<compile_context>
chip_gen: v7x
topology: tpu7x:2x2x1
jax: 0.10.0
libtpu: 0.0.40
codegen_flags: <defaults>
</compile_context>

<pallas_src>
import functools

import jax
import jax.numpy as jnp
from jax import lax
from jax.experimental import pallas as pl
from jax.experimental.pallas import tpu as pltpu

_CP = 8        # channels packed per slab row block (sublane-friendly)
_LANES = 128   # padded image-row width (lane dimension)


# ------------------------------ Pallas kernel ------------------------------ #

def _fused_basic_attention_kernel(x_ref, w1_ref, b1_ref, w2_ref, b2_ref,
                                  w3_ref, b3_ref, s_ref, mask_ref,
                                  o_ref, act_ref, *, h):
    rows = _CP * h                     # rows of one output slab (y-major, channel-minor)
    f32 = jnp.float32

    def conv3x3(src_ref, w_taps_ref, b_ref):
        acc = jnp.zeros((rows, _LANES), f32)
        for dy in range(3):
            # 8-sublane-aligned row tap of the zero-haloed slab
            a_dy = src_ref[pl.ds(dy * _CP, rows), :].astype(jnp.bfloat16)
            for dx in range(3):
                t = dy * 3 + dx
                if dx == 1:            # no column shift
                    shifted = a_dy
                else:                  # +-1 column shift via 0/1 shift matrix (MXU)
                    shifted = jnp.dot(a_dy, s_ref[dx],
                                      preferred_element_type=f32
                                      ).astype(jnp.bfloat16)
                # block-diagonal (I_H (x) W_tap) channel-mixing matmul
                acc = acc + jnp.dot(w_taps_ref[t], shifted,
                                    preferred_element_type=f32)
        return acc + b_ref[...]

    mask = mask_ref[...]                                        # (1, 128)

    # conv3x3 #1 + ReLU (pad ring re-zeroed by the interior mask)
    y1 = jnp.maximum(conv3x3(x_ref, w1_ref, b1_ref), 0.0) * mask

    # re-halo the layer-1 output in VMEM so layer 2 can take row taps
    act_ref[...] = jnp.zeros_like(act_ref)
    act_ref[pl.ds(_CP, rows), :] = y1

    # conv3x3 #2 + ReLU
    y2 = jnp.maximum(conv3x3(act_ref, w2_ref, b2_ref), 0.0)

    # conv1x1 + Sigmoid
    y3 = jnp.dot(w3_ref[...], y2.astype(jnp.bfloat16),
                 preferred_element_type=f32) + b3_ref[...]
    o_ref[...] = (1.0 / (1.0 + jnp.exp(-y3))).astype(o_ref.dtype)


# ------------------------------ host wrapper ------------------------------- #

def basic_attention_forward(x_nchw, params):
    n, cin, hh, ww = x_nchw.shape
    catt = params["w3"].shape[0]
    assert cin <= _CP and catt <= _CP, "channel counts must fit one 8-channel block"
    assert ww + 2 <= _LANES, "image width must fit a single 128-lane row"
    hp = hh + 2
    rows_in = _CP * hp
    rows_out = _CP * hh

    # (N, C, H, W) -> zero-padded slab (N, 8*(H+2), 128)
    xp = jnp.pad(x_nchw, ((0, 0), (0, _CP - cin), (1, 1), (1, 1)))       # (N,8,Hp,Wp)
    xp = jnp.pad(xp, ((0, 0), (0, 0), (0, 0), (0, _LANES - (ww + 2))))   # (N,8,Hp,128)
    xp = jnp.transpose(xp, (0, 2, 1, 3)).reshape(n, rows_in, _LANES)

    eye = jnp.eye(hh, dtype=jnp.float32)

    def tap_weights(w_oihw):                       # OIHW -> (9, 8H, 8H) bf16
        cout, cin_ = w_oihw.shape[0], w_oihw.shape[1]
        w8 = jnp.zeros((9, _CP, _CP), jnp.float32)
        w8 = w8.at[:, :cout, :cin_].set(
            jnp.transpose(w_oihw, (2, 3, 0, 1)).reshape(9, cout, cin_))
        big = jnp.einsum("yz,tab->tyazb", eye, w8)
        return big.reshape(9, rows_out, rows_out).astype(jnp.bfloat16)

    def bias_col(b):
        bp = jnp.zeros((_CP,), jnp.float32).at[:b.shape[0]].set(b)
        return jnp.tile(bp, hh).reshape(rows_out, 1)

    w1 = tap_weights(params["w1"]); b1 = bias_col(params["b1"])
    w2 = tap_weights(params["w2"]); b2 = bias_col(params["b2"])
    w3p = jnp.zeros((_CP, _CP), jnp.float32).at[:catt, :cin].set(
        params["w3"].reshape(catt, cin))
    w3 = jnp.einsum("yz,ab->yazb", eye, w3p).reshape(
        rows_out, rows_out).astype(jnp.bfloat16)
    b3 = bias_col(params["b3"])

    # column shift matrices: dx=0 reads x-1, dx=1 identity (skipped), dx=2 reads x+1
    shift = jnp.stack([jnp.eye(_LANES, k=1 - dx, dtype=jnp.float32)
                       for dx in range(3)]).astype(jnp.bfloat16)
    # interior (non-padding) columns of the 128-wide slab row
    mask = jnp.zeros((1, _LANES), jnp.float32).at[:, 1:ww + 1].set(1.0)

    kernel = functools.partial(_fused_basic_attention_kernel, h=hh)
    out_slab = pl.pallas_call(
        kernel,
        out_shape=jax.ShapeDtypeStruct((n, rows_out, _LANES), jnp.float32),
        grid=(n,),
        in_specs=[
            pl.BlockSpec((None, rows_in, _LANES), lambda i: (i, 0, 0)),   # x slab
            pl.BlockSpec((9, rows_out, rows_out), lambda i: (0, 0, 0)),   # w1 taps
            pl.BlockSpec((rows_out, 1), lambda i: (0, 0)),                # b1
            pl.BlockSpec((9, rows_out, rows_out), lambda i: (0, 0, 0)),   # w2 taps
            pl.BlockSpec((rows_out, 1), lambda i: (0, 0)),                # b2
            pl.BlockSpec((rows_out, rows_out), lambda i: (0, 0)),         # w3 (1x1)
            pl.BlockSpec((rows_out, 1), lambda i: (0, 0)),                # b3
            pl.BlockSpec((3, _LANES, _LANES), lambda i: (0, 0, 0)),       # column shifts
            pl.BlockSpec((1, _LANES), lambda i: (0, 0)),                  # interior mask
        ],
        out_specs=pl.BlockSpec((None, rows_out, _LANES), lambda i: (i, 0, 0)),
        scratch_shapes=[pltpu.VMEM((rows_in, _LANES), jnp.float32)],
        compiler_params=pltpu.CompilerParams(
            dimension_semantics=("parallel",)),
    )(xp, w1, b1, w2, b2, w3, b3, shift, mask)

    # (N, 8H, 128) slab -> (N, Catt, H, W) NCHW
    out = out_slab.reshape(n, hh, _CP, _LANES)
    out = jnp.transpose(out, (0, 2, 1, 3))[:, :catt, :, 1:ww + 1]
    return out


# --------------------------- deterministic params -------------------------- #

def init_params(key, in_channels, att_channels, scale=0.1):
    k = jax.random.split(key, 6)
    return {
        "w1": scale * jax.random.normal(k[0], (in_channels, in_channels, 3, 3), jnp.float32),
        "b1": scale * jax.random.normal(k[1], (in_channels,), jnp.float32),
        "w2": scale * jax.random.normal(k[2], (in_channels, in_channels, 3, 3), jnp.float32),
        "b2": scale * jax.random.normal(k[3], (in_channels,), jnp.float32),
        "w3": scale * jax.random.normal(k[4], (att_channels, in_channels, 1, 1), jnp.float32),
        "b3": scale * jax.random.normal(k[5], (att_channels,), jnp.float32),
    }


# ------------------------------ pure-JAX reference ------------------------- #

def basic_attention_reference(x, params):
    dn = ("NCHW", "OIHW", "NCHW")
    y = lax.conv_general_dilated(x, params["w1"], (1, 1), "SAME",
                                 dimension_numbers=dn,
                                 precision=lax.Precision.HIGHEST)
    y = jnp.maximum(y + params["b1"][None, :, None, None], 0.0)
    y = lax.conv_general_dilated(y, params["w2"], (1, 1), "SAME",
                                 dimension_numbers=dn,
                                 precision=lax.Precision.HIGHEST)
    y = jnp.maximum(y + params["b2"][None, :, None, None], 0.0)
    y = lax.conv_general_dilated(y, params["w3"], (1, 1), "VALID",
                                 dimension_numbers=dn,
                                 precision=lax.Precision.HIGHEST)
    y = y + params["b3"][None, :, None, None]
    return jax.nn.sigmoid(y)


# ----------------------------------- main ---------------------------------- #

if __name__ == "__main__":
    in_channels, att_channels = 4, 8
    batch, height, width = 2, 16, 16

    key = jax.random.PRNGKey(0)
    kx, kp = jax.random.split(key)
    x = jax.random.normal(kx, (batch, in_channels, height, width), jnp.float32)
    params = init_params(kp, in_channels, att_channels)

    out = jax.jit(basic_attention_forward)(x, params)
    out = jax.block_until_ready(out)
    assert out.shape == (batch, att_channels, height, width), out.shape

    ref = basic_attention_reference(x, params)
    max_err = float(jnp.max(jnp.abs(out - ref)))
    assert jnp.allclose(out, ref, atol=5e-3, rtol=5e-3), max_err

    print("KERNEL_OK")
</pallas_src>

<mosaic_0001>
module attributes {stable_mosaic.version = 11 : i64} {
  func.func @_fused_basic_attention_kernel(%arg0: i32, %arg1: memref<1x144x128xf32, #tpu.memory_space<vmem>>, %arg2: memref<9x128x128xbf16, #tpu.memory_space<vmem>>, %arg3: memref<128x1xf32, #tpu.memory_space<vmem>>, %arg4: memref<9x128x128xbf16, #tpu.memory_space<vmem>>, %arg5: memref<128x1xf32, #tpu.memory_space<vmem>>, %arg6: memref<128x128xbf16, #tpu.memory_space<vmem>>, %arg7: memref<128x1xf32, #tpu.memory_space<vmem>>, %arg8: memref<3x128x128xbf16, #tpu.memory_space<vmem>>, %arg9: memref<1x128xf32, #tpu.memory_space<vmem>>, %arg10: memref<1x128x128xf32, #tpu.memory_space<vmem>>, %arg11: memref<144x128xf32, #tpu.memory_space<vmem>>) attributes {dimension_semantics = [#tpu.dimension_semantics<parallel>], iteration_bounds = array<i64: 2>, scalar_prefetch = 0 : i64, scratch_operands = 1 : i64, tpu.core_type = #tpu.core_type<tc>, window_params = [{transform_indices = @transform_0, window_bounds = array<i64: 1, 144, 128>}, {pipeline_mode = #tpu.pipeline_mode<synchronous>, transform_indices = @transform_1, window_bounds = array<i64: 9, 128, 128>}, {pipeline_mode = #tpu.pipeline_mode<synchronous>, transform_indices = @transform_2, window_bounds = array<i64: 128, 1>}, {pipeline_mode = #tpu.pipeline_mode<synchronous>, transform_indices = @transform_3, window_bounds = array<i64: 9, 128, 128>}, {pipeline_mode = #tpu.pipeline_mode<synchronous>, transform_indices = @transform_4, window_bounds = array<i64: 128, 1>}, {pipeline_mode = #tpu.pipeline_mode<synchronous>, transform_indices = @transform_5, window_bounds = array<i64: 128, 128>}, {pipeline_mode = #tpu.pipeline_mode<synchronous>, transform_indices = @transform_6, window_bounds = array<i64: 128, 1>}, {pipeline_mode = #tpu.pipeline_mode<synchronous>, transform_indices = @transform_7, window_bounds = array<i64: 3, 128, 128>}, {pipeline_mode = #tpu.pipeline_mode<synchronous>, transform_indices = @transform_8, window_bounds = array<i64: 1, 128>}, {transform_indices = @transform_9, window_bounds = array<i64: 1, 128, 128>}]} {
    %c0 = arith.constant 0 : index
    %c0_0 = arith.constant 0 : index
    %0 = vector.load %arg9[%c0, %c0_0] : memref<1x128xf32, #tpu.memory_space<vmem>>, vector<1x128xf32>
    %cst = arith.constant 0.000000e+00 : f32
    %1 = vector.broadcast %cst : f32 to vector<128x128xf32>
    %c0_1 = arith.constant 0 : index
    %c0_2 = arith.constant 0 : index
    %c0_3 = arith.constant 0 : index
    %2 = vector.load %arg1[%c0_1, %c0_2, %c0_3] : memref<1x144x128xf32, #tpu.memory_space<vmem>>, vector<1x128x128xf32>
    %3 = vector.shape_cast %2 : vector<1x128x128xf32> to vector<128x128xf32>
    %4 = arith.truncf %3 : vector<128x128xf32> to vector<128x128xbf16>
    %c0_4 = arith.constant 0 : index
    %c0_5 = arith.constant 0 : index
    %c0_6 = arith.constant 0 : index
    %5 = vector.load %arg8[%c0_4, %c0_5, %c0_6] : memref<3x128x128xbf16, #tpu.memory_space<vmem>>, vector<1x128x128xbf16>
    %6 = vector.shape_cast %5 : vector<1x128x128xbf16> to vector<128x128xbf16>
    %cst_7 = arith.constant dense<0.000000e+00> : vector<128x128xf32>
    %7 = tpu.matmul %4, %6, %cst_7 {dimension_numbers = #tpu.dot_dimension_numbers<[1], [0], [0], [1], [0, 0, 1, 1], [], []>} : vector<128x128xbf16>, vector<128x128xbf16>, vector<128x128xf32> -> vector<128x128xf32>
    %8 = arith.truncf %7 : vector<128x128xf32> to vector<128x128xbf16>
    %c0_8 = arith.constant 0 : index
    %c0_9 = arith.constant 0 : index
    %c0_10 = arith.constant 0 : index
    %9 = vector.load %arg2[%c0_8, %c0_9, %c0_10] : memref<9x128x128xbf16, #tpu.memory_space<vmem>>, vector<1x128x128xbf16>
    %10 = vector.shape_cast %9 : vector<1x128x128xbf16> to vector<128x128xbf16>
    %cst_11 = arith.constant dense<0.000000e+00> : vector<128x128xf32>
    %11 = tpu.matmul %10, %8, %cst_11 {dimension_numbers = #tpu.dot_dimension_numbers<[1], [0], [0], [1], [0, 0, 1, 1], [], []>} : vector<128x128xbf16>, vector<128x128xbf16>, vector<128x128xf32> -> vector<128x128xf32>
    %12 = arith.addf %1, %11 : vector<128x128xf32>
    %c1 = arith.constant 1 : index
    %c0_12 = arith.constant 0 : index
    %c0_13 = arith.constant 0 : index
    %13 = vector.load %arg2[%c1, %c0_12, %c0_13] : memref<9x128x128xbf16, #tpu.memory_space<vmem>>, vector<1x128x128xbf16>
    %14 = vector.shape_cast %13 : vector<1x128x128xbf16> to vector<128x128xbf16>
    %cst_14 = arith.constant dense<0.000000e+00> : vector<128x128xf32>
    %15 = tpu.matmul %14, %4, %cst_14 {dimension_numbers = #tpu.dot_dimension_numbers<[1], [0], [0], [1], [0, 0, 1, 1], [], []>} : vector<128x128xbf16>, vector<128x128xbf16>, vector<128x128xf32> -> vector<128x128xf32>
    %16 = arith.addf %12, %15 : vector<128x128xf32>
    %c2 = arith.constant 2 : index
    %c0_15 = arith.constant 0 : index
    %c0_16 = arith.constant 0 : index
    %17 = vector.load %arg8[%c2, %c0_15, %c0_16] : memref<3x128x128xbf16, #tpu.memory_space<vmem>>, vector<1x128x128xbf16>
    %18 = vector.shape_cast %17 : vector<1x128x128xbf16> to vector<128x128xbf16>
    %cst_17 = arith.constant dense<0.000000e+00> : vector<128x128xf32>
    %19 = tpu.matmul %4, %18, %cst_17 {dimension_numbers = #tpu.dot_dimension_numbers<[1], [0], [0], [1], [0, 0, 1, 1], [], []>} : vector<128x128xbf16>, vector<128x128xbf16>, vector<128x128xf32> -> vector<128x128xf32>
    %20 = arith.truncf %19 : vector<128x128xf32> to vector<128x128xbf16>
    %c2_18 = arith.constant 2 : index
    %c0_19 = arith.constant 0 : index
    %c0_20 = arith.constant 0 : index
    %21 = vector.load %arg2[%c2_18, %c0_19, %c0_20] : memref<9x128x128xbf16, #tpu.memory_space<vmem>>, vector<1x128x128xbf16>
    %22 = vector.shape_cast %21 : vector<1x128x128xbf16> to vector<128x128xbf16>
    %cst_21 = arith.constant dense<0.000000e+00> : vector<128x128xf32>
    %23 = tpu.matmul %22, %20, %cst_21 {dimension_numbers = #tpu.dot_dimension_numbers<[1], [0], [0], [1], [0, 0, 1, 1], [], []>} : vector<128x128xbf16>, vector<128x128xbf16>, vector<128x128xf32> -> vector<128x128xf32>
    %24 = arith.addf %16, %23 : vector<128x128xf32>
    %c0_22 = arith.constant 0 : index
    %c8 = arith.constant 8 : index
    %c0_23 = arith.constant 0 : index
    %25 = vector.load %arg1[%c0_22, %c8, %c0_23] : memref<1x144x128xf32, #tpu.memory_space<vmem>>, vector<1x128x128xf32>
    %26 = vector.shape_cast %25 : vector<1x128x128xf32> to vector<128x128xf32>
    %27 = arith.truncf %26 : vector<128x128xf32> to vector<128x128xbf16>
    %c0_24 = arith.constant 0 : index
    %c0_25 = arith.constant 0 : index
    %c0_26 = arith.constant 0 : index
    %28 = vector.load %arg8[%c0_24, %c0_25, %c0_26] : memref<3x128x128xbf16, #tpu.memory_space<vmem>>, vector<1x128x128xbf16>
    %29 = vector.shape_cast %28 : vector<1x128x128xbf16> to vector<128x128xbf16>
    %cst_27 = arith.constant dense<0.000000e+00> : vector<128x128xf32>
    %30 = tpu.matmul %27, %29, %cst_27 {dimension_numbers = #tpu.dot_dimension_numbers<[1], [0], [0], [1], [0, 0, 1, 1], [], []>} : vector<128x128xbf16>, vector<128x128xbf16>, vector<128x128xf32> -> vector<128x128xf32>
    %31 = arith.truncf %30 : vector<128x128xf32> to vector<128x128xbf16>
    %c3 = arith.constant 3 : index
    %c0_28 = arith.constant 0 : index
    %c0_29 = arith.constant 0 : index
    %32 = vector.load %arg2[%c3, %c0_28, %c0_29] : memref<9x128x128xbf16, #tpu.memory_space<vmem>>, vector<1x128x128xbf16>
    %33 = vector.shape_cast %32 : vector<1x128x128xbf16> to vector<128x128xbf16>
    %cst_30 = arith.constant dense<0.000000e+00> : vector<128x128xf32>
    %34 = tpu.matmul %33, %31, %cst_30 {dimension_numbers = #tpu.dot_dimension_numbers<[1], [0], [0], [1], [0, 0, 1, 1], [], []>} : vector<128x128xbf16>, vector<128x128xbf16>, vector<128x128xf32> -> vector<128x128xf32>
    %35 = arith.addf %24, %34 : vector<128x128xf32>
    %c4 = arith.constant 4 : index
    %c0_31 = arith.constant 0 : index
    %c0_32 = arith.constant 0 : index
    %36 = vector.load %arg2[%c4, %c0_31, %c0_32] : memref<9x128x128xbf16, #tpu.memory_space<vmem>>, vector<1x128x128xbf16>
    %37 = vector.shape_cast %36 : vector<1x128x128xbf16> to vector<128x128xbf16>
    %cst_33 = arith.constant dense<0.000000e+00> : vector<128x128xf32>
    %38 = tpu.matmul %37, %27, %cst_33 {dimension_numbers = #tpu.dot_dimension_numbers<[1], [0], [0], [1], [0, 0, 1, 1], [], []>} : vector<128x128xbf16>, vector<128x128xbf16>, vector<128x128xf32> -> vector<128x128xf32>
    %39 = arith.addf %35, %38 : vector<128x128xf32>
    %c2_34 = arith.constant 2 : index
    %c0_35 = arith.constant 0 : index
    %c0_36 = arith.constant 0 : index
    %40 = vector.load %arg8[%c2_34, %c0_35, %c0_36] : memref<3x128x128xbf16, #tpu.memory_space<vmem>>, vector<1x128x128xbf16>
    %41 = vector.shape_cast %40 : vector<1x128x128xbf16> to vector<128x128xbf16>
    %cst_37 = arith.constant dense<0.000000e+00> : vector<128x128xf32>
    %42 = tpu.matmul %27, %41, %cst_37 {dimension_numbers = #tpu.dot_dimension_numbers<[1], [0], [0], [1], [0, 0, 1, 1], [], []>} : vector<128x128xbf16>, vector<128x128xbf16>, vector<128x128xf32> -> vector<128x128xf32>
    %43 = arith.truncf %42 : vector<128x128xf32> to vector<128x128xbf16>
    %c5 = arith.constant 5 : index
    %c0_38 = arith.constant 0 : index
    %c0_39 = arith.constant 0 : index
    %44 = vector.load %arg2[%c5, %c0_38, %c0_39] : memref<9x128x128xbf16, #tpu.memory_space<vmem>>, vector<1x128x128xbf16>
    %45 = vector.shape_cast %44 : vector<1x128x128xbf16> to vector<128x128xbf16>
    %cst_40 = arith.constant dense<0.000000e+00> : vector<128x128xf32>
    %46 = tpu.matmul %45, %43, %cst_40 {dimension_numbers = #tpu.dot_dimension_numbers<[1], [0], [0], [1], [0, 0, 1, 1], [], []>} : vector<128x128xbf16>, vector<128x128xbf16>, vector<128x128xf32> -> vector<128x128xf32>
    %47 = arith.addf %39, %46 : vector<128x128xf32>
    %c0_41 = arith.constant 0 : index
    %c16 = arith.constant 16 : index
    %c0_42 = arith.constant 0 : index
    %48 = vector.load %arg1[%c0_41, %c16, %c0_42] : memref<1x144x128xf32, #tpu.memory_space<vmem>>, vector<1x128x128xf32>
    %49 = vector.shape_cast %48 : vector<1x128x128xf32> to vector<128x128xf32>
    %50 = arith.truncf %49 : vector<128x128xf32> to vector<128x128xbf16>
    %c0_43 = arith.constant 0 : index
    %c0_44 = arith.constant 0 : index
    %c0_45 = arith.constant 0 : index
    %51 = vector.load %arg8[%c0_43, %c0_44, %c0_45] : memref<3x128x128xbf16, #tpu.memory_space<vmem>>, vector<1x128x128xbf16>
    %52 = vector.shape_cast %51 : vector<1x128x128xbf16> to vector<128x128xbf16>
    %cst_46 = arith.constant dense<0.000000e+00> : vector<128x128xf32>
    %53 = tpu.matmul %50, %52, %cst_46 {dimension_numbers = #tpu.dot_dimension_numbers<[1], [0], [0], [1], [0, 0, 1, 1], [], []>} : vector<128x128xbf16>, vector<128x128xbf16>, vector<128x128xf32> -> vector<128x128xf32>
    %54 = arith.truncf %53 : vector<128x128xf32> to vector<128x128xbf16>
    %c6 = arith.constant 6 : index
    %c0_47 = arith.constant 0 : index
    %c0_48 = arith.constant 0 : index
    %55 = vector.load %arg2[%c6, %c0_47, %c0_48] : memref<9x128x128xbf16, #tpu.memory_space<vmem>>, vector<1x128x128xbf16>
    %56 = vector.shape_cast %55 : vector<1x128x128xbf16> to vector<128x128xbf16>
    %cst_49 = arith.constant dense<0.000000e+00> : vector<128x128xf32>
    %57 = tpu.matmul %56, %54, %cst_49 {dimension_numbers = #tpu.dot_dimension_numbers<[1], [0], [0], [1], [0, 0, 1, 1], [], []>} : vector<128x128xbf16>, vector<128x128xbf16>, vector<128x128xf32> -> vector<128x128xf32>
    %58 = arith.addf %47, %57 : vector<128x128xf32>
    %c7 = arith.constant 7 : index
    %c0_50 = arith.constant 0 : index
    %c0_51 = arith.constant 0 : index
    %59 = vector.load %arg2[%c7, %c0_50, %c0_51] : memref<9x128x128xbf16, #tpu.memory_space<vmem>>, vector<1x128x128xbf16>
    %60 = vector.shape_cast %59 : vector<1x128x128xbf16> to vector<128x128xbf16>
    %cst_52 = arith.constant dense<0.000000e+00> : vector<128x128xf32>
    %61 = tpu.matmul %60, %50, %cst_52 {dimension_numbers = #tpu.dot_dimension_numbers<[1], [0], [0], [1], [0, 0, 1, 1], [], []>} : vector<128x128xbf16>, vector<128x128xbf16>, vector<128x128xf32> -> vector<128x128xf32>
    %62 = arith.addf %58, %61 : vector<128x128xf32>
    %c2_53 = arith.constant 2 : index
    %c0_54 = arith.constant 0 : index
    %c0_55 = arith.constant 0 : index
    %63 = vector.load %arg8[%c2_53, %c0_54, %c0_55] : memref<3x128x128xbf16, #tpu.memory_space<vmem>>, vector<1x128x128xbf16>
    %64 = vector.shape_cast %63 : vector<1x128x128xbf16> to vector<128x128xbf16>
    %cst_56 = arith.constant dense<0.000000e+00> : vector<128x128xf32>
    %65 = tpu.matmul %50, %64, %cst_56 {dimension_numbers = #tpu.dot_dimension_numbers<[1], [0], [0], [1], [0, 0, 1, 1], [], []>} : vector<128x128xbf16>, vector<128x128xbf16>, vector<128x128xf32> -> vector<128x128xf32>
    %66 = arith.truncf %65 : vector<128x128xf32> to vector<128x128xbf16>
    %c8_57 = arith.constant 8 : index
    %c0_58 = arith.constant 0 : index
    %c0_59 = arith.constant 0 : index
    %67 = vector.load %arg2[%c8_57, %c0_58, %c0_59] : memref<9x128x128xbf16, #tpu.memory_space<vmem>>, vector<1x128x128xbf16>
    %68 = vector.shape_cast %67 : vector<1x128x128xbf16> to vector<128x128xbf16>
    %cst_60 = arith.constant dense<0.000000e+00> : vector<128x128xf32>
    %69 = tpu.matmul %68, %66, %cst_60 {dimension_numbers = #tpu.dot_dimension_numbers<[1], [0], [0], [1], [0, 0, 1, 1], [], []>} : vector<128x128xbf16>, vector<128x128xbf16>, vector<128x128xf32> -> vector<128x128xf32>
    %70 = arith.addf %62, %69 : vector<128x128xf32>
    %c0_61 = arith.constant 0 : index
    %c0_62 = arith.constant 0 : index
    %71 = vector.load %arg3[%c0_61, %c0_62] : memref<128x1xf32, #tpu.memory_space<vmem>>, vector<128x1xf32>
    %72 = vector.broadcast %71 : vector<128x1xf32> to vector<128x128xf32>
    %73 = arith.addf %70, %72 : vector<128x128xf32>
    %cst_63 = arith.constant 0.000000e+00 : f32
    %74 = vector.broadcast %cst_63 : f32 to vector<128x128xf32>
    %75 = arith.maximumf %73, %74 : vector<128x128xf32>
    %76 = vector.broadcast %0 : vector<1x128xf32> to vector<128x128xf32>
    %77 = arith.mulf %75, %76 : vector<128x128xf32>
    %cst_64 = arith.constant 0.000000e+00 : f32
    %78 = vector.broadcast %cst_64 : f32 to vector<144x128xf32>
    %c0_65 = arith.constant 0 : index
    %c0_66 = arith.constant 0 : index
    %79 = vector.load %arg11[%c0_65, %c0_66] : memref<144x128xf32, #tpu.memory_space<vmem>>, vector<144x128xf32>
    tpu.vector_store %arg11[%c0_65, %c0_66], %78 {strides = array<i32>} : memref<144x128xf32, #tpu.memory_space<vmem>>, vector<144x128xf32>,
    %c8_67 = arith.constant 8 : index
    %c0_68 = arith.constant 0 : index
    %80 = vector.load %arg11[%c8_67, %c0_68] : memref<144x128xf32, #tpu.memory_space<vmem>>, vector<128x128xf32>
    tpu.vector_store %arg11[%c8_67, %c0_68], %77 {strides = array<i32>} : memref<144x128xf32, #tpu.memory_space<vmem>>, vector<128x128xf32>,
    %cst_69 = arith.constant 0.000000e+00 : f32
    %81 = vector.broadcast %cst_69 : f32 to vector<128x128xf32>
    %c0_70 = arith.constant 0 : index
    %c0_71 = arith.constant 0 : index
    %82 = vector.load %arg11[%c0_70, %c0_71] : memref<144x128xf32, #tpu.memory_space<vmem>>, vector<128x128xf32>
    %83 = arith.truncf %82 : vector<128x128xf32> to vector<128x128xbf16>
    %c0_72 = arith.constant 0 : index
    %c0_73 = arith.constant 0 : index
    %c0_74 = arith.constant 0 : index
    %84 = vector.load %arg8[%c0_72, %c0_73, %c0_74] : memref<3x128x128xbf16, #tpu.memory_space<vmem>>, vector<1x128x128xbf16>
    %85 = vector.shape_cast %84 : vector<1x128x128xbf16> to vector<128x128xbf16>
    %cst_75 = arith.constant dense<0.000000e+00> : vector<128x128xf32>
    %86 = tpu.matmul %83, %85, %cst_75 {dimension_numbers = #tpu.dot_dimension_numbers<[1], [0], [0], [1], [0, 0, 1, 1], [], []>} : vector<128x128xbf16>, vector<128x128xbf16>, vector<128x128xf32> -> vector<128x128xf32>
    %87 = arith.truncf %86 : vector<128x128xf32> to vector<128x128xbf16>
    %c0_76 = arith.constant 0 : index
    %c0_77 = arith.constant 0 : index
    %c0_78 = arith.constant 0 : index
    %88 = vector.load %arg4[%c0_76, %c0_77, %c0_78] : memref<9x128x128xbf16, #tpu.memory_space<vmem>>, vector<1x128x128xbf16>
    %89 = vector.shape_cast %88 : vector<1x128x128xbf16> to vector<128x128xbf16>
    %cst_79 = arith.constant dense<0.000000e+00> : vector<128x128xf32>
    %90 = tpu.matmul %89, %87, %cst_79 {dimension_numbers = #tpu.dot_dimension_numbers<[1], [0], [0], [1], [0, 0, 1, 1], [], []>} : vector<128x128xbf16>, vector<128x128xbf16>, vector<128x128xf32> -> vector<128x128xf32>
    %91 = arith.addf %81, %90 : vector<128x128xf32>
    %c1_80 = arith.constant 1 : index
    %c0_81 = arith.constant 0 : index
    %c0_82 = arith.constant 0 : index
    %92 = vector.load %arg4[%c1_80, %c0_81, %c0_82] : memref<9x128x128xbf16, #tpu.memory_space<vmem>>, vector<1x128x128xbf16>
    %93 = vector.shape_cast %92 : vector<1x128x128xbf16> to vector<128x128xbf16>
    %cst_83 = arith.constant dense<0.000000e+00> : vector<128x128xf32>
    %94 = tpu.matmul %93, %83, %cst_83 {dimension_numbers = #tpu.dot_dimension_numbers<[1], [0], [0], [1], [0, 0, 1, 1], [], []>} : vector<128x128xbf16>, vector<128x128xbf16>, vector<128x128xf32> -> vector<128x128xf32>
    %95 = arith.addf %91, %94 : vector<128x128xf32>
    %c2_84 = arith.constant 2 : index
    %c0_85 = arith.constant 0 : index
    %c0_86 = arith.constant 0 : index
    %96 = vector.load %arg8[%c2_84, %c0_85, %c0_86] : memref<3x128x128xbf16, #tpu.memory_space<vmem>>, vector<1x128x128xbf16>
    %97 = vector.shape_cast %96 : vector<1x128x128xbf16> to vector<128x128xbf16>
    %cst_87 = arith.constant dense<0.000000e+00> : vector<128x128xf32>
    %98 = tpu.matmul %83, %97, %cst_87 {dimension_numbers = #tpu.dot_dimension_numbers<[1], [0], [0], [1], [0, 0, 1, 1], [], []>} : vector<128x128xbf16>, vector<128x128xbf16>, vector<128x128xf32> -> vector<128x128xf32>
    %99 = arith.truncf %98 : vector<128x128xf32> to vector<128x128xbf16>
    %c2_88 = arith.constant 2 : index
    %c0_89 = arith.constant 0 : index
    %c0_90 = arith.constant 0 : index
    %100 = vector.load %arg4[%c2_88, %c0_89, %c0_90] : memref<9x128x128xbf16, #tpu.memory_space<vmem>>, vector<1x128x128xbf16>
    %101 = vector.shape_cast %100 : vector<1x128x128xbf16> to vector<128x128xbf16>
    %cst_91 = arith.constant dense<0.000000e+00> : vector<128x128xf32>
    %102 = tpu.matmul %101, %99, %cst_91 {dimension_numbers = #tpu.dot_dimension_numbers<[1], [0], [0], [1], [0, 0, 1, 1], [], []>} : vector<128x128xbf16>, vector<128x128xbf16>, vector<128x128xf32> -> vector<128x128xf32>
    %103 = arith.addf %95, %102 : vector<128x128xf32>
    %c8_92 = arith.constant 8 : index
    %c0_93 = arith.constant 0 : index
    %104 = vector.load %arg11[%c8_92, %c0_93] : memref<144x128xf32, #tpu.memory_space<vmem>>, vector<128x128xf32>
    %105 = arith.truncf %104 : vector<128x128xf32> to vector<128x128xbf16>
    %c0_94 = arith.constant 0 : index
    %c0_95 = arith.constant 0 : index
    %c0_96 = arith.constant 0 : index
    %106 = vector.load %arg8[%c0_94, %c0_95, %c0_96] : memref<3x128x128xbf16, #tpu.memory_space<vmem>>, vector<1x128x128xbf16>
    %107 = vector.shape_cast %106 : vector<1x128x128xbf16> to vector<128x128xbf16>
    %cst_97 = arith.constant dense<0.000000e+00> : vector<128x128xf32>
    %108 = tpu.matmul %105, %107, %cst_97 {dimension_numbers = #tpu.dot_dimension_numbers<[1], [0], [0], [1], [0, 0, 1, 1], [], []>} : vector<128x128xbf16>, vector<128x128xbf16>, vector<128x128xf32> -> vector<128x128xf32>
    %109 = arith.truncf %108 : vector<128x128xf32> to vector<128x128xbf16>
    %c3_98 = arith.constant 3 : index
    %c0_99 = arith.constant 0 : index
    %c0_100 = arith.constant 0 : index
    %110 = vector.load %arg4[%c3_98, %c0_99, %c0_100] : memref<9x128x128xbf16, #tpu.memory_space<vmem>>, vector<1x128x128xbf16>
    %111 = vector.shape_cast %110 : vector<1x128x128xbf16> to vector<128x128xbf16>
    %cst_101 = arith.constant dense<0.000000e+00> : vector<128x128xf32>
    %112 = tpu.matmul %111, %109, %cst_101 {dimension_numbers = #tpu.dot_dimension_numbers<[1], [0], [0], [1], [0, 0, 1, 1], [], []>} : vector<128x128xbf16>, vector<128x128xbf16>, vector<128x128xf32> -> vector<128x128xf32>
    %113 = arith.addf %103, %112 : vector<128x128xf32>
    %c4_102 = arith.constant 4 : index
    %c0_103 = arith.constant 0 : index
    %c0_104 = arith.constant 0 : index
    %114 = vector.load %arg4[%c4_102, %c0_103, %c0_104] : memref<9x128x128xbf16, #tpu.memory_space<vmem>>, vector<1x128x128xbf16>
    %115 = vector.shape_cast %114 : vector<1x128x128xbf16> to vector<128x128xbf16>
    %cst_105 = arith.constant dense<0.000000e+00> : vector<128x128xf32>
    %116 = tpu.matmul %115, %105, %cst_105 {dimension_numbers = #tpu.dot_dimension_numbers<[1], [0], [0], [1], [0, 0, 1, 1], [], []>} : vector<128x128xbf16>, vector<128x128xbf16>, vector<128x128xf32> -> vector<128x128xf32>
    %117 = arith.addf %113, %116 : vector<128x128xf32>
    %c2_106 = arith.constant 2 : index
    %c0_107 = arith.constant 0 : index
    %c0_108 = arith.constant 0 : index
    %118 = vector.load %arg8[%c2_106, %c0_107, %c0_108] : memref<3x128x128xbf16, #tpu.memory_space<vmem>>, vector<1x128x128xbf16>
    %119 = vector.shape_cast %118 : vector<1x128x128xbf16> to vector<128x128xbf16>
    %cst_109 = arith.constant dense<0.000000e+00> : vector<128x128xf32>
    %120 = tpu.matmul %105, %119, %cst_109 {dimension_numbers = #tpu.dot_dimension_numbers<[1], [0], [0], [1], [0, 0, 1, 1], [], []>} : vector<128x128xbf16>, vector<128x128xbf16>, vector<128x128xf32> -> vector<128x128xf32>
    %121 = arith.truncf %120 : vector<128x128xf32> to vector<128x128xbf16>
    %c5_110 = arith.constant 5 : index
    %c0_111 = arith.constant 0 : index
    %c0_112 = arith.constant 0 : index
    %122 = vector.load %arg4[%c5_110, %c0_111, %c0_112] : memref<9x128x128xbf16, #tpu.memory_space<vmem>>, vector<1x128x128xbf16>
    %123 = vector.shape_cast %122 : vector<1x128x128xbf16> to vector<128x128xbf16>
    %cst_113 = arith.constant dense<0.000000e+00> : vector<128x128xf32>
    %124 = tpu.matmul %123, %121, %cst_113 {dimension_numbers = #tpu.dot_dimension_numbers<[1], [0], [0], [1], [0, 0, 1, 1], [], []>} : vector<128x128xbf16>, vector<128x128xbf16>, vector<128x128xf32> -> vector<128x128xf32>
    %125 = arith.addf %117, %124 : vector<128x128xf32>
    %c16_114 = arith.constant 16 : index
    %c0_115 = arith.constant 0 : index
    %126 = vector.load %arg11[%c16_114, %c0_115] : memref<144x128xf32, #tpu.memory_space<vmem>>, vector<128x128xf32>
    %127 = arith.truncf %126 : vector<128x128xf32> to vector<128x128xbf16>
    %c0_116 = arith.constant 0 : index
    %c0_117 = arith.constant 0 : index
    %c0_118 = arith.constant 0 : index
    %128 = vector.load %arg8[%c0_116, %c0_117, %c0_118] : memref<3x128x128xbf16, #tpu.memory_space<vmem>>, vector<1x128x128xbf16>
    %129 = vector.shape_cast %128 : vector<1x128x128xbf16> to vector<128x128xbf16>
    %cst_119 = arith.constant dense<0.000000e+00> : vector<128x128xf32>
    %130 = tpu.matmul %127, %129, %cst_119 {dimension_numbers = #tpu.dot_dimension_numbers<[1], [0], [0], [1], [0, 0, 1, 1], [], []>} : vector<128x128xbf16>, vector<128x128xbf16>, vector<128x128xf32> -> vector<128x128xf32>
    %131 = arith.truncf %130 : vector<128x128xf32> to vector<128x128xbf16>
    %c6_120 = arith.constant 6 : index
    %c0_121 = arith.constant 0 : index
    %c0_122 = arith.constant 0 : index
    %132 = vector.load %arg4[%c6_120, %c0_121, %c0_122] : memref<9x128x128xbf16, #tpu.memory_space<vmem>>, vector<1x128x128xbf16>
    %133 = vector.shape_cast %132 : vector<1x128x128xbf16> to vector<128x128xbf16>
    %cst_123 = arith.constant dense<0.000000e+00> : vector<128x128xf32>
    %134 = tpu.matmul %133, %131, %cst_123 {dimension_numbers = #tpu.dot_dimension_numbers<[1], [0], [0], [1], [0, 0, 1, 1], [], []>} : vector<128x128xbf16>, vector<128x128xbf16>, vector<128x128xf32> -> vector<128x128xf32>
    %135 = arith.addf %125, %134 : vector<128x128xf32>
    %c7_124 = arith.constant 7 : index
    %c0_125 = arith.constant 0 : index
    %c0_126 = arith.constant 0 : index
    %136 = vector.load %arg4[%c7_124, %c0_125, %c0_126] : memref<9x128x128xbf16, #tpu.memory_space<vmem>>, vector<1x128x128xbf16>
    %137 = vector.shape_cast %136 : vector<1x128x128xbf16> to vector<128x128xbf16>
    %cst_127 = arith.constant dense<0.000000e+00> : vector<128x128xf32>
    %138 = tpu.matmul %137, %127, %cst_127 {dimension_numbers = #tpu.dot_dimension_numbers<[1], [0], [0], [1], [0, 0, 1, 1], [], []>} : vector<128x128xbf16>, vector<128x128xbf16>, vector<128x128xf32> -> vector<128x128xf32>
    %139 = arith.addf %135, %138 : vector<128x128xf32>
    %c2_128 = arith.constant 2 : index
    %c0_129 = arith.constant 0 : index
    %c0_130 = arith.constant 0 : index
    %140 = vector.load %arg8[%c2_128, %c0_129, %c0_130] : memref<3x128x128xbf16, #tpu.memory_space<vmem>>, vector<1x128x128xbf16>
    %141 = vector.shape_cast %140 : vector<1x128x128xbf16> to vector<128x128xbf16>
    %cst_131 = arith.constant dense<0.000000e+00> : vector<128x128xf32>
    %142 = tpu.matmul %127, %141, %cst_131 {dimension_numbers = #tpu.dot_dimension_numbers<[1], [0], [0], [1], [0, 0, 1, 1], [], []>} : vector<128x128xbf16>, vector<128x128xbf16>, vector<128x128xf32> -> vector<128x128xf32>
    %143 = arith.truncf %142 : vector<128x128xf32> to vector<128x128xbf16>
    %c8_132 = arith.constant 8 : index
    %c0_133 = arith.constant 0 : index
    %c0_134 = arith.constant 0 : index
    %144 = vector.load %arg4[%c8_132, %c0_133, %c0_134] : memref<9x128x128xbf16, #tpu.memory_space<vmem>>, vector<1x128x128xbf16>
    %145 = vector.shape_cast %144 : vector<1x128x128xbf16> to vector<128x128xbf16>
    %cst_135 = arith.constant dense<0.000000e+00> : vector<128x128xf32>
    %146 = tpu.matmul %145, %143, %cst_135 {dimension_numbers = #tpu.dot_dimension_numbers<[1], [0], [0], [1], [0, 0, 1, 1], [], []>} : vector<128x128xbf16>, vector<128x128xbf16>, vector<128x128xf32> -> vector<128x128xf32>
    %147 = arith.addf %139, %146 : vector<128x128xf32>
    %c0_136 = arith.constant 0 : index
    %c0_137 = arith.constant 0 : index
    %148 = vector.load %arg5[%c0_136, %c0_137] : memref<128x1xf32, #tpu.memory_space<vmem>>, vector<128x1xf32>
    %149 = vector.broadcast %148 : vector<128x1xf32> to vector<128x128xf32>
    %150 = arith.addf %147, %149 : vector<128x128xf32>
    %cst_138 = arith.constant 0.000000e+00 : f32
    %151 = vector.broadcast %cst_138 : f32 to vector<128x128xf32>
    %152 = arith.maximumf %150, %151 : vector<128x128xf32>
    %c0_139 = arith.constant 0 : index
    %c0_140 = arith.constant 0 : index
    %153 = vector.load %arg6[%c0_139, %c0_140] : memref<128x128xbf16, #tpu.memory_space<vmem>>, vector<128x128xbf16>
    %154 = arith.truncf %152 : vector<128x128xf32> to vector<128x128xbf16>
    %cst_141 = arith.constant dense<0.000000e+00> : vector<128x128xf32>
    %155 = tpu.matmul %153, %154, %cst_141 {dimension_numbers = #tpu.dot_dimension_numbers<[1], [0], [0], [1], [0, 0, 1, 1], [], []>} : vector<128x128xbf16>, vector<128x128xbf16>, vector<128x128xf32> -> vector<128x128xf32>
    %c0_142 = arith.constant 0 : index
    %c0_143 = arith.constant 0 : index
    %156 = vector.load %arg7[%c0_142, %c0_143] : memref<128x1xf32, #tpu.memory_space<vmem>>, vector<128x1xf32>
    %157 = vector.broadcast %156 : vector<128x1xf32> to vector<128x128xf32>
    %158 = arith.addf %155, %157 : vector<128x128xf32>
    %cst_144 = arith.constant 0.000000e+00 : f32
    %159 = vector.broadcast %cst_144 : f32 to vector<128x128xf32>
    %160 = arith.subf %159, %158 : vector<128x128xf32>
    %161 = math.exp %160 : vector<128x128xf32>
    %cst_145 = arith.constant 1.000000e+00 : f32
    %162 = vector.broadcast %cst_145 : f32 to vector<128x128xf32>
    %163 = arith.addf %162, %161 : vector<128x128xf32>
    %cst_146 = arith.constant 1.000000e+00 : f32
    %164 = vector.broadcast %cst_146 : f32 to vector<128x128xf32>
    %165 = arith.divf %164, %163 : vector<128x128xf32>
    %c0_147 = arith.constant 0 : index
    %c0_148 = arith.constant 0 : index
    %c0_149 = arith.constant 0 : index
    %166 = vector.load %arg10[%c0_147, %c0_148, %c0_149] : memref<1x128x128xf32, #tpu.memory_space<vmem>>, vector<1x128x128xf32>
    %167 = vector.shape_cast %166 : vector<1x128x128xf32> to vector<128x128xf32>
    %168 = vector.shape_cast %165 : vector<128x128xf32> to vector<1x128x128xf32>
    tpu.vector_store %arg10[%c0_147, %c0_148, %c0_149], %168 {strides = array<i32>} : memref<1x128x128xf32, #tpu.memory_space<vmem>>, vector<1x128x128xf32>,
    return
  }
  func.func @transform_0(%arg0: i32) -> (i32, i32, i32) {
    %c0_i32 = arith.constant 0 : i32
    %c0_i32_0 = arith.constant 0 : i32
    %c0_i32_1 = arith.constant 0 : i32
    return %arg0, %c0_i32, %c0_i32_0 : i32, i32, i32
  }
  func.func @transform_1(%arg0: i32) -> (i32, i32, i32) {
    %c0_i32 = arith.constant 0 : i32
    %c0_i32_0 = arith.constant 0 : i32
    %c0_i32_1 = arith.constant 0 : i32
    %c0_i32_2 = arith.constant 0 : i32
    return %c0_i32, %c0_i32_0, %c0_i32_1 : i32, i32, i32
  }
  func.func @transform_2(%arg0: i32) -> (i32, i32) {
    %c0_i32 = arith.constant 0 : i32
    %c0_i32_0 = arith.constant 0 : i32
    %c0_i32_1 = arith.constant 0 : i32
    return %c0_i32, %c0_i32_0 : i32, i32
  }
  func.func @transform_3(%arg0: i32) -> (i32, i32, i32) {
    %c0_i32 = arith.constant 0 : i32
    %c0_i32_0 = arith.constant 0 : i32
    %c0_i32_1 = arith.constant 0 : i32
    %c0_i32_2 = arith.constant 0 : i32
    return %c0_i32, %c0_i32_0, %c0_i32_1 : i32, i32, i32
  }
  func.func @transform_4(%arg0: i32) -> (i32, i32) {
    %c0_i32 = arith.constant 0 : i32
    %c0_i32_0 = arith.constant 0 : i32
    %c0_i32_1 = arith.constant 0 : i32
    return %c0_i32, %c0_i32_0 : i32, i32
  }
  func.func @transform_5(%arg0: i32) -> (i32, i32) {
    %c0_i32 = arith.constant 0 : i32
    %c0_i32_0 = arith.constant 0 : i32
    %c0_i32_1 = arith.constant 0 : i32
    return %c0_i32, %c0_i32_0 : i32, i32
  }
  func.func @transform_6(%arg0: i32) -> (i32, i32) {
    %c0_i32 = arith.constant 0 : i32
    %c0_i32_0 = arith.constant 0 : i32
    %c0_i32_1 = arith.constant 0 : i32
    return %c0_i32, %c0_i32_0 : i32, i32
  }
  func.func @transform_7(%arg0: i32) -> (i32, i32, i32) {
    %c0_i32 = arith.constant 0 : i32
    %c0_i32_0 = arith.constant 0 : i32
    %c0_i32_1 = arith.constant 0 : i32
    %c0_i32_2 = arith.constant 0 : i32
    return %c0_i32, %c0_i32_0, %c0_i32_1 : i32, i32, i32
  }
  func.func @transform_8(%arg0: i32) -> (i32, i32) {
    %c0_i32 = arith.constant 0 : i32
    %c0_i32_0 = arith.constant 0 : i32
    %c0_i32_1 = arith.constant 0 : i32
    return %c0_i32, %c0_i32_0 : i32, i32
  }
  func.func @transform_9(%arg0: i32) -> (i32, i32, i32) {
    %c0_i32 = arith.constant 0 : i32
    %c0_i32_0 = arith.constant 0 : i32
    %c0_i32_1 = arith.constant 0 : i32
    return %arg0, %c0_i32, %c0_i32_0 : i32, i32, i32
  }
}

</mosaic_0001>

<bundles_post_ra>
// kernel: tile.18
= control target key start
LH: loop header
LB: loop body
LE: loop exit
PB: predicated region body
PF: predicated region fallthrough
CT: control target
= control target key end

     0   :  { %s28_s0 = inlined_call_operand.vmem [shape: f32[8], index: 0, kind: input, shape index: {}]   ;;  %s29_s1 = inlined_call_operand.vmem [shape: f32[16,8], index: 1, kind: output, shape index: {}]  }
   0x1   :  { %v4_v0 = vld [vmem:[%s28_s0] ss:$0 sm:$0xff] }
   0x2   :  { %5 = vst [vmem:[%s29_s1] sm:$0xff] %v4_v0  ;;  %8 = vst [vmem:[%s29_s1 + $0x8] sm:$0xff] %v4_v0 }

// kernel: tile.0
= control target key start
LH: loop header
LB: loop body
LE: loop exit
PB: predicated region body
PF: predicated region fallthrough
CT: control target
= control target key end

     0   :  { %vm3_vm0 = vcmask 7168   ;;  %s178_s10 = smov 127   ;;  %s179_s19 = smov 125   ;;  %s328_s0 = inlined_call_operand.vmem [shape: f32[16,8], index: 0, kind: input, shape index: {}]   ;;  %s329_s1 = inlined_call_operand.vmem [shape: f32[128,1], index: 1, kind: output, shape index: {}]  }
   0x1   :  { %v30_v0 = vld [vmem:[%s328_s0] sm:$0xff]   ;;  %v142_v1 = vld [vmem:[%s328_s0 + $0x8] sm:$0xff]   ;;  %s177_s0 = smov 126   ;;  %s180_s20 = smov 124  }
   0x2   :  { %31 = vrot.lane.b32.xlu1 %v30_v0, %s177_s0  ;;  %14 = vrot.lane.b32.xlu0 %v30_v0, %s178_s10  ;;  %4 = vst.msk [vmem:[%s329_s1] ss:$8 sm:$0xf] %vm3_vm0, %v30_v0   ;;  %5 = vst.msk [vmem:[%s329_s1] ss:$8 sm:$0xf0] %vm3_vm0, %v30_v0  }
   0x3   :  { %133 = vst.msk [vmem:[%s329_s1 + $0x40] ss:$8 sm:$0xf] %vm3_vm0, %v142_v1   ;;  %134 = vst.msk [vmem:[%s329_s1 + $0x40] ss:$8 sm:$0xf0] %vm3_vm0, %v142_v1  }
   0x4   :  { %s181_s21 = smov 123   ;;  %s182_s22 = smov 122  }
   0x5   :  { %s183_s23 = smov 121  }
   0x6   :  { %40 = vrot.lane.b32.xlu1 %v142_v1, %s177_s0  ;;  %23 = vrot.lane.b32.xlu0 %v142_v1, %s178_s10 }
   0xa   :  { %57 = vrot.lane.b32.xlu1 %v142_v1, %s179_s19  ;;  %48 = vrot.lane.b32.xlu0 %v30_v0, %s179_s19 }
   0xe   :  { %74 = vrot.lane.b32.xlu1 %v142_v1, %s180_s20  ;;  %65 = vrot.lane.b32.xlu0 %v30_v0, %s180_s20 }
  0x12   :  { %91 = vrot.lane.b32.xlu1 %v142_v1, %s181_s21  ;;  %82 = vrot.lane.b32.xlu0 %v30_v0, %s181_s21 }
  0x16   :  { %108 = vrot.lane.b32.xlu1 %v142_v1, %s182_s22  ;;  %99 = vrot.lane.b32.xlu0 %v30_v0, %s182_s22 }
  0x1a   :  { %125 = vrot.lane.b32.xlu1 %v142_v1, %s183_s23  ;;  %116 = vrot.lane.b32.xlu0 %v30_v0, %s183_s23 }
  0x74   :  { %v32_v2 = vpop.permute.xlu1 %31   ;;  %v15_v3 = vpop.permute.xlu0 %14  }
  0x75   :  { %140 = vst.msk [vmem:[%s329_s1 + $0x2] ss:$8 sm:$0xf] %vm3_vm0, %v32_v2   ;;  %141 = vst.msk [vmem:[%s329_s1 + $0x2] ss:$8 sm:$0xf0] %vm3_vm0, %v32_v2  }
  0x76   :  { %135 = vst.msk [vmem:[%s329_s1 + $0x1] ss:$8 sm:$0xf] %vm3_vm0, %v15_v3   ;;  %136 = vst.msk [vmem:[%s329_s1 + $0x1] ss:$8 sm:$0xf0] %vm3_vm0, %v15_v3  }
  0x78   :  { %v41_v4 = vpop.permute.xlu1 %40   ;;  %v24_v5 = vpop.permute.xlu0 %23  }
  0x79   :  { %143 = vst.msk [vmem:[%s329_s1 + $0x42] ss:$8 sm:$0xf] %vm3_vm0, %v41_v4   ;;  %144 = vst.msk [vmem:[%s329_s1 + $0x42] ss:$8 sm:$0xf0] %vm3_vm0, %v41_v4  }
  0x7a   :  { %138 = vst.msk [vmem:[%s329_s1 + $0x41] ss:$8 sm:$0xf] %vm3_vm0, %v24_v5   ;;  %139 = vst.msk [vmem:[%s329_s1 + $0x41] ss:$8 sm:$0xf0] %vm3_vm0, %v24_v5  }
  0x7c   :  { %v58_v6 = vpop.permute.xlu1 %57   ;;  %v49_v7 = vpop.permute.xlu0 %48  }
  0x7d   :  { %148 = vst.msk [vmem:[%s329_s1 + $0x43] ss:$8 sm:$0xf] %vm3_vm0, %v58_v6   ;;  %149 = vst.msk [vmem:[%s329_s1 + $0x43] ss:$8 sm:$0xf0] %vm3_vm0, %v58_v6  }
  0x7e   :  { %145 = vst.msk [vmem:[%s329_s1 + $0x3] ss:$8 sm:$0xf] %vm3_vm0, %v49_v7   ;;  %146 = vst.msk [vmem:[%s329_s1 + $0x3] ss:$8 sm:$0xf0] %vm3_vm0, %v49_v7  }
  0x80   :  { %v75_v8 = vpop.permute.xlu1 %74   ;;  %v66_v9 = vpop.permute.xlu0 %65  }
  0x81   :  { %153 = vst.msk [vmem:[%s329_s1 + $0x44] ss:$8 sm:$0xf] %vm3_vm0, %v75_v8   ;;  %154 = vst.msk [vmem:[%s329_s1 + $0x44] ss:$8 sm:$0xf0] %vm3_vm0, %v75_v8  }
  0x82   :  { %150 = vst.msk [vmem:[%s329_s1 + $0x4] ss:$8 sm:$0xf] %vm3_vm0, %v66_v9   ;;  %151 = vst.msk [vmem:[%s329_s1 + $0x4] ss:$8 sm:$0xf0] %vm3_vm0, %v66_v9  }
  0x84   :  { %v92_v10 = vpop.permute.xlu1 %91   ;;  %v83_v11 = vpop.permute.xlu0 %82  }
  0x85   :  { %158 = vst.msk [vmem:[%s329_s1 + $0x45] ss:$8 sm:$0xf] %vm3_vm0, %v92_v10   ;;  %159 = vst.msk [vmem:[%s329_s1 + $0x45] ss:$8 sm:$0xf0] %vm3_vm0, %v92_v10  }
  0x86   :  { %155 = vst.msk [vmem:[%s329_s1 + $0x5] ss:$8 sm:$0xf] %vm3_vm0, %v83_v11   ;;  %156 = vst.msk [vmem:[%s329_s1 + $0x5] ss:$8 sm:$0xf0] %vm3_vm0, %v83_v11  }
  0x88   :  { %v109_v12 = vpop.permute.xlu1 %108   ;;  %v100_v13 = vpop.permute.xlu0 %99  }
  0x89   :  { %163 = vst.msk [vmem:[%s329_s1 + $0x46] ss:$8 sm:$0xf] %vm3_vm0, %v109_v12   ;;  %164 = vst.msk [vmem:[%s329_s1 + $0x46] ss:$8 sm:$0xf0] %vm3_vm0, %v109_v12  }
  0x8a   :  { %160 = vst.msk [vmem:[%s329_s1 + $0x6] ss:$8 sm:$0xf] %vm3_vm0, %v100_v13   ;;  %161 = vst.msk [vmem:[%s329_s1 + $0x6] ss:$8 sm:$0xf0] %vm3_vm0, %v100_v13  }
  0x8c   :  { %v126_v14 = vpop.permute.xlu1 %125   ;;  %v117_v15 = vpop.permute.xlu0 %116  }
  0x8d   :  { %168 = vst.msk [vmem:[%s329_s1 + $0x47] ss:$8 sm:$0xf] %vm3_vm0, %v126_v14   ;;  %169 = vst.msk [vmem:[%s329_s1 + $0x47] ss:$8 sm:$0xf0] %vm3_vm0, %v126_v14  }
  0x8e   :  { %165 = vst.msk [vmem:[%s329_s1 + $0x7] ss:$8 sm:$0xf] %vm3_vm0, %v117_v15   ;;  %166 = vst.msk [vmem:[%s329_s1 + $0x7] ss:$8 sm:$0xf0] %vm3_vm0, %v117_v15  }

// kernel: basic_attention_forward.1
= control target key start
LH: loop header
LB: loop body
LE: loop exit
PB: predicated region body
PF: predicated region fallthrough
CT: control target
= control target key end

     0   :  { %s8433_s30 = smov 0   ;;  %s9995_s0 = inlined_call_operand.vmem [shape: f32[2,144,128], index: 0, kind: input, shape index: {}]   ;;  %s9996_s1 = inlined_call_operand.vmem [shape: bf16[9,128,128], index: 1, kind: input, shape index: {}]   ;;  %s9997_s2 = inlined_call_operand.vmem [shape: f32[128,1], index: 2, kind: input, shape index: {}]   ;;  %s9998_s3 = inlined_call_operand.vmem [shape: bf16[9,128,128], index: 3, kind: input, shape index: {}]   ;;  %s9999_s4 = inlined_call_operand.vmem [shape: f32[128,1], index: 4, kind: input, shape index: {}]   ;;  %s10000_s5 = inlined_call_operand.vmem [shape: bf16[128,128], index: 5, kind: input, shape index: {}]   ;;  %s10001_s6 = inlined_call_operand.vmem [shape: f32[128,1], index: 6, kind: input, shape index: {}]   ;;  %s10002_s7 = inlined_call_operand.vmem [shape: bf16[3,128,128], index: 7, kind: input, shape index: {}]   ;;  %s10003_s8 = inlined_call_operand.vmem [shape: f32[1,128], index: 8, kind: input, shape index: {}]   ;;  %s10004_s9 = inlined_call_operand.vmem [shape: f32[2,128,128], index: 9, kind: output, shape index: {}]  }
   0x1 LB: > { %s5878_s10 = sadd.s32 4294967295, %s8379_s30   ;;  %p5882_p0 = scmp.ge.s32.totalorder %s8379_s30, 1  ;;  %s8379_s30 = sphi %s8433_s30, %s19_s30  }
   0x2   : > { %p287_p1 = scmp.lt.s32.totalorder %s8379_s30, 3 }
   0x4   : > { %p288_p2 = pnand %p5882_p0, %p287_p1 }
   0x5   : > { %v8444_v0 = vld [vmem:[%s10002_s7] sm:$0xff] (!%p288_p2)   ;;  %p323_p3 = scmp.lt.s32.totalorder (!%p288_p2), %s5878_s10, 1  ;;  %v8449_v1 = vld [vmem:[%s10002_s7 + $0x8] sm:$0xff] (!%p288_p2)   ;;  %v8459_v2 = vld [vmem:[%s10002_s7 + $0x10] sm:$0xff] (!%p288_p2)  }
   0x6   : > { %291 = sbr.rel (%p288_p2) target bundleno = 1980 (0x7bc), region = 56  ;;  %6858 = vmatprep.subr.bf16.mxu1 (!%p288_p2), %v8444_v0  ;;  %v8471_v3 = vld [vmem:[%s10002_s7 + $0x18] sm:$0xff] (!%p288_p2)   ;;  %v8477_v4 = vld [vmem:[%s10002_s7 + $0x80] sm:$0xff] (!%p288_p2)   ;;  %v8490_v8 = vld [vmem:[%s10002_s7 + $0x88] sm:$0xff] (!%p288_p2)  }
   0x7   : > { %6859 = vmatpush3.bf16.msra.mxu1 (!%p288_p2), %v8444_v0  ;;  %6954 = vmatprep.subr.bf16.mxu0 (!%p288_p2), %v8477_v4  ;;  %v8496_v9 = vld [vmem:[%s10002_s7 + $0x20] sm:$0xff] (!%p288_p2)   ;;  %v8501_v10 = vld [vmem:[%s10002_s7 + $0x90] sm:$0xff] (!%p288_p2)   ;;  %v8510_v11 = vld [vmem:[%s10002_s7 + $0x28] sm:$0xff] (!%p288_p2)  }
   0x8   : > { %6860 = vmatprep.subr.bf16.mxu1 (!%p288_p2), %v8449_v1  ;;  %6955 = vmatpush3.bf16.msra.mxu0 (!%p288_p2), %v8477_v4  ;;  %v8516_v12 = vld [vmem:[%s10002_s7 + $0x98] sm:$0xff] (!%p288_p2)   ;;  %v8522_v13 = vld [vmem:[%s10002_s7 + $0x30] sm:$0xff] (!%p288_p2)   ;;  %v8530_v14 = vld [vmem:[%s10002_s7 + $0xa0] sm:$0xff] (!%p288_p2)  }
   0x9   : > { %6956 = vmatprep.subr.bf16.mxu0 (!%p288_p2), %v8490_v8  ;;  %v8535_v15 = vld [vmem:[%s10002_s7 + $0x38] sm:$0xff] (!%p288_p2)   ;;  %v8540_v16 = vld [vmem:[%s10002_s7 + $0xa8] sm:$0xff] (!%p288_p2)   ;;  %v8564_v22 = vld [vmem:[%s10002_s7 + $0xb0] sm:$0xff] (!%p288_p2)  }
   0xa   : > { %v8581_v26 = vld [vmem:[%s10002_s7 + $0xb8] sm:$0xff] (!%p288_p2)   ;;  %v8135_v51 = vld [vmem:[%s9996_s1 + $0x40] sm:$0xff] (!%p288_p2)   ;;  %v8136_v52 = vld [vmem:[%s9996_s1 + $0x48] sm:$0xff] (!%p288_p2)  }
   0xb   : > { %6861 = vmatpush3.bf16.msra.mxu1 (!%p288_p2), %v8449_v1  ;;  %v8137_v53 = vld [vmem:[%s9996_s1 + $0x50] sm:$0xff] (!%p288_p2)   ;;  %v8138_v54 = vld [vmem:[%s9996_s1 + $0x58] sm:$0xff] (!%p288_p2)   ;;  %v8367_v55 = vld [vmem:[%s10002_s7 + $0x80] sm:$0xff] (!%p288_p2)  }
   0xc   : > { %6862 = vmatprep.subr.bf16.mxu1 (!%p288_p2), %v8459_v2  ;;  %6957 = vmatpush3.bf16.msra.mxu0 (!%p288_p2), %v8490_v8  ;;  %v8139_v56 = vld [vmem:[%s9996_s1 + $0x60] sm:$0xff] (!%p288_p2)   ;;  %v8140_v57 = vld [vmem:[%s9996_s1 + $0x68] sm:$0xff] (!%p288_p2)   ;;  %v8369_v59 = vld [vmem:[%s10002_s7 + $0x90] sm:$0xff] (!%p288_p2)  }
   0xd   : > { %s10006_s10 = smov (!%p323_p3, %s5878_s10), 1  ;;  %6958 = vmatprep.subr.bf16.mxu0 %v8501_v10  ;;  %v8368_v58 = vld [vmem:[%s10002_s7 + $0x88] sm:$0xff]   ;;  %v8141_v60 = vld [vmem:[%s9996_s1 + $0x70] sm:$0xff]   ;;  %v8142_v61 = vld [vmem:[%s9996_s1 + $0x78] sm:$0xff]  }
   0xe   : > { %s8106_s17 = smul.u32 144, %s10006_s10  ;;  %v8370_v62 = vld [vmem:[%s10002_s7 + $0x98] sm:$0xff]   ;;  %v8371_v63 = vld [vmem:[%s10002_s7 + $0xa0] sm:$0xff]   ;;  %s6361_s18 = sshll.u32 %s10006_s10, 7 }
   0xf   : > { %6863 = vmatpush3.bf16.msra.mxu1 %v8459_v2  ;;  %s9974_s10 = scalar_lea.vmem %s10004_s9, %s6361_s18 }
  0x10   : > { %s8465_s20 = scalar_lea.vmem %s9995_s0, %s8106_s17  ;;  %6864 = vmatprep.subr.bf16.mxu1 %v8471_v3  ;;  %6959 = vmatpush3.bf16.msra.mxu0 %v8501_v10 }
  0x11   : > { %v335_v5 = vld [vmem:[%s8465_s20] sm:$0xff]  ;;  %v8481_v6 = vld [vmem:[%s8465_s20 + $0x8] sm:$0xff]  ;;  %6960 = vmatprep.subr.bf16.mxu0 %v8516_v12  ;;  %v8547_v17 = vld [vmem:[%s8465_s20 + $0x10] sm:$0xff] }
  0x12   : > { %v351_v7 = vpack.c.bf16 %v8481_v6, %v335_v5  ;;  %v8550_v18 = vld [vmem:[%s8465_s20 + $0x18] sm:$0xff]  ;;  %v8553_v19 = vld [vmem:[%s8465_s20 + $0x80] sm:$0xff]  ;;  %v8559_v21 = vld [vmem:[%s8465_s20 + $0x28] sm:$0xff]  ;;  %v8666_v43 = vpack.c.bf16 %v8547_v17, %v8481_v6 }
  0x13   : > { %6865 = vmatpush3.bf16.msra.mxu1 %v8471_v3  ;;  %v8556_v20 = vld [vmem:[%s8465_s20 + $0x20] sm:$0xff]  ;;  %v1982_v23 = vld [vmem:[%s8465_s20 + $0x88] sm:$0xff]  ;;  %v8576_v25 = vpack.c.bf16 %v8550_v18, %v8547_v17  ;;  %v8591_v28 = vld [vmem:[%s8465_s20 + $0x30] sm:$0xff] }
  0x14   : > { %6874 = vmatprep.mubr.bf16.mxu1 %v351_v7  ;;  %6970 = vmatprep.mubr.bf16.mxu0 %v351_v7  ;;  %v8572_v24 = vpack.c.bf16 %v1982_v23, %v8553_v19  ;;  %v8586_v27 = vpack.c.bf16 %v8559_v21, %v8556_v20  ;;  %v8594_v29 = vld [vmem:[%s8465_s20 + $0x38] sm:$0xff]  ;;  %v8598_v30 = vld [vmem:[%s8465_s20 + $0x40] sm:$0xff]  ;;  %v8601_v31 = vld [vmem:[%s8465_s20 + $0x48] sm:$0xff]  ;;  %v8678_v44 = vpack.c.bf16 %v8556_v20, %v8550_v18 }
  0x15   : > { %6866 = vmatprep.subr.bf16.mxu1 %v8496_v9  ;;  %6961 = vmatpush3.bf16.msra.mxu0 %v8516_v12  ;;  %v8609_v32 = vpack.c.bf16 %v8594_v29, %v8591_v28  ;;  %v8613_v33 = vpack.c.bf16 %v8601_v31, %v8598_v30  ;;  %v345_v34 = vld [vmem:[%s8465_s20 + $0x50] sm:$0xff]  ;;  %v8620_v35 = vld [vmem:[%s8465_s20 + $0x58] sm:$0xff]  ;;  %v347_v36 = vld [vmem:[%s8465_s20 + $0x60] sm:$0xff]  ;;  %v8683_v45 = vpack.c.bf16 %v8591_v28, %v8559_v21 }
  0x16   : > { %6962 = vmatprep.subr.bf16.mxu0 %v8530_v14  ;;  %v348_v37 = vld [vmem:[%s8465_s20 + $0x68] sm:$0xff]  ;;  %v8633_v38 = vpack.c.bf16 %v8620_v35, %v345_v34  ;;  %v349_v40 = vld [vmem:[%s8465_s20 + $0x70] sm:$0xff]  ;;  %v350_v41 = vld [vmem:[%s8465_s20 + $0x78] sm:$0xff]  ;;  %v8692_v46 = vpack.c.bf16 %v8598_v30, %v8594_v29  ;;  %v8695_v47 = vpack.c.bf16 %v345_v34, %v8601_v31  ;;  %v8704_v48 = vpack.c.bf16 %v347_v36, %v8620_v35 }
  0x17   : > { %6867 = vmatpush3.bf16.msra.mxu1 %v8496_v9  ;;  %v8636_v39 = vpack.c.bf16 %v348_v37, %v347_v36  ;;  %v8650_v42 = vpack.c.bf16 %v350_v41, %v349_v40  ;;  %v8706_v49 = vpack.c.bf16 %v349_v40, %v348_v37  ;;  %v8715_v50 = vpack.c.bf16 %v8553_v19, %v350_v41 }
  0x18   : > { %6868 = vmatprep.subr.bf16.mxu1 %v8510_v11 }
  0x19   : > { %6963 = vmatpush3.bf16.msra.mxu0 %v8530_v14 }
  0x1a   : > { %6964 = vmatprep.subr.bf16.mxu0 %v8540_v16 }
  0x1b   : > { %6869 = vmatpush3.bf16.msra.mxu1 %v8510_v11 }
  0x1c   : > { %6870 = vmatprep.subr.bf16.mxu1 %v8522_v13 }
  0x1d   : > { %6965 = vmatpush3.bf16.msra.mxu0 %v8540_v16 }
  0x1e   : > { %6966 = vmatprep.subr.bf16.mxu0 %v8564_v22 }
  0x1f   : > { %6871 = vmatpush3.bf16.msra.mxu1 %v8522_v13 }
  0x20   : > { %6872 = vmatprep.subr.bf16.mxu1 %v8535_v15 }
  0x21   : > { %6967 = vmatpush3.bf16.msra.mxu0 %v8564_v22 }
  0x22   : > { %6968 = vmatprep.subr.bf16.mxu0 %v8581_v26 }
  0x23   : > { %6873 = vmatpush3.bf16.msra.mxu1 %v8535_v15 }
  0x24   : > { %6890 = vmatprep.subr.bf16.mxu1 %v351_v7 }
  0x25   : > { %6969 = vmatpush3.bf16.msra.mxu0 %v8581_v26 }
  0x26   : > { %6875 = vmatmul.mubr.bf16.vlgmr.msra.gmra.mrb[0].mxu1 %v8576_v25  ;;  %7018 = vmatprep.subr.bf16.mxu0 %v8444_v0 }
  0x27   : > { %6878 = vmatprep.mubr.bf16.mxu1 %v8586_v27  ;;  %6891 = vmatpush3.bf16.msra.mxu1 %v351_v7 }
  0x28   : > { %6892 = vmatprep.subr.bf16.mxu1 %v8576_v25  ;;  %6971 = vmatmul.mubr.bf16.vlgmr.msra.gmra.mrb[0].mxu0 %v8576_v25 }
  0x29   : > { %7019 = vmatpush3.bf16.msra.mxu0 %v8444_v0  ;;  %6974 = vmatprep.mubr.bf16.mxu0 %v8586_v27 }
  0x2a   : > { %7020 = vmatprep.subr.bf16.mxu0 %v8449_v1 }
  0x2b   : > { %6893 = vmatpush3.bf16.msra.mxu1 %v8576_v25 }
  0x2c   : > { %6894 = vmatprep.subr.bf16.mxu1 %v8586_v27 }
  0x2d   : > { %7021 = vmatpush3.bf16.msra.mxu0 %v8449_v1 }
  0x2e   : > { %6879 = vmatmul.mubr.bf16.gmra.mrb[4].mxu1 %v8609_v32  ;;  %7022 = vmatprep.subr.bf16.mxu0 %v8459_v2 }
  0x2f   : > { %6882 = vmatprep.mubr.bf16.mxu1 %v8613_v33  ;;  %6895 = vmatpush3.bf16.msra.mxu1 %v8586_v27 }
  0x30   : > { %6896 = vmatprep.subr.bf16.mxu1 %v8609_v32  ;;  %6975 = vmatmul.mubr.bf16.gmra.mrb[4].mxu0 %v8609_v32 }
  0x31   : > { %7023 = vmatpush3.bf16.msra.mxu0 %v8459_v2  ;;  %6978 = vmatprep.mubr.bf16.mxu0 %v8613_v33 }
  0x32   : > { %7024 = vmatprep.subr.bf16.mxu0 %v8471_v3 }
  0x33   : > { %6897 = vmatpush3.bf16.msra.mxu1 %v8609_v32 }
  0x34   : > { %6898 = vmatprep.subr.bf16.mxu1 %v8613_v33 }
  0x35   : > { %7025 = vmatpush3.bf16.msra.mxu0 %v8471_v3 }
  0x36   : > { %6883 = vmatmul.mubr.bf16.gmra.mrb[8].mxu1 %v8633_v38  ;;  %7026 = vmatprep.subr.bf16.mxu0 %v8496_v9 }
  0x37   : > { %6886 = vmatprep.mubr.bf16.mxu1 %v8636_v39  ;;  %6899 = vmatpush3.bf16.msra.mxu1 %v8613_v33 }
  0x38   : > { %6900 = vmatprep.subr.bf16.mxu1 %v8633_v38  ;;  %6979 = vmatmul.mubr.bf16.gmra.mrb[8].mxu0 %v8633_v38 }
  0x39   : > { %7027 = vmatpush3.bf16.msra.mxu0 %v8496_v9  ;;  %6982 = vmatprep.mubr.bf16.mxu0 %v8636_v39 }
  0x3a   : > { %7028 = vmatprep.subr.bf16.mxu0 %v8510_v11 }
  0x3b   : > { %6901 = vmatpush3.bf16.msra.mxu1 %v8633_v38 }
  0x3c   : > { %6902 = vmatprep.subr.bf16.mxu1 %v8636_v39 }
  0x3d   : > { %7029 = vmatpush3.bf16.msra.mxu0 %v8510_v11 }
  0x3e   : > { %6887 = vmatmul.mubr.bf16.gmra.mrb[12].mxu1 %v8650_v42  ;;  %7030 = vmatprep.subr.bf16.mxu0 %v8522_v13 }
  0x3f   : > { %6903 = vmatpush3.bf16.msra.mxu1 %v8636_v39  ;;  %6906 = vmatprep.mubr.bf16.mxu1 %v8135_v51 }
  0x40   : > { %6904 = vmatprep.subr.bf16.mxu1 %v8650_v42  ;;  %6983 = vmatmul.mubr.bf16.gmra.mrb[12].mxu0 %v8650_v42 }
  0x41   : > { %7031 = vmatpush3.bf16.msra.mxu0 %v8522_v13  ;;  %7034 = vmatprep.mubr.bf16.mxu0 %v8666_v43 }
  0x42   : > { %7032 = vmatprep.subr.bf16.mxu0 %v8535_v15 }
  0x43   : > { %6905 = vmatpush3.bf16.msra.mxu1 %v8650_v42 }
  0x45   : > { %7033 = vmatpush3.bf16.msra.mxu0 %v8535_v15 }
  0x46   : > { %7114 = vmatprep.subr.bf16.mxu0 %v8477_v4  ;;  %6907 = vmatmul.mubr.bf16.vlgmr.msra.gmra.mrb[16].mxu1 %v8136_v52 }
  0x47   : > { %6910 = vmatprep.mubr.bf16.mxu1 %v8137_v53 }
  0x48   : > { %7035 = vmatmul.mubr.bf16.vlgmr.msra.gmra.mrb[16].mxu0 %v8678_v44 }
  0x49   : > { %7038 = vmatprep.mubr.bf16.mxu0 %v8683_v45  ;;  %7115 = vmatpush3.bf16.msra.mxu0 %v8477_v4 }
  0x4a   : > { %7116 = vmatprep.subr.bf16.mxu0 %v8490_v8 }
  0x4d   : > { %7117 = vmatpush3.bf16.msra.mxu0 %v8490_v8 }
  0x4e   : > { %7118 = vmatprep.subr.bf16.mxu0 %v8501_v10  ;;  %6911 = vmatmul.mubr.bf16.gmra.mrb[20].mxu1 %v8138_v54 }
  0x4f   : > { %6914 = vmatprep.mubr.bf16.mxu1 %v8139_v56 }
  0x50   : > { %7039 = vmatmul.mubr.bf16.gmra.mrb[20].mxu0 %v8692_v46 }
  0x51   : > { %7042 = vmatprep.mubr.bf16.mxu0 %v8695_v47  ;;  %7119 = vmatpush3.bf16.msra.mxu0 %v8501_v10 }
  0x52   : > { %7120 = vmatprep.subr.bf16.mxu0 %v8516_v12 }
  0x55   : > { %7121 = vmatpush3.bf16.msra.mxu0 %v8516_v12 }
  0x56   : > { %7122 = vmatprep.subr.bf16.mxu0 %v8530_v14  ;;  %6915 = vmatmul.mubr.bf16.gmra.mrb[24].mxu1 %v8140_v57 }
  0x57   : > { %6918 = vmatprep.mubr.bf16.mxu1 %v8141_v60 }
  0x58   : > { %7043 = vmatmul.mubr.bf16.gmra.mrb[24].mxu0 %v8704_v48 }
  0x59   : > { %7046 = vmatprep.mubr.bf16.mxu0 %v8706_v49  ;;  %7123 = vmatpush3.bf16.msra.mxu0 %v8530_v14 }
  0x5a   : > { %7124 = vmatprep.subr.bf16.mxu0 %v8540_v16 }
  0x5d   : > { %7125 = vmatpush3.bf16.msra.mxu0 %v8540_v16 }
  0x5e   : > { %7126 = vmatprep.subr.bf16.mxu0 %v8564_v22  ;;  %6919 = vmatmul.mubr.bf16.gmra.mrb[28].mxu1 %v8142_v61 }
  0x60   : > { %7047 = vmatmul.mubr.bf16.gmra.mrb[28].mxu0 %v8715_v50 }
  0x61   : > { %7127 = vmatpush3.bf16.msra.mxu0 %v8564_v22  ;;  %7130 = vmatprep.mubr.bf16.mxu0 %v8666_v43 }
  0x62   : > { %7128 = vmatprep.subr.bf16.mxu0 %v8581_v26 }
  0x65   : > { %7129 = vmatpush3.bf16.msra.mxu0 %v8581_v26 }
  0x66   : > { %7178 = vmatprep.subr.bf16.mxu0 %v8444_v0 }
  0x68   : > { %7131 = vmatmul.mubr.bf16.vlgmr.msra.gmra.mrb[32].mxu0 %v8678_v44 }
  0x69   : > { %7179 = vmatpush3.bf16.msra.mxu0 %v8444_v0  ;;  %7134 = vmatprep.mubr.bf16.mxu0 %v8683_v45  ;;  %v8143_v0 = vld [vmem:[%s9996_s1] sm:$0xff]  }
  0x6a   : > { %7180 = vmatprep.subr.bf16.mxu0 %v8449_v1  ;;  %6938 = vmatprep.mubr.bf16.mxu1 %v8143_v0  ;;  %v8145_v0 = vld [vmem:[%s9996_s1 + $0x10] sm:$0xff]  }
  0x6d   : > { %7181 = vmatpush3.bf16.msra.mxu0 %v8449_v1  ;;  %v8372_v1 = vld [vmem:[%s10002_s7 + $0xa8] sm:$0xff]  }
  0x6e   : > { %7182 = vmatprep.subr.bf16.mxu0 %v8459_v2 }
  0x70   : > { %7135 = vmatmul.mubr.bf16.gmra.mrb[36].mxu0 %v8692_v46 }
  0x71   : > { %7183 = vmatpush3.bf16.msra.mxu0 %v8459_v2  ;;  %7138 = vmatprep.mubr.bf16.mxu0 %v8695_v47 }
  0x72   : > { %7184 = vmatprep.subr.bf16.mxu0 %v8471_v3 }
  0x75   : > { %7185 = vmatpush3.bf16.msra.mxu0 %v8471_v3 }
  0x76   : > { %7186 = vmatprep.subr.bf16.mxu0 %v8496_v9 }
  0x78   : > { %7139 = vmatmul.mubr.bf16.gmra.mrb[40].mxu0 %v8704_v48 }
  0x79   : > { %7187 = vmatpush3.bf16.msra.mxu0 %v8496_v9  ;;  %7142 = vmatprep.mubr.bf16.mxu0 %v8706_v49 }
  0x7a   : > { %7188 = vmatprep.subr.bf16.mxu0 %v8510_v11 }
  0x7d   : > { %7189 = vmatpush3.bf16.msra.mxu0 %v8510_v11 }
  0x7e   : > { %7190 = vmatprep.subr.bf16.mxu0 %v8522_v13 }
  0x80   : > { %7143 = vmatmul.mubr.bf16.gmra.mrb[44].mxu0 %v8715_v50 }
  0x81   : > { %7191 = vmatpush3.bf16.msra.mxu0 %v8522_v13  ;;  %7194 = vmatprep.mubr.bf16.mxu0 %v8576_v25 }
  0x82   : > { %7192 = vmatprep.subr.bf16.mxu0 %v8535_v15 }
  0x85   : > { %7193 = vmatpush3.bf16.msra.mxu0 %v8535_v15 }
  0x86   : > { %7274 = vmatprep.subr.bf16.mxu0 %v8367_v55 }
  0x88   : > { %7195 = vmatmul.mubr.bf16.vlgmr.msra.gmra.mrb[48].mxu0 %v8586_v27 }
  0x89   : > { %7198 = vmatprep.mubr.bf16.mxu0 %v8609_v32  ;;  %7275 = vmatpush3.bf16.msra.mxu0 %v8367_v55 }
  0x8a   : > { %7276 = vmatprep.subr.bf16.mxu0 %v8368_v58 }
  0x8d   : > { %7277 = vmatpush3.bf16.msra.mxu0 %v8368_v58 }
  0x8e   : > { %7278 = vmatprep.subr.bf16.mxu0 %v8369_v59 }
  0x90   : > { %7199 = vmatmul.mubr.bf16.gmra.mrb[52].mxu0 %v8613_v33 }
  0x91   : > { %7202 = vmatprep.mubr.bf16.mxu0 %v8633_v38  ;;  %7279 = vmatpush3.bf16.msra.mxu0 %v8369_v59 }
  0x92   : > { %7280 = vmatprep.subr.bf16.mxu0 %v8370_v62 }
  0x95   : > { %7281 = vmatpush3.bf16.msra.mxu0 %v8370_v62  ;;  %v8144_v62 = vld [vmem:[%s9996_s1 + $0x8] sm:$0xff]  }
  0x96   : > { %7282 = vmatprep.subr.bf16.mxu0 %v8371_v63 }
  0x98   : > { %7203 = vmatmul.mubr.bf16.gmra.mrb[56].mxu0 %v8636_v39 }
  0x99   : > { %7206 = vmatprep.mubr.bf16.mxu0 %v8650_v42  ;;  %7283 = vmatpush3.bf16.msra.mxu0 %v8371_v63 }
  0x9a   : > { %7284 = vmatprep.subr.bf16.mxu0 %v8372_v1 }
  0x9d   : > { %7285 = vmatpush3.bf16.msra.mxu0 %v8372_v1 }
  0x9e   : > { %7286 = vmatprep.subr.bf16.mxu0 %v8564_v22 }
  0xa0   : > { %7207 = vmatmul.mubr.bf16.gmra.mrb[60].mxu0 %v8572_v24 }
  0xa1   : > { %7287 = vmatpush3.bf16.msra.mxu0 %v8564_v22  ;;  %7290 = vmatprep.mubr.bf16.mxu0 %v8576_v25 }
  0xa2   : > { %7288 = vmatprep.subr.bf16.mxu0 %v8581_v26 }
  0xa5   : > { %7289 = vmatpush3.bf16.msra.mxu0 %v8581_v26 }
  0xa8   : > { %7291 = vmatmul.mubr.bf16.vlgmr.msra.gmra.mrb[64].mxu0 %v8586_v27 }
  0xa9   : > { %7294 = vmatprep.mubr.bf16.mxu0 %v8609_v32 }
  0xb0   : > { %7295 = vmatmul.mubr.bf16.gmra.mrb[68].mxu0 %v8613_v33 }
  0xb1   : > { %7298 = vmatprep.mubr.bf16.mxu0 %v8633_v38 }
  0xb8   : > { %7299 = vmatmul.mubr.bf16.gmra.mrb[72].mxu0 %v8636_v39 }
  0xb9   : > { %7302 = vmatprep.mubr.bf16.mxu0 %v8650_v42 }
  0xc0   : > { %7303 = vmatmul.mubr.bf16.gmra.mrb[76].mxu0 %v8572_v24 }
  0xf9   : > { %v6876_v2 = vpop.f32.mrb[0].mxu1 }
  0xfa   : > { %v457_v3 = vpop.f32.mrb[1].mxu1 }
  0xfb   : > { %v6877_v4 = vpop.f32.mrb[2].mxu1  ;;  %v6972_v9 = vpop.f32.mrb[0].mxu0 }
  0xfc   : > { %v521_v5 = vpack.c.bf16 %v6877_v4, %v6876_v2  ;;  %v460_v6 = vpop.f32.mrb[3].mxu1  ;;  %v950_v11 = vpop.f32.mrb[1].mxu0 }
  0xfd   : > { %v520_v7 = vpack.c.bf16 %v460_v6, %v457_v3  ;;  %v6973_v13 = vpop.f32.mrb[2].mxu0  ;;  %v8146_v6 = vld [vmem:[%s9996_s1 + $0x18] sm:$0xff]  }
  0xfe   : > { %v1014_v16 = vpack.c.bf16 %v6973_v13, %v6972_v9  ;;  %v953_v17 = vpop.f32.mrb[3].mxu0 }
  0xff   : > { %6922 = vmatprep.subr.bf16.mxu1 %v520_v7  ;;  %v1013_v19 = vpack.c.bf16 %v953_v17, %v950_v11 }
 0x100   : > { %6923 = vmatpush3.bf16.msra.mxu1 %v520_v7 }
 0x101   : > { %v6880_v8 = vpop.f32.mrb[4].mxu1  ;;  %6924 = vmatprep.subr.bf16.mxu1 %v521_v5 }
 0x102   : > { %v473_v10 = vpop.f32.mrb[5].mxu1 }
 0x103   : > { %v6881_v12 = vpop.f32.mrb[6].mxu1  ;;  %v6976_v21 = vpop.f32.mrb[4].mxu0 }
 0x104   : > { %v523_v14 = vpack.c.bf16 %v6881_v12, %v6880_v8  ;;  %v476_v15 = vpop.f32.mrb[7].mxu1  ;;  %6925 = vmatpush3.bf16.msra.mxu1 %v521_v5  ;;  %v966_v23 = vpop.f32.mrb[5].mxu0  ;;  %v8147_v8 = vld [vmem:[%s9996_s1 + $0x20] sm:$0xff]  }
 0x105   : > { %v522_v18 = vpack.c.bf16 %v476_v15, %v473_v10  ;;  %v6977_v28 = vpop.f32.mrb[6].mxu0 }
 0x106   : > { %v1016_v31 = vpack.c.bf16 %v6977_v28, %v6976_v21  ;;  %v969_v34 = vpop.f32.mrb[7].mxu0 }
 0x107   : > { %6926 = vmatprep.subr.bf16.mxu1 %v522_v18  ;;  %v1015_v36 = vpack.c.bf16 %v969_v34, %v966_v23 }
 0x108   : > { %6927 = vmatpush3.bf16.msra.mxu1 %v522_v18 }
 0x109   : > { %v6884_v20 = vpop.f32.mrb[8].mxu1  ;;  %6928 = vmatprep.subr.bf16.mxu1 %v523_v14 }
 0x10a   : > { %v489_v22 = vpop.f32.mrb[9].mxu1 }
 0x10b   : > { %v6885_v26 = vpop.f32.mrb[10].mxu1  ;;  %v6980_v40 = vpop.f32.mrb[8].mxu0 }
 0x10c   : > { %v525_v29 = vpack.c.bf16 %v6885_v26, %v6884_v20  ;;  %v492_v30 = vpop.f32.mrb[11].mxu1  ;;  %6929 = vmatpush3.bf16.msra.mxu1 %v523_v14  ;;  %v982_v51 = vpop.f32.mrb[9].mxu0  ;;  %v8148_v14 = vld [vmem:[%s9996_s1 + $0x28] sm:$0xff]   ;;  %v8151_v26 = vld [vmem:[%s9996_s1 + $0x80] sm:$0xff]  }
 0x10d   : > { %v524_v35 = vpack.c.bf16 %v492_v30, %v489_v22  ;;  %v6981_v53 = vpop.f32.mrb[10].mxu0  ;;  %v8150_v22 = vld [vmem:[%s9996_s1 + $0x38] sm:$0xff]  }
 0x10e   : > { %v1018_v56 = vpack.c.bf16 %v6981_v53, %v6980_v40  ;;  %v985_v57 = vpop.f32.mrb[11].mxu0 }
 0x10f   : > { %6930 = vmatprep.subr.bf16.mxu1 %v524_v35  ;;  %v1017_v59 = vpack.c.bf16 %v985_v57, %v982_v51 }
 0x110   : > { %6931 = vmatpush3.bf16.msra.mxu1 %v524_v35  ;;  %v8152_v35 = vld [vmem:[%s9996_s1 + $0x88] sm:$0xff]  }
 0x111   : > { %v6888_v37 = vpop.f32.mrb[12].mxu1  ;;  %6932 = vmatprep.subr.bf16.mxu1 %v525_v29 }
 0x112   : > { %v505_v41 = vpop.f32.mrb[13].mxu1 }
 0x113   : > { %v6889_v52 = vpop.f32.mrb[14].mxu1  ;;  %v6984_v60 = vpop.f32.mrb[12].mxu0 }
 0x114   : > { %v527_v54 = vpack.c.bf16 %v6889_v52, %v6888_v37  ;;  %v508_v55 = vpop.f32.mrb[15].mxu1  ;;  %6933 = vmatpush3.bf16.msra.mxu1 %v525_v29  ;;  %v998_v61 = vpop.f32.mrb[13].mxu0  ;;  %v8153_v37 = vld [vmem:[%s9996_s1 + $0x90] sm:$0xff]  }
 0x115   : > { %v526_v58 = vpack.c.bf16 %v508_v55, %v505_v41  ;;  %v6985_v63 = vpop.f32.mrb[14].mxu0 }
 0x116   : > { %v1020_v1 = vpack.c.bf16 %v6985_v63, %v6984_v60  ;;  %v1001_v2 = vpop.f32.mrb[15].mxu0 }
 0x117   : > { %6934 = vmatprep.subr.bf16.mxu1 %v526_v58  ;;  %v1019_v3 = vpack.c.bf16 %v1001_v2, %v998_v61 }
 0x118   : > { %6935 = vmatpush3.bf16.msra.mxu1 %v526_v58 }
 0x119   : > { %6936 = vmatprep.subr.bf16.mxu1 %v527_v54 }
 0x11b   : > { %v7036_v4 = vpop.f32.mrb[16].mxu0 }
 0x11c   : > { %6937 = vmatpush3.bf16.msra.mxu1 %v527_v54  ;;  %v1257_v5 = vpop.f32.mrb[17].mxu0  ;;  %v8154_v54 = vld [vmem:[%s9996_s1 + $0x98] sm:$0xff]  }
 0x11d   : > { %6986 = vmatprep.subr.bf16.mxu1 %v1013_v19  ;;  %v7037_v7 = vpop.f32.mrb[18].mxu0 }
 0x11e   : > { %v1321_v9 = vpack.c.bf16 %v7037_v7, %v7036_v4  ;;  %v1260_v10 = vpop.f32.mrb[19].mxu0 }
 0x11f   : > { %6939 = vmatmul.mubr.bf16.vlgmr.msra.gmra.mrb[16].mxu1 %v8144_v62  ;;  %v1320_v11 = vpack.c.bf16 %v1260_v10, %v1257_v5  ;;  %v8156_v62 = vld [vmem:[%s9996_s1 + $0xa8] sm:$0xff]  }
 0x120   : > { %6987 = vmatpush3.bf16.msra.mxu1 %v1013_v19  ;;  %6942 = vmatprep.mubr.bf16.mxu1 %v8145_v0  ;;  %v8157_v0 = vld [vmem:[%s9996_s1 + $0xb0] sm:$0xff]  }
 0x121   : > { %6988 = vmatprep.subr.bf16.mxu1 %v1014_v16 }
 0x123   : > { %v7040_v12 = vpop.f32.mrb[20].mxu0 }
 0x124   : > { %6989 = vmatpush3.bf16.msra.mxu1 %v1014_v16  ;;  %v1273_v13 = vpop.f32.mrb[21].mxu0  ;;  %v8149_v16 = vld [vmem:[%s9996_s1 + $0x30] sm:$0xff]  }
 0x125   : > { %6990 = vmatprep.subr.bf16.mxu1 %v1015_v36  ;;  %v7041_v15 = vpop.f32.mrb[22].mxu0 }
 0x126   : > { %v1323_v17 = vpack.c.bf16 %v7041_v15, %v7040_v12  ;;  %v1276_v18 = vpop.f32.mrb[23].mxu0 }
 0x127   : > { %6943 = vmatmul.mubr.bf16.gmra.mrb[20].mxu1 %v8146_v6  ;;  %v1322_v19 = vpack.c.bf16 %v1276_v18, %v1273_v13  ;;  %v8158_v6 = vld [vmem:[%s9996_s1 + $0xb8] sm:$0xff]  }
 0x128   : > { %6991 = vmatpush3.bf16.msra.mxu1 %v1015_v36  ;;  %6946 = vmatprep.mubr.bf16.mxu1 %v8147_v8  ;;  %v8159_v8 = vld [vmem:[%s9996_s1 + $0xc0] sm:$0xff]  }
 0x129   : > { %6992 = vmatprep.subr.bf16.mxu1 %v1016_v31 }
 0x12b   : > { %v7044_v20 = vpop.f32.mrb[24].mxu0 }
 0x12c   : > { %6993 = vmatpush3.bf16.msra.mxu1 %v1016_v31  ;;  %v1289_v21 = vpop.f32.mrb[25].mxu0 }
 0x12d   : > { %6994 = vmatprep.subr.bf16.mxu1 %v1017_v59  ;;  %v7045_v23 = vpop.f32.mrb[26].mxu0 }
 0x12e   : > { %v1325_v28 = vpack.c.bf16 %v7045_v23, %v7044_v20  ;;  %v1292_v29 = vpop.f32.mrb[27].mxu0 }
 0x12f   : > { %6947 = vmatmul.mubr.bf16.gmra.mrb[24].mxu1 %v8148_v14  ;;  %v1324_v30 = vpack.c.bf16 %v1292_v29, %v1289_v21  ;;  %v8160_v14 = vld [vmem:[%s9996_s1 + $0xc8] sm:$0xff]  }
 0x130   : > { %6995 = vmatpush3.bf16.msra.mxu1 %v1017_v59  ;;  %6950 = vmatprep.mubr.bf16.mxu1 %v8149_v16  ;;  %v8161_v16 = vld [vmem:[%s9996_s1 + $0xd0] sm:$0xff]  }
 0x131   : > { %6996 = vmatprep.subr.bf16.mxu1 %v1018_v56 }
 0x133   : > { %v7048_v31 = vpop.f32.mrb[28].mxu0 }
 0x134   : > { %6997 = vmatpush3.bf16.msra.mxu1 %v1018_v56  ;;  %v1305_v34 = vpop.f32.mrb[29].mxu0  ;;  %v8155_v56 = vld [vmem:[%s9996_s1 + $0xa0] sm:$0xff]  }
 0x135   : > { %6998 = vmatprep.subr.bf16.mxu1 %v1019_v3  ;;  %v7049_v36 = vpop.f32.mrb[30].mxu0 }
 0x136   : > { %v1327_v40 = vpack.c.bf16 %v7049_v36, %v7048_v31  ;;  %v1308_v41 = vpop.f32.mrb[31].mxu0 }
 0x137   : > { %6951 = vmatmul.mubr.bf16.gmra.mrb[28].mxu1 %v8150_v22  ;;  %v1326_v51 = vpack.c.bf16 %v1308_v41, %v1305_v34  ;;  %v8162_v22 = vld [vmem:[%s9996_s1 + $0xd8] sm:$0xff]  }
 0x138   : > { %6999 = vmatpush3.bf16.msra.mxu1 %v1019_v3  ;;  %7002 = vmatprep.mubr.bf16.mxu1 %v8151_v26  ;;  %v8163_v26 = vld [vmem:[%s9996_s1 + $0xe0] sm:$0xff]  }
 0x139   : > { %7000 = vmatprep.subr.bf16.mxu1 %v1020_v1 }
 0x13b   : > { %v7132_v52 = vpop.f32.mrb[32].mxu0 }
 0x13c   : > { %7001 = vmatpush3.bf16.msra.mxu1 %v1020_v1  ;;  %v1718_v53 = vpop.f32.mrb[33].mxu0 }
 0x13d   : > { %7050 = vmatprep.subr.bf16.mxu1 %v1320_v11  ;;  %v7133_v55 = vpop.f32.mrb[34].mxu0 }
 0x13e   : > { %v8848_v57 = vpack.c.bf16 %v7133_v55, %v7132_v52  ;;  %v1721_v58 = vpop.f32.mrb[35].mxu0  ;;  %v8167_v52 = vld [vmem:[%s9996_s1 + $0x100] sm:$0xff]   ;;  %v8381_v55 = vmov 0  }
 0x13f   : > { %7003 = vmatmul.mubr.bf16.vlgmr.msra.gmra.mrb[16].mxu1 %v8152_v35  ;;  %v8850_v59 = vpack.c.bf16 %v1721_v58, %v1718_v53  ;;  %v8165_v35 = vld [vmem:[%s9996_s1 + $0xf0] sm:$0xff]   ;;  %8117 = vset.pattern.permute.xlu0 %v8381_v55 }
 0x140   : > { %7051 = vmatpush3.bf16.msra.mxu1 %v1320_v11  ;;  %7006 = vmatprep.mubr.bf16.mxu1 %v8153_v37  ;;  %v2737_v58 = vld [vmem:[%s9997_s2 + $0x10] sm:$0xff] }
 0x141   : > { %7052 = vmatprep.subr.bf16.mxu1 %v1321_v9  ;;  %8118 = vset.pattern.permute.xlu1 %v8381_v55 }
 0x142   : > { %2763 = vperm.xlu1 %8118, %v2737_v58   ;;  %v5319_v58 = vld [vmem:[%s9999_s4 + $0x8] sm:$0xff] }
 0x143   : > { %v7136_v60 = vpop.f32.mrb[36].mxu0 }
 0x144   : > { %7053 = vmatpush3.bf16.msra.mxu1 %v1321_v9  ;;  %v1734_v61 = vpop.f32.mrb[37].mxu0 }
 0x145   : > { %7054 = vmatprep.subr.bf16.mxu1 %v1322_v19  ;;  %v7137_v63 = vpop.f32.mrb[38].mxu0 }
 0x146   : > { %v8858_v1 = vpack.c.bf16 %v7137_v63, %v7136_v60  ;;  %v1737_v2 = vpop.f32.mrb[39].mxu0  ;;  %v2736_v60 = vld [vmem:[%s9997_s2 + $0x8] sm:$0xff]  ;;  %v8169_v63 = vld [vmem:[%s9996_s1 + $0x110] sm:$0xff]  }
 0x147   : > { %7007 = vmatmul.mubr.bf16.gmra.mrb[20].mxu1 %v8154_v54  ;;  %v8860_v3 = vpack.c.bf16 %v1737_v2, %v1734_v61 }
 0x148   : > { %7055 = vmatpush3.bf16.msra.mxu1 %v1322_v19  ;;  %7010 = vmatprep.mubr.bf16.mxu1 %v8155_v56  ;;  %v2735_v56 = vld [vmem:[%s9997_s2] sm:$0xff] }
 0x149   : > { %7056 = vmatprep.subr.bf16.mxu1 %v1323_v17  ;;  %2753 = vperm.xlu0 %8117, %v2735_v56  }
 0x14b   : > { %v7140_v4 = vpop.f32.mrb[40].mxu0 }
 0x14c   : > { %7057 = vmatpush3.bf16.msra.mxu1 %v1323_v17  ;;  %v1750_v5 = vpop.f32.mrb[41].mxu0 }
 0x14d   : > { %7058 = vmatprep.subr.bf16.mxu1 %v1324_v30  ;;  %v7141_v7 = vpop.f32.mrb[42].mxu0  ;;  %2758 = vperm.xlu0 %8117, %v2736_v60  }
 0x14e   : > { %v8868_v9 = vpack.c.bf16 %v7141_v7, %v7140_v4  ;;  %v1753_v10 = vpop.f32.mrb[43].mxu0  ;;  %v2738_v4 = vld [vmem:[%s9997_s2 + $0x18] sm:$0xff]  ;;  %v2741_v7 = vld [vmem:[%s9997_s2 + $0x30] sm:$0xff] }
 0x14f   : > { %7011 = vmatmul.mubr.bf16.gmra.mrb[24].mxu1 %v8156_v62  ;;  %v8870_v11 = vpack.c.bf16 %v1753_v10, %v1750_v5  ;;  %v8168_v62 = vld [vmem:[%s9996_s1 + $0x108] sm:$0xff]   ;;  %v2739_v5 = vld [vmem:[%s9997_s2 + $0x20] sm:$0xff]  ;;  %2768 = vperm.xlu1 %8118, %v2738_v4  }
 0x150   : > { %7059 = vmatpush3.bf16.msra.mxu1 %v1324_v30  ;;  %7014 = vmatprep.mubr.bf16.mxu1 %v8157_v0 }
 0x151   : > { %7060 = vmatprep.subr.bf16.mxu1 %v1325_v28  ;;  %2773 = vperm.xlu0 %8117, %v2739_v5  }
 0x153   : > { %v7144_v12 = vpop.f32.mrb[44].mxu0 }
 0x154   : > { %7061 = vmatpush3.bf16.msra.mxu1 %v1325_v28  ;;  %v1766_v13 = vpop.f32.mrb[45].mxu0 }
 0x155   : > { %7062 = vmatprep.subr.bf16.mxu1 %v1326_v51  ;;  %v7145_v15 = vpop.f32.mrb[46].mxu0  ;;  %2783 = vperm.xlu0 %8117, %v2741_v7   ;;  %v5323_v7 = vld [vmem:[%s9999_s4 + $0x28] sm:$0xff] }
 0x156   : > { %v8878_v17 = vpack.c.bf16 %v7145_v15, %v7144_v12  ;;  %v1769_v18 = vpop.f32.mrb[47].mxu0  ;;  %v8170_v12 = vld [vmem:[%s9996_s1 + $0x118] sm:$0xff]   ;;  %v8171_v15 = vld [vmem:[%s9996_s1 + $0x120] sm:$0xff]  }
 0x157   : > { %7015 = vmatmul.mubr.bf16.gmra.mrb[28].mxu1 %v8158_v6  ;;  %v8881_v19 = vpack.c.bf16 %v1769_v18, %v1766_v13 }
 0x158   : > { %7063 = vmatpush3.bf16.msra.mxu1 %v1326_v51  ;;  %7066 = vmatprep.mubr.bf16.mxu1 %v8159_v8 }
 0x159   : > { %7064 = vmatprep.subr.bf16.mxu1 %v1327_v40 }
 0x15b   : > { %v7196_v20 = vpop.f32.mrb[48].mxu0 }
 0x15c   : > { %7065 = vmatpush3.bf16.msra.mxu1 %v1327_v40  ;;  %v2025_v21 = vpop.f32.mrb[49].mxu0 }
 0x15d   : > { %7082 = vmatprep.subr.bf16.mxu1 %v8666_v43  ;;  %v7197_v23 = vpop.f32.mrb[50].mxu0 }
 0x15e   : > { %v8892_v28 = vpack.c.bf16 %v7197_v23, %v7196_v20  ;;  %v2028_v29 = vpop.f32.mrb[51].mxu0 }
 0x15f   : > { %7067 = vmatmul.mubr.bf16.vlgmr.msra.gmra.mrb[16].mxu1 %v8160_v14  ;;  %v2742_v14 = vld [vmem:[%s9997_s2 + $0x38] sm:$0xff] }
 0x160   : > { %7083 = vmatpush3.bf16.msra.mxu1 %v8666_v43  ;;  %7070 = vmatprep.mubr.bf16.mxu1 %v8161_v16  ;;  %v8895_v43 = vpack.c.bf16 %v2028_v29, %v2025_v21  ;;  %v2744_v21 = vld [vmem:[%s9997_s2 + $0x48] sm:$0xff] }
 0x161   : > { %7084 = vmatprep.subr.bf16.mxu1 %v8678_v44 }
 0x163   : > { %v7200_v30 = vpop.f32.mrb[52].mxu0 }
 0x164   : > { %7085 = vmatpush3.bf16.msra.mxu1 %v8678_v44  ;;  %v2041_v31 = vpop.f32.mrb[53].mxu0  ;;  %v8164_v44 = vld [vmem:[%s9996_s1 + $0xe8] sm:$0xff]  }
 0x165   : > { %7086 = vmatprep.subr.bf16.mxu1 %v8683_v45  ;;  %v7201_v34 = vpop.f32.mrb[54].mxu0 }
 0x166   : > { %v8906_v36 = vpack.c.bf16 %v7201_v34, %v7200_v30  ;;  %v2044_v37 = vpop.f32.mrb[55].mxu0  ;;  %v2746_v30 = vld [vmem:[%s9997_s2 + $0x58] sm:$0xff] }
 0x167   : > { %7071 = vmatmul.mubr.bf16.gmra.mrb[20].mxu1 %v8162_v22 }
 0x168   : > { %7087 = vmatpush3.bf16.msra.mxu1 %v8683_v45  ;;  %7074 = vmatprep.mubr.bf16.mxu1 %v8163_v26  ;;  %v8909_v45 = vpack.c.bf16 %v2044_v37, %v2041_v31  ;;  %v8172_v26 = vld [vmem:[%s9996_s1 + $0x128] sm:$0xff]   ;;  %v8173_v31 = vld [vmem:[%s9996_s1 + $0x130] sm:$0xff]  }
 0x169   : > { %7088 = vmatprep.subr.bf16.mxu1 %v8692_v46  ;;  %v2748_v37 = vld [vmem:[%s9997_s2 + $0x68] sm:$0xff] }
 0x16b   : > { %v7204_v40 = vpop.f32.mrb[56].mxu0 }
 0x16c   : > { %7089 = vmatpush3.bf16.msra.mxu1 %v8692_v46  ;;  %v2057_v41 = vpop.f32.mrb[57].mxu0  ;;  %v8166_v46 = vld [vmem:[%s9996_s1 + $0xf8] sm:$0xff]  }
 0x16d   : > { %7090 = vmatprep.subr.bf16.mxu1 %v8695_v47  ;;  %v7205_v51 = vpop.f32.mrb[58].mxu0 }
 0x16e   : > { %v8920_v53 = vpack.c.bf16 %v7205_v51, %v7204_v40  ;;  %v2060_v54 = vpop.f32.mrb[59].mxu0 }
 0x16f   : > { %7075 = vmatmul.mubr.bf16.gmra.mrb[24].mxu1 %v8164_v44 }
 0x170   : > { %7091 = vmatpush3.bf16.msra.mxu1 %v8695_v47  ;;  %7078 = vmatprep.mubr.bf16.mxu1 %v8165_v35  ;;  %v8923_v47 = vpack.c.bf16 %v2060_v54, %v2057_v41  ;;  %v8175_v54 = vld [vmem:[%s9996_s1 + $0x140] sm:$0xff]  }
 0x171   : > { %7092 = vmatprep.subr.bf16.mxu1 %v8704_v48 }
 0x174   : > { %7093 = vmatpush3.bf16.msra.mxu1 %v8704_v48  ;;  %v7208_v48 = vpop.f32.mrb[60].mxu0 }
 0x175   : > { %7094 = vmatprep.subr.bf16.mxu1 %v8706_v49  ;;  %v2073_v61 = vpop.f32.mrb[61].mxu0 }
 0x177   : > { %7079 = vmatmul.mubr.bf16.gmra.mrb[28].mxu1 %v8166_v46  ;;  %v8174_v46 = vld [vmem:[%s9996_s1 + $0x138] sm:$0xff]  }
 0x178   : > { %7095 = vmatpush3.bf16.msra.mxu1 %v8706_v49  ;;  %7098 = vmatprep.mubr.bf16.mxu1 %v8167_v52  ;;  %v7209_v49 = vpop.f32.mrb[62].mxu0  ;;  %v2750_v52 = vld [vmem:[%s9997_s2 + $0x78] sm:$0xff] }
 0x179   : > { %7096 = vmatprep.subr.bf16.mxu1 %v8715_v50  ;;  %v8943_v0 = vpack.c.bf16 %v7209_v49, %v7208_v48  ;;  %v2076_v2 = vpop.f32.mrb[63].mxu0 }
 0x17a   : > { %v8952_v6 = vpack.c.bf16 %v2076_v2, %v2073_v61  ;;  %v8177_v2 = vld [vmem:[%s9996_s1 + $0x150] sm:$0xff]  }
 0x17b   : > { %v7292_v8 = vpop.f32.mrb[64].mxu0 }
 0x17c   : > { %7097 = vmatpush3.bf16.msra.mxu1 %v8715_v50  ;;  %v2740_v50 = vld [vmem:[%s9997_s2 + $0x28] sm:$0xff]  ;;  %v2486_v10 = vpop.f32.mrb[65].mxu0 }
 0x17d   : > { %7146 = vmatprep.subr.bf16.mxu1 %v8850_v59  ;;  %2778 = vperm.xlu1 %8118, %v2740_v50   ;;  %v7293_v13 = vpop.f32.mrb[66].mxu0 }
 0x17e   : > { %v8975_v16 = vpack.c.bf16 %v7293_v13, %v7292_v8  ;;  %v2489_v18 = vpop.f32.mrb[67].mxu0  ;;  %v8178_v8 = vld [vmem:[%s9996_s1 + $0x158] sm:$0xff]   ;;  %v5327_v13 = vld [vmem:[%s9999_s4 + $0x48] sm:$0xff] }
 0x17f   : > { %7099 = vmatmul.mubr.bf16.vlgmr.msra.gmra.mrb[16].mxu1 %v8168_v62  ;;  %v8978_v20 = vpack.c.bf16 %v2489_v18, %v2486_v10  ;;  %v8176_v62 = vld [vmem:[%s9996_s1 + $0x148] sm:$0xff]   ;;  %v5325_v10 = vld [vmem:[%s9999_s4 + $0x38] sm:$0xff] }
 0x180   : > { %7147 = vmatpush3.bf16.msra.mxu1 %v8850_v59  ;;  %7102 = vmatprep.mubr.bf16.mxu1 %v8169_v63  ;;  %v2743_v59 = vld [vmem:[%s9997_s2 + $0x40] sm:$0xff]  ;;  %v5321_v63 = vld [vmem:[%s9999_s4 + $0x18] sm:$0xff]  ;;  %v5331_v18 = vld [vmem:[%s9999_s4 + $0x68] sm:$0xff] }
 0x181   : > { %7148 = vmatprep.subr.bf16.mxu1 %v8848_v57  ;;  %2788 = vperm.xlu1 %8118, %v2742_v14   ;;  %v5328_v14 = vld [vmem:[%s9999_s4 + $0x50] sm:$0xff] }
 0x182   : > { %2793 = vperm.xlu0 %8117, %v2743_v59   ;;  %v5329_v59 = vld [vmem:[%s9999_s4 + $0x58] sm:$0xff] }
 0x183   : > { %v7296_v22 = vpop.f32.mrb[68].mxu0 }
 0x184   : > { %7149 = vmatpush3.bf16.msra.mxu1 %v8848_v57  ;;  %v2745_v57 = vld [vmem:[%s9997_s2 + $0x50] sm:$0xff]  ;;  %v2502_v23 = vpop.f32.mrb[69].mxu0 }
 0x185   : > { %7150 = vmatprep.subr.bf16.mxu1 %v8860_v3  ;;  %2798 = vperm.xlu1 %8118, %v2744_v21   ;;  %v7297_v29 = vpop.f32.mrb[70].mxu0  ;;  %v5332_v21 = vld [vmem:[%s9999_s4 + $0x70] sm:$0xff] }
 0x186   : > { %2803 = vperm.xlu0 %8117, %v2745_v57   ;;  %v9001_v44 = vpack.c.bf16 %v7297_v29, %v7296_v22  ;;  %v2505_v34 = vpop.f32.mrb[71].mxu0  ;;  %v5333_v57 = vld [vmem:[%s9999_s4 + $0x78] sm:$0xff]  ;;  %v5470_v22 = vld [vmem:[%s10001_s6] sm:$0xff] }
 0x187   : > { %7103 = vmatmul.mubr.bf16.gmra.mrb[20].mxu1 %v8170_v12  ;;  %v9004_v35 = vpack.c.bf16 %v2505_v34, %v2502_v23  ;;  %v5326_v12 = vld [vmem:[%s9999_s4 + $0x40] sm:$0xff]  ;;  %v5471_v23 = vld [vmem:[%s10001_s6 + $0x8] sm:$0xff]  ;;  %v5473_v29 = vld [vmem:[%s10001_s6 + $0x18] sm:$0xff] }
 0x188   : > { %7151 = vmatpush3.bf16.msra.mxu1 %v8860_v3  ;;  %7106 = vmatprep.mubr.bf16.mxu1 %v8171_v15  ;;  %v2747_v3 = vld [vmem:[%s9997_s2 + $0x60] sm:$0xff]  ;;  %v9164_v34 = vld [vmem:[%s10002_s7 + $0x8] sm:$0xff]  }
 0x189   : > { %7152 = vmatprep.subr.bf16.mxu1 %v8858_v1  ;;  %2808 = vperm.xlu1 %8118, %v2746_v30   ;;  %v5330_v15 = vld [vmem:[%s9999_s4 + $0x60] sm:$0xff] }
 0x18a   : > { %2813 = vperm.xlu0 %8117, %v2747_v3   ;;  %v5474_v30 = vld [vmem:[%s10001_s6 + $0x20] sm:$0xff] }
 0x18b   : > { %v7300_v40 = vpop.f32.mrb[72].mxu0  ;;  %v9149_v3 = vld [vmem:[%s10002_s7] sm:$0xff]  }
 0x18c   : > { %7153 = vmatpush3.bf16.msra.mxu1 %v8858_v1  ;;  %v2749_v1 = vld [vmem:[%s9997_s2 + $0x70] sm:$0xff]  ;;  %v2518_v41 = vpop.f32.mrb[73].mxu0  ;;  %7338 = vmatprep.subr.bf16.mxu0 %v9149_v3 }
 0x18d   : > { %7154 = vmatprep.subr.bf16.mxu1 %v8870_v11  ;;  %2818 = vperm.xlu1 %8118, %v2748_v37   ;;  %v7301_v51 = vpop.f32.mrb[74].mxu0  ;;  %v8186_v37 = vld [vmem:[%s9996_s1 + $0x198] sm:$0xff]  }
 0x18e   : > { %2823 = vperm.xlu0 %8117, %v2749_v1   ;;  %v9027_v55 = vpack.c.bf16 %v7301_v51, %v7300_v40  ;;  %v2521_v56 = vpop.f32.mrb[75].mxu0  ;;  %7339 = vmatpush3.bf16.msra.mxu0 %v9149_v3  ;;  %v5478_v1 = vld [vmem:[%s10001_s6 + $0x40] sm:$0xff]  ;;  %v9200_v51 = vld [vmem:[%s10002_s7 + $0x18] sm:$0xff]  }
 0x18f   : > { %7107 = vmatmul.mubr.bf16.gmra.mrb[24].mxu1 %v8172_v26  ;;  %v9030_v48 = vpack.c.bf16 %v2521_v56, %v2518_v41  ;;  %v5472_v26 = vld [vmem:[%s10001_s6 + $0x10] sm:$0xff]  ;;  %7340 = vmatprep.subr.bf16.mxu0 %v9164_v34  ;;  %v8187_v40 = vld [vmem:[%s9996_s1 + $0x1a0] sm:$0xff]  }
 0x190   : > { %7155 = vmatpush3.bf16.msra.mxu1 %v8870_v11  ;;  %7110 = vmatprep.mubr.bf16.mxu1 %v8173_v31  ;;  %v5318_v11 = vld [vmem:[%s9999_s4] sm:$0xff]  ;;  %v5475_v31 = vld [vmem:[%s10001_s6 + $0x28] sm:$0xff]  ;;  %v9185_v41 = vld [vmem:[%s10002_s7 + $0x10] sm:$0xff]  }
 0x191   : > { %7156 = vmatprep.subr.bf16.mxu1 %v8868_v9  ;;  %2828 = vperm.xlu1 %8118, %v2750_v52   ;;  %v8188_v52 = vld [vmem:[%s9996_s1 + $0x1a8] sm:$0xff]   ;;  %v9221_v56 = vld [vmem:[%s10002_s7 + $0x20] sm:$0xff]  }
 0x192   : > { %5336 = vperm.xlu0 %8117, %v5318_v11   ;;  %7341 = vmatpush3.bf16.msra.mxu0 %v9164_v34  ;;  %v5482_v11 = vld [vmem:[%s10001_s6 + $0x60] sm:$0xff] }
 0x193   : > { %v7304_v60 = vpop.f32.mrb[76].mxu0  ;;  %7342 = vmatprep.subr.bf16.mxu0 %v9185_v41 }
 0x194   : > { %7157 = vmatpush3.bf16.msra.mxu1 %v8868_v9  ;;  %v5320_v9 = vld [vmem:[%s9999_s4 + $0x10] sm:$0xff]  ;;  %v2534_v61 = vpop.f32.mrb[77].mxu0 }
 0x195   : > { %7158 = vmatprep.subr.bf16.mxu1 %v8881_v19  ;;  %5341 = vperm.xlu1 %8118, %v5319_v58   ;;  %v7305_v49 = vpop.f32.mrb[78].mxu0  ;;  %v5484_v58 = vld [vmem:[%s10001_s6 + $0x70] sm:$0xff] }
 0x196   : > { %5346 = vperm.xlu0 %8117, %v5320_v9   ;;  %v9053_v4 = vpack.c.bf16 %v7305_v49, %v7304_v60  ;;  %v2537_v5 = vpop.f32.mrb[79].mxu0  ;;  %7343 = vmatpush3.bf16.msra.mxu0 %v9185_v41  ;;  %v9236_v9 = vld [vmem:[%s10002_s7 + $0x28] sm:$0xff]   ;;  %v8190_v60 = vld [vmem:[%s9996_s1 + $0x1b8] sm:$0xff]  }
 0x197   : > { %7111 = vmatmul.mubr.bf16.gmra.mrb[28].mxu1 %v8174_v46  ;;  %v9056_v50 = vpack.c.bf16 %v2537_v5, %v2534_v61  ;;  %v5480_v46 = vld [vmem:[%s10001_s6 + $0x50] sm:$0xff]  ;;  %7344 = vmatprep.subr.bf16.mxu0 %v9200_v51  ;;  %v8191_v61 = vld [vmem:[%s9996_s1 + $0x1c0] sm:$0xff]   ;;  %v8202_v49 = vld [vmem:[%s9996_s1 + $0x218] sm:$0xff]  }
 0x198   : > { %7159 = vmatpush3.bf16.msra.mxu1 %v8881_v19  ;;  %7162 = vmatprep.mubr.bf16.mxu1 %v8175_v54  ;;  %v5322_v19 = vld [vmem:[%s9999_s4 + $0x20] sm:$0xff]  ;;  %v8189_v54 = vld [vmem:[%s9996_s1 + $0x1b0] sm:$0xff]  }
 0x199   : > { %7160 = vmatprep.subr.bf16.mxu1 %v8878_v17  ;;  %5351 = vperm.xlu1 %8118, %v5321_v63   ;;  %v8203_v63 = vld [vmem:[%s9996_s1 + $0x220] sm:$0xff]   ;;  %v9330_v5 = vld [vmem:[%s10002_s7 + $0x30] sm:$0xff]  }
 0x19a   : > { %5356 = vperm.xlu0 %8117, %v5322_v19   ;;  %7345 = vmatpush3.bf16.msra.mxu0 %v9200_v51  ;;  %v8204_v19 = vld [vmem:[%s9996_s1 + $0x228] sm:$0xff]  }
 0x19b   : > { %7346 = vmatprep.subr.bf16.mxu0 %v9221_v56 }
 0x19c   : > { %7161 = vmatpush3.bf16.msra.mxu1 %v8878_v17  ;;  %v5324_v17 = vld [vmem:[%s9999_s4 + $0x30] sm:$0xff] }
 0x19d   : > { %7210 = vmatprep.subr.bf16.mxu1 %v8895_v43  ;;  %5361 = vperm.xlu1 %8118, %v5323_v7   ;;  %v9348_v7 = vld [vmem:[%s10002_s7 + $0x80] sm:$0xff]  }
 0x19e   : > { %5366 = vperm.xlu0 %8117, %v5324_v17   ;;  %7347 = vmatpush3.bf16.msra.mxu0 %v9221_v56 }
 0x19f   : > { %7163 = vmatmul.mubr.bf16.vlgmr.msra.gmra.mrb[16].mxu1 %v8176_v62  ;;  %7348 = vmatprep.subr.bf16.mxu0 %v9236_v9  ;;  %v8192_v62 = vld [vmem:[%s9996_s1 + $0x1c8] sm:$0xff]  }
 0x1a0   : > { %7211 = vmatpush3.bf16.msra.mxu1 %v8895_v43  ;;  %7166 = vmatprep.mubr.bf16.mxu1 %v8177_v2  ;;  %v8179_v43 = vld [vmem:[%s9996_s1 + $0x160] sm:$0xff]   ;;  %v8205_v2 = vld [vmem:[%s9996_s1 + $0x230] sm:$0xff]  }
 0x1a1   : > { %7212 = vmatprep.subr.bf16.mxu1 %v8892_v28  ;;  %5371 = vperm.xlu1 %8118, %v5325_v10  }
 0x1a2   : > { %5376 = vperm.xlu0 %8117, %v5326_v12   ;;  %7349 = vmatpush3.bf16.msra.mxu0 %v9236_v9 }
 0x1a3   : > { %7350 = vmatprep.subr.bf16.mxu0 %v9330_v5 }
 0x1a4   : > { %7213 = vmatpush3.bf16.msra.mxu1 %v8892_v28  ;;  %v8180_v28 = vld [vmem:[%s9996_s1 + $0x168] sm:$0xff]  }
 0x1a5   : > { %7214 = vmatprep.subr.bf16.mxu1 %v8909_v45  ;;  %5381 = vperm.xlu1 %8118, %v5327_v13  }
 0x1a6   : > { %5386 = vperm.xlu0 %8117, %v5328_v14   ;;  %7351 = vmatpush3.bf16.msra.mxu0 %v9330_v5 }
 0x1a7   : > { %7167 = vmatmul.mubr.bf16.gmra.mrb[20].mxu1 %v8178_v8 }
 0x1a8   : > { %7215 = vmatpush3.bf16.msra.mxu1 %v8909_v45  ;;  %7170 = vmatprep.mubr.bf16.mxu1 %v8179_v43  ;;  %v8181_v45 = vld [vmem:[%s9996_s1 + $0x170] sm:$0xff]  }
 0x1a9   : > { %7216 = vmatprep.subr.bf16.mxu1 %v8906_v36  ;;  %5391 = vperm.xlu1 %8118, %v5329_v59  }
 0x1aa   : > { %5396 = vperm.xlu0 %8117, %v5330_v15  }
 0x1ac   : > { %7217 = vmatpush3.bf16.msra.mxu1 %v8906_v36  ;;  %v8182_v36 = vld [vmem:[%s9996_s1 + $0x178] sm:$0xff]  }
 0x1ad   : > { %7218 = vmatprep.subr.bf16.mxu1 %v8923_v47  ;;  %5401 = vperm.xlu1 %8118, %v5331_v18  }
 0x1ae   : > { %5406 = vperm.xlu0 %8117, %v5332_v21  }
 0x1af   : > { %7171 = vmatmul.mubr.bf16.gmra.mrb[24].mxu1 %v8180_v28 }
 0x1b0   : > { %7219 = vmatpush3.bf16.msra.mxu1 %v8923_v47  ;;  %7174 = vmatprep.mubr.bf16.mxu1 %v8181_v45  ;;  %v8183_v47 = vld [vmem:[%s9996_s1 + $0x180] sm:$0xff]  }
 0x1b1   : > { %7220 = vmatprep.subr.bf16.mxu1 %v8920_v53  ;;  %5411 = vperm.xlu1 %8118, %v5333_v57  }
 0x1b2   : > { %5488 = vperm.xlu0 %8117, %v5470_v22  }
 0x1b4   : > { %7221 = vmatpush3.bf16.msra.mxu1 %v8920_v53  ;;  %v8184_v53 = vld [vmem:[%s9996_s1 + $0x188] sm:$0xff]  }
 0x1b5   : > { %7222 = vmatprep.subr.bf16.mxu1 %v8952_v6  ;;  %5493 = vperm.xlu1 %8118, %v5471_v23  }
 0x1b6   : > { %5498 = vperm.xlu0 %8117, %v5472_v26  }
 0x1b7   : > { %7175 = vmatmul.mubr.bf16.gmra.mrb[28].mxu1 %v8182_v36  ;;  %v9354_v36 = vld [vmem:[%s10003_s8] ss:$0 sm:$0xff] }
 0x1b8   : > { %7223 = vmatpush3.bf16.msra.mxu1 %v8952_v6  ;;  %7226 = vmatprep.mubr.bf16.mxu1 %v8183_v47  ;;  %v8185_v6 = vld [vmem:[%s9996_s1 + $0x190] sm:$0xff]  }
 0x1b9   : > { %7224 = vmatprep.subr.bf16.mxu1 %v8943_v0  ;;  %5503 = vperm.xlu1 %8118, %v5473_v29  }
 0x1ba   : > { %5508 = vperm.xlu0 %8117, %v5474_v30  }
 0x1bc   : > { %7225 = vmatpush3.bf16.msra.mxu1 %v8943_v0  ;;  %v5476_v0 = vld [vmem:[%s10001_s6 + $0x30] sm:$0xff] }
 0x1bd   : > { %7242 = vmatprep.subr.bf16.mxu1 %v8576_v25  ;;  %5513 = vperm.xlu1 %8118, %v5475_v31  }
 0x1be   : > { %5518 = vperm.xlu0 %8117, %v5476_v0  }
 0x1bf   : > { %7227 = vmatmul.mubr.bf16.vlgmr.msra.gmra.mrb[16].mxu1 %v8184_v53 }
 0x1c0   : > { %7243 = vmatpush3.bf16.msra.mxu1 %v8576_v25  ;;  %7230 = vmatprep.mubr.bf16.mxu1 %v8185_v6  ;;  %v5477_v25 = vld [vmem:[%s10001_s6 + $0x38] sm:$0xff] }
 0x1c1   : > { %7244 = vmatprep.subr.bf16.mxu1 %v8586_v27  ;;  %5523 = vperm.xlu1 %8118, %v5477_v25   ;;  %v2764_v8 = vpop.permute.xlu1 %2763  ;;  %v8382_v25 = vmov 0.0  }
 0x1c2   : > { %5528 = vperm.xlu0 %8117, %v5478_v1  }
 0x1c4   : > { %7245 = vmatpush3.bf16.msra.mxu1 %v8586_v27  ;;  %v5479_v27 = vld [vmem:[%s10001_s6 + $0x48] sm:$0xff] }
 0x1c5   : > { %7246 = vmatprep.subr.bf16.mxu1 %v8609_v32  ;;  %5533 = vperm.xlu1 %8118, %v5479_v27  }
 0x1c6   : > { %5538 = vperm.xlu0 %8117, %v5480_v46  }
 0x1c7   : > { %7231 = vmatmul.mubr.bf16.gmra.mrb[20].mxu1 %v8186_v37 }
 0x1c8   : > { %7247 = vmatpush3.bf16.msra.mxu1 %v8609_v32  ;;  %7234 = vmatprep.mubr.bf16.mxu1 %v8187_v40  ;;  %v5481_v32 = vld [vmem:[%s10001_s6 + $0x58] sm:$0xff]  ;;  %v2754_v17 = vpop.permute.xlu0 %2753 }
 0x1c9   : > { %7248 = vmatprep.subr.bf16.mxu1 %v8613_v33  ;;  %5543 = vperm.xlu1 %8118, %v5481_v32  }
 0x1ca   : > { %5548 = vperm.xlu0 %8117, %v5482_v11  }
 0x1cc   : > { %7249 = vmatpush3.bf16.msra.mxu1 %v8613_v33  ;;  %v5483_v33 = vld [vmem:[%s10001_s6 + $0x68] sm:$0xff]  ;;  %v2759_v10 = vpop.permute.xlu0 %2758 }
 0x1cd   : > { %7250 = vmatprep.subr.bf16.mxu1 %v8633_v38  ;;  %5553 = vperm.xlu1 %8118, %v5483_v33  }
 0x1ce   : > { %5558 = vperm.xlu0 %8117, %v5484_v58   ;;  %v2769_v12 = vpop.permute.xlu1 %2768 }
 0x1cf   : > { %7235 = vmatmul.mubr.bf16.gmra.mrb[24].mxu1 %v8188_v52 }
 0x1d0   : > { %7251 = vmatpush3.bf16.msra.mxu1 %v8633_v38  ;;  %7238 = vmatprep.mubr.bf16.mxu1 %v8189_v54  ;;  %v5485_v38 = vld [vmem:[%s10001_s6 + $0x78] sm:$0xff]  ;;  %v2774_v43 = vpop.permute.xlu0 %2773 }
 0x1d1   : > { %7252 = vmatprep.subr.bf16.mxu1 %v8636_v39  ;;  %5563 = vperm.xlu1 %8118, %v5485_v38  }
 0x1d4   : > { %7253 = vmatpush3.bf16.msra.mxu1 %v8636_v39  ;;  %v8193_v39 = vld [vmem:[%s9996_s1 + $0x1d0] sm:$0xff]   ;;  %v2784_v14 = vpop.permute.xlu0 %2783 }
 0x1d5   : > { %7254 = vmatprep.subr.bf16.mxu1 %v8650_v42 }
 0x1d7   : > { %7239 = vmatmul.mubr.bf16.gmra.mrb[28].mxu1 %v8190_v60 }
 0x1d8   : > { %7255 = vmatpush3.bf16.msra.mxu1 %v8650_v42  ;;  %7258 = vmatprep.mubr.bf16.mxu1 %v8191_v61  ;;  %v8194_v42 = vld [vmem:[%s9996_s1 + $0x1d8] sm:$0xff]  }
 0x1d9   : > { %7256 = vmatprep.subr.bf16.mxu1 %v8572_v24 }
 0x1dc   : > { %7257 = vmatpush3.bf16.msra.mxu1 %v8572_v24  ;;  %v8195_v24 = vld [vmem:[%s9996_s1 + $0x1e0] sm:$0xff]  }
 0x1dd   : > { %7306 = vmatprep.subr.bf16.mxu1 %v8978_v20 }
 0x1df   : > { %7259 = vmatmul.mubr.bf16.vlgmr.msra.gmra.mrb[16].mxu1 %v8192_v62  ;;  %v9374_v62 = vld [vmem:[%s10002_s7 + $0x88] sm:$0xff]  }
 0x1e0   : > { %7307 = vmatpush3.bf16.msra.mxu1 %v8978_v20  ;;  %7262 = vmatprep.mubr.bf16.mxu1 %v8193_v39  ;;  %v8196_v20 = vld [vmem:[%s9996_s1 + $0x1e8] sm:$0xff]  }
 0x1e1   : > { %7308 = vmatprep.subr.bf16.mxu1 %v8975_v16 }
 0x1e4   : > { %7309 = vmatpush3.bf16.msra.mxu1 %v8975_v16  ;;  %v8197_v16 = vld [vmem:[%s9996_s1 + $0x1f0] sm:$0xff]  }
 0x1e5   : > { %7310 = vmatprep.subr.bf16.mxu1 %v9004_v35 }
 0x1e7   : > { %7263 = vmatmul.mubr.bf16.gmra.mrb[20].mxu1 %v8194_v42 }
 0x1e8   : > { %7311 = vmatpush3.bf16.msra.mxu1 %v9004_v35  ;;  %7266 = vmatprep.mubr.bf16.mxu1 %v8195_v24  ;;  %v8198_v35 = vld [vmem:[%s9996_s1 + $0x1f8] sm:$0xff]  }
 0x1e9   : > { %7312 = vmatprep.subr.bf16.mxu1 %v9001_v44 }
 0x1ec   : > { %7313 = vmatpush3.bf16.msra.mxu1 %v9001_v44  ;;  %v8199_v44 = vld [vmem:[%s9996_s1 + $0x200] sm:$0xff]  }
 0x1ed   : > { %7314 = vmatprep.subr.bf16.mxu1 %v9030_v48 }
 0x1ef   : > { %7267 = vmatmul.mubr.bf16.gmra.mrb[24].mxu1 %v8196_v20 }
 0x1f0   : > { %7315 = vmatpush3.bf16.msra.mxu1 %v9030_v48  ;;  %7270 = vmatprep.mubr.bf16.mxu1 %v8197_v16  ;;  %v8200_v48 = vld [vmem:[%s9996_s1 + $0x208] sm:$0xff]  }
 0x1f1   : > { %7316 = vmatprep.subr.bf16.mxu1 %v9027_v55 }
 0x1f4   : > { %7317 = vmatpush3.bf16.msra.mxu1 %v9027_v55  ;;  %v8201_v55 = vld [vmem:[%s9996_s1 + $0x210] sm:$0xff]  }
 0x1f5   : > { %7318 = vmatprep.subr.bf16.mxu1 %v9056_v50 }
 0x1f7   : > { %7271 = vmatmul.mubr.bf16.gmra.mrb[28].mxu1 %v8198_v35 }
 0x1f8   : > { %7319 = vmatpush3.bf16.msra.mxu1 %v9056_v50  ;;  %7322 = vmatprep.mubr.bf16.mxu1 %v8199_v44  ;;  %v9339_v50 = vld [vmem:[%s10002_s7 + $0x38] sm:$0xff]  }
 0x1f9   : > { %7320 = vmatprep.subr.bf16.mxu1 %v9053_v4  ;;  %7352 = vmatprep.subr.bf16.mxu0 %v9339_v50 }
 0x1fa   : > { %7353 = vmatpush3.bf16.msra.mxu0 %v9339_v50 }
 0x1fc   : > { %7321 = vmatpush3.bf16.msra.mxu1 %v9053_v4  ;;  %v8206_v4 = vld [vmem:[%s9996_s1 + $0x238] sm:$0xff]   ;;  %v2779_v13 = vpop.permute.xlu1 %2778 }
 0x1fd   : > { %7498 = vmatprep.subr.bf16.mxu1 %v9149_v3 }
 0x1ff   : > { %7323 = vmatmul.mubr.bf16.vlgmr.msra.gmra.mrb[16].mxu1 %v8200_v48 }
 0x200   : > { %7326 = vmatprep.mubr.bf16.mxu1 %v8201_v55  ;;  %7499 = vmatpush3.bf16.msra.mxu1 %v9149_v3  ;;  %v2789_v45 = vpop.permute.xlu1 %2788 }
 0x201   : > { %7500 = vmatprep.subr.bf16.mxu1 %v9164_v34  ;;  %v2794_v29 = vpop.permute.xlu0 %2793 }
 0x204   : > { %7501 = vmatpush3.bf16.msra.mxu1 %v9164_v34  ;;  %v2799_v37 = vpop.permute.xlu1 %2798 }
 0x205   : > { %7502 = vmatprep.subr.bf16.mxu1 %v9185_v41  ;;  %v2804_v39 = vpop.permute.xlu0 %2803 }
 0x207   : > { %7327 = vmatmul.mubr.bf16.gmra.mrb[20].mxu1 %v8202_v49 }
 0x208   : > { %7330 = vmatprep.mubr.bf16.mxu1 %v8203_v63  ;;  %7503 = vmatpush3.bf16.msra.mxu1 %v9185_v41  ;;  %v2809_v16 = vpop.permute.xlu1 %2808 }
 0x209   : > { %7504 = vmatprep.subr.bf16.mxu1 %v9200_v51 }
 0x20c   : > { %7505 = vmatpush3.bf16.msra.mxu1 %v9200_v51 }
 0x20d   : > { %7506 = vmatprep.subr.bf16.mxu1 %v9221_v56 }
 0x20f   : > { %7331 = vmatmul.mubr.bf16.gmra.mrb[24].mxu1 %v8204_v19 }
 0x210   : > { %7334 = vmatprep.mubr.bf16.mxu1 %v8205_v2  ;;  %7507 = vmatpush3.bf16.msra.mxu1 %v9221_v56 }
 0x211   : > { %7508 = vmatprep.subr.bf16.mxu1 %v9236_v9 }
 0x214   : > { %7509 = vmatpush3.bf16.msra.mxu1 %v9236_v9 }
 0x215   : > { %7510 = vmatprep.subr.bf16.mxu1 %v9330_v5 }
 0x217   : > { %7335 = vmatmul.mubr.bf16.gmra.mrb[28].mxu1 %v8206_v4 }
 0x218   : > { %7511 = vmatpush3.bf16.msra.mxu1 %v9330_v5 }
 0x219   : > { %7512 = vmatprep.subr.bf16.mxu1 %v9339_v50 }
 0x21c   : > { %7513 = vmatpush3.bf16.msra.mxu1 %v9339_v50 }
 0x21d   : > { %7594 = vmatprep.subr.bf16.mxu1 %v9348_v7 }
 0x2d2   : > { %v7324_v28 = vpop.f32.mrb[16].mxu1 }
 0x2d3   : > { %v2833_v59 = vadd.f32 %v7324_v28, %v2764_v8  ;;  %v2656_v15 = vpop.f32.mrb[17].mxu1  ;;  %v2814_v8 = vpop.permute.xlu0 %2813 }
 0x2d4   : > { %v2831_v18 = vadd.f32 %v2754_v17, %v2656_v15  ;;  %v7325_v21 = vpop.f32.mrb[18].mxu1 }
 0x2d5   : > { %v2849_v57 = vmax.f32 %v2833_v59, 0.0  ;;  %v2834_v22 = vadd.f32 %v7325_v21, %v2769_v12  ;;  %v2659_v47 = vpop.f32.mrb[19].mxu1 }
 0x2d6   : > { %v2847_v23 = vmax.f32 %v2831_v18, 0.0  ;;  %v2832_v26 = vadd.f32 %v2759_v10, %v2659_v47 }
 0x2d7   : > { %v2850_v53 = vmax.f32 %v2834_v22, 0.0  ;;  %v2871_v31 = vmul.f32 %v9354_v36, %v2849_v57  ;;  %v9409_v57 = vld [vmem:[%s10002_s7 + $0x98] sm:$0xff]  }
 0x2d8   : > { %v2869_v30 = vmul.f32 %v9354_v36, %v2847_v23  ;;  %v2848_v6 = vmax.f32 %v2832_v26, 0.0 }
 0x2d9   : > { %v2872_v0 = vmul.f32 %v9354_v36, %v2850_v53 }
 0x2da   : > { %v9360_v1 = vpack.c.bf16 %v2869_v30, %v8382_v25  ;;  %v2870_v40 = vmul.f32 %v9354_v36, %v2848_v6  ;;  %v7328_v27 = vpop.f32.mrb[20].mxu1 }
 0x2db   : > { %v9363_v46 = vpack.c.bf16 %v2872_v0, %v2871_v31  ;;  %v2837_v52 = vadd.f32 %v7328_v27, %v2784_v14  ;;  %v2672_v32 = vpop.f32.mrb[21].mxu1  ;;  %v9401_v14 = vld [vmem:[%s10002_s7 + $0x90] sm:$0xff]  }
 0x2dc   : > { %v9365_v11 = vpack.c.bf16 %v2871_v31, %v2870_v40  ;;  %v9367_v54 = vpack.c.bf16 %v2870_v40, %v2869_v30  ;;  %v2835_v33 = vadd.f32 %v2774_v43, %v2672_v32  ;;  %v7329_v58 = vpop.f32.mrb[22].mxu1  ;;  %7354 = vmatprep.mubr.bf16.mxu0 %v9360_v1  ;;  %7370 = vmatprep.subr.bf16.mxu0 %v9360_v1 }
 0x2dd   : > { %v2853_v60 = vmax.f32 %v2837_v52, 0.0  ;;  %v2838_v38 = vadd.f32 %v7329_v58, %v2789_v45  ;;  %v2675_v61 = vpop.f32.mrb[23].mxu1  ;;  %v2819_v45 = vpop.permute.xlu1 %2818 }
 0x2de   : > { %v2851_v42 = vmax.f32 %v2835_v33, 0.0  ;;  %v2836_v24 = vadd.f32 %v2779_v13, %v2675_v61  ;;  %7355 = vmatmul.mubr.bf16.vlgmr.msra.gmra.mrb[80].mxu0 %v9365_v11  ;;  %7514 = vmatprep.mubr.bf16.mxu1 %v9367_v54 }
 0x2df   : > { %v2854_v20 = vmax.f32 %v2838_v38, 0.0  ;;  %7371 = vmatpush3.bf16.msra.mxu0 %v9360_v1  ;;  %7515 = vmatmul.mubr.bf16.vlgmr.msra.gmra.mrb[32].mxu1 %v9363_v46  ;;  %v2875_v48 = vmul.f32 %v9354_v36, %v2853_v60  ;;  %v9435_v60 = vld [vmem:[%s10002_s7 + $0xa0] sm:$0xff]  }
 0x2e0   : > { %v2873_v35 = vmul.f32 %v9354_v36, %v2851_v42  ;;  %v2852_v44 = vmax.f32 %v2836_v24, 0.0  ;;  %7372 = vmatprep.subr.bf16.mxu0 %v9365_v11  ;;  %7595 = vmatpush3.bf16.msra.mxu1 %v9348_v7 }
 0x2e1   : > { %v2876_v55 = vmul.f32 %v9354_v36, %v2854_v20  ;;  %7596 = vmatprep.subr.bf16.mxu1 %v9374_v62  ;;  %v2829_v27 = vpop.permute.xlu1 %2828  ;;  %v9443_v20 = vld [vmem:[%s10002_s7 + $0xa8] sm:$0xff]  }
 0x2e2   : > { %v9386_v49 = vpack.c.bf16 %v2873_v35, %v2872_v0  ;;  %v2874_v63 = vmul.f32 %v9354_v36, %v2852_v44  ;;  %v7332_v19 = vpop.f32.mrb[24].mxu1 }
 0x2e3   : > { %v9389_v2 = vpack.c.bf16 %v2876_v55, %v2875_v48  ;;  %v2841_v4 = vadd.f32 %v7332_v19, %v2804_v39  ;;  %7373 = vmatpush3.bf16.msra.mxu0 %v9365_v11  ;;  %v2688_v17 = vpop.f32.mrb[25].mxu1 }
 0x2e4   : > { %v9392_v10 = vpack.c.bf16 %v2875_v48, %v2874_v63  ;;  %v9394_v12 = vpack.c.bf16 %v2874_v63, %v2873_v35  ;;  %v2839_v43 = vadd.f32 %v2794_v29, %v2688_v17  ;;  %v7333_v13 = vpop.f32.mrb[26].mxu1  ;;  %7358 = vmatprep.mubr.bf16.mxu0 %v9386_v49  ;;  %7374 = vmatprep.subr.bf16.mxu0 %v9386_v49  ;;  %v2824_v29 = vpop.permute.xlu0 %2823 }
 0x2e5   : > { %v2857_v28 = vmax.f32 %v2841_v4, 0.0  ;;  %v2842_v59 = vadd.f32 %v7333_v13, %v2809_v16  ;;  %7597 = vmatpush3.bf16.msra.mxu1 %v9374_v62  ;;  %v2691_v15 = vpop.f32.mrb[27].mxu1  ;;  %v8231_v13 = vld [vmem:[%s9998_s3] sm:$0xff]  }
 0x2e6   : > { %v2855_v18 = vmax.f32 %v2839_v43, 0.0  ;;  %v2840_v21 = vadd.f32 %v2799_v37, %v2691_v15  ;;  %7359 = vmatmul.mubr.bf16.gmra.mrb[84].mxu0 %v9392_v10  ;;  %7518 = vmatprep.mubr.bf16.mxu1 %v9394_v12 }
 0x2e7   : > { %v2858_v22 = vmax.f32 %v2842_v59, 0.0  ;;  %7375 = vmatpush3.bf16.msra.mxu0 %v9386_v49  ;;  %7519 = vmatmul.mubr.bf16.gmra.mrb[36].mxu1 %v9389_v2  ;;  %v2879_v26 = vmul.f32 %v9354_v36, %v2857_v28 }
 0x2e8   : > { %v2877_v47 = vmul.f32 %v9354_v36, %v2855_v18  ;;  %v2856_v23 = vmax.f32 %v2840_v21, 0.0  ;;  %7376 = vmatprep.subr.bf16.mxu0 %v9392_v10  ;;  %7598 = vmatprep.subr.bf16.mxu1 %v9401_v14 }
 0x2e9   : > { %v2880_v53 = vmul.f32 %v9354_v36, %v2858_v22  ;;  %7599 = vmatpush3.bf16.msra.mxu1 %v9401_v14 }
 0x2ea   : > { %v9419_v30 = vpack.c.bf16 %v2877_v47, %v2876_v55  ;;  %v2878_v6 = vmul.f32 %v9354_v36, %v2856_v23  ;;  %v7336_v31 = vpop.f32.mrb[28].mxu1  ;;  %7600 = vmatprep.subr.bf16.mxu1 %v9409_v57 }
 0x2eb   : > { %v9423_v0 = vpack.c.bf16 %v2880_v53, %v2879_v26  ;;  %v2845_v37 = vadd.f32 %v7336_v31, %v2824_v29  ;;  %7377 = vmatpush3.bf16.msra.mxu0 %v9392_v10  ;;  %v2704_v40 = vpop.f32.mrb[29].mxu1 }
 0x2ec   : > { %v9426_v52 = vpack.c.bf16 %v2879_v26, %v2878_v6  ;;  %v9428_v32 = vpack.c.bf16 %v2878_v6, %v2877_v47  ;;  %v2843_v33 = vadd.f32 %v2814_v8, %v2704_v40  ;;  %v7337_v58 = vpop.f32.mrb[30].mxu1  ;;  %7362 = vmatprep.mubr.bf16.mxu0 %v9419_v30  ;;  %7378 = vmatprep.subr.bf16.mxu0 %v9419_v30 }
 0x2ed   : > { %v2861_v38 = vmax.f32 %v2845_v37, 0.0  ;;  %v2846_v61 = vadd.f32 %v7337_v58, %v2829_v27  ;;  %7601 = vmatpush3.bf16.msra.mxu1 %v9409_v57  ;;  %v2707_v39 = vpop.f32.mrb[31].mxu1 }
 0x2ee   : > { %v2859_v42 = vmax.f32 %v2843_v33, 0.0  ;;  %v2844_v24 = vadd.f32 %v2819_v45, %v2707_v39  ;;  %7363 = vmatmul.mubr.bf16.gmra.mrb[88].mxu0 %v9426_v52  ;;  %7522 = vmatprep.mubr.bf16.mxu1 %v9428_v32 }
 0x2ef   : > { %v2862_v16 = vmax.f32 %v2846_v61, 0.0  ;;  %7379 = vmatpush3.bf16.msra.mxu0 %v9419_v30  ;;  %7523 = vmatmul.mubr.bf16.gmra.mrb[40].mxu1 %v9423_v0  ;;  %v2883_v48 = vmul.f32 %v9354_v36, %v2861_v38 }
 0x2f0   : > { %v2881_v35 = vmul.f32 %v9354_v36, %v2859_v42  ;;  %v2860_v44 = vmax.f32 %v2844_v24, 0.0  ;;  %7380 = vmatprep.subr.bf16.mxu0 %v9426_v52  ;;  %7602 = vmatprep.subr.bf16.mxu1 %v9435_v60 }
 0x2f1   : > { %v2884_v55 = vmul.f32 %v9354_v36, %v2862_v16  ;;  %7603 = vmatpush3.bf16.msra.mxu1 %v9435_v60 }
 0x2f2   : > { %v9453_v63 = vpack.c.bf16 %v2881_v35, %v2880_v53  ;;  %v2882_v19 = vmul.f32 %v9354_v36, %v2860_v44  ;;  %7604 = vmatprep.subr.bf16.mxu1 %v9443_v20  ;;  %v9472_v36 = vld [vmem:[%s10002_s7 + $0xb0] sm:$0xff]  }
 0x2f3   : > { %v9457_v4 = vpack.c.bf16 %v2884_v55, %v2883_v48  ;;  %v9460_v17 = vpack.c.bf16 %v8382_v25, %v2884_v55  ;;  %7381 = vmatpush3.bf16.msra.mxu0 %v9426_v52  ;;  %v9480_v25 = vld [vmem:[%s10002_s7 + $0xb8] sm:$0xff]  }
 0x2f4   : > { %v9463_v8 = vpack.c.bf16 %v2883_v48, %v2882_v19  ;;  %v9465_v43 = vpack.c.bf16 %v2882_v19, %v2881_v35  ;;  %7366 = vmatprep.mubr.bf16.mxu0 %v9453_v63  ;;  %7382 = vmatprep.subr.bf16.mxu0 %v9453_v63 }
 0x2f5   : > { %7605 = vmatpush3.bf16.msra.mxu1 %v9443_v20 }
 0x2f6   : > { %7367 = vmatmul.mubr.bf16.gmra.mrb[92].mxu0 %v9463_v8  ;;  %7526 = vmatprep.mubr.bf16.mxu1 %v9465_v43 }
 0x2f7   : > { %7383 = vmatpush3.bf16.msra.mxu0 %v9453_v63  ;;  %7527 = vmatmul.mubr.bf16.gmra.mrb[44].mxu1 %v9457_v4 }
 0x2f8   : > { %7384 = vmatprep.subr.bf16.mxu0 %v9463_v8  ;;  %7606 = vmatprep.subr.bf16.mxu1 %v9472_v36 }
 0x2f9   : > { %7607 = vmatpush3.bf16.msra.mxu1 %v9472_v36  ;;  %7610 = vmatprep.mubr.bf16.mxu1 %v9367_v54 }
 0x2fa   : > { %7608 = vmatprep.subr.bf16.mxu1 %v9480_v25 }
 0x2fb   : > { %7385 = vmatpush3.bf16.msra.mxu0 %v9463_v8 }
 0x2fd   : > { %7609 = vmatpush3.bf16.msra.mxu1 %v9480_v25 }
 0x2fe   : > { %7658 = vmatprep.subr.bf16.mxu1 %v9149_v3 }
 0x300   : > { %7611 = vmatmul.mubr.bf16.vlgmr.msra.gmra.mrb[48].mxu1 %v9363_v46 }
 0x301   : > { %7614 = vmatprep.mubr.bf16.mxu1 %v9394_v12  ;;  %7659 = vmatpush3.bf16.msra.mxu1 %v9149_v3  ;;  %v8223_v3 = vld [vmem:[%s9998_s3 + $0x40] sm:$0xff]  }
 0x302   : > { %7660 = vmatprep.subr.bf16.mxu1 %v9164_v34  ;;  %7386 = vmatprep.mubr.bf16.mxu0 %v8223_v3 }
 0x305   : > { %7661 = vmatpush3.bf16.msra.mxu1 %v9164_v34  ;;  %v8224_v34 = vld [vmem:[%s9998_s3 + $0x48] sm:$0xff]  }
 0x306   : > { %7662 = vmatprep.subr.bf16.mxu1 %v9185_v41  ;;  %7387 = vmatmul.mubr.bf16.vlgmr.msra.gmra.mrb[96].mxu0 %v8224_v34 }
 0x308   : > { %7615 = vmatmul.mubr.bf16.gmra.mrb[52].mxu1 %v9389_v2 }
 0x309   : > { %7618 = vmatprep.mubr.bf16.mxu1 %v9428_v32  ;;  %7663 = vmatpush3.bf16.msra.mxu1 %v9185_v41  ;;  %v8225_v41 = vld [vmem:[%s9998_s3 + $0x50] sm:$0xff]  }
 0x30a   : > { %7664 = vmatprep.subr.bf16.mxu1 %v9200_v51  ;;  %7390 = vmatprep.mubr.bf16.mxu0 %v8225_v41 }
 0x30d   : > { %7665 = vmatpush3.bf16.msra.mxu1 %v9200_v51  ;;  %v8226_v51 = vld [vmem:[%s9998_s3 + $0x58] sm:$0xff]  }
 0x30e   : > { %7666 = vmatprep.subr.bf16.mxu1 %v9221_v56  ;;  %7391 = vmatmul.mubr.bf16.gmra.mrb[100].mxu0 %v8226_v51 }
 0x310   : > { %7619 = vmatmul.mubr.bf16.gmra.mrb[56].mxu1 %v9423_v0 }
 0x311   : > { %7622 = vmatprep.mubr.bf16.mxu1 %v9465_v43  ;;  %7667 = vmatpush3.bf16.msra.mxu1 %v9221_v56  ;;  %v8227_v56 = vld [vmem:[%s9998_s3 + $0x60] sm:$0xff]  }
 0x312   : > { %7668 = vmatprep.subr.bf16.mxu1 %v9236_v9  ;;  %7394 = vmatprep.mubr.bf16.mxu0 %v8227_v56 }
 0x315   : > { %7669 = vmatpush3.bf16.msra.mxu1 %v9236_v9  ;;  %v8228_v9 = vld [vmem:[%s9998_s3 + $0x68] sm:$0xff]  }
 0x316   : > { %7670 = vmatprep.subr.bf16.mxu1 %v9330_v5  ;;  %7395 = vmatmul.mubr.bf16.gmra.mrb[104].mxu0 %v8228_v9 }
 0x318   : > { %7623 = vmatmul.mubr.bf16.gmra.mrb[60].mxu1 %v9457_v4 }
 0x319   : > { %7671 = vmatpush3.bf16.msra.mxu1 %v9330_v5  ;;  %7674 = vmatprep.mubr.bf16.mxu1 %v9365_v11  ;;  %v8229_v5 = vld [vmem:[%s9998_s3 + $0x70] sm:$0xff]  }
 0x31a   : > { %7672 = vmatprep.subr.bf16.mxu1 %v9339_v50  ;;  %7398 = vmatprep.mubr.bf16.mxu0 %v8229_v5 }
 0x31d   : > { %7673 = vmatpush3.bf16.msra.mxu1 %v9339_v50  ;;  %v8230_v50 = vld [vmem:[%s9998_s3 + $0x78] sm:$0xff]  }
 0x31e   : > { %7754 = vmatprep.subr.bf16.mxu1 %v9348_v7  ;;  %7399 = vmatmul.mubr.bf16.gmra.mrb[108].mxu0 %v8230_v50 }
 0x31f   : > { %7418 = vmatprep.mubr.bf16.mxu0 %v8231_v13 }
 0x320   : > { %7675 = vmatmul.mubr.bf16.vlgmr.msra.gmra.mrb[64].mxu1 %v9386_v49 }
 0x321   : > { %7678 = vmatprep.mubr.bf16.mxu1 %v9392_v10  ;;  %7755 = vmatpush3.bf16.msra.mxu1 %v9348_v7 }
 0x322   : > { %7756 = vmatprep.subr.bf16.mxu1 %v9374_v62 }
 0x325   : > { %7757 = vmatpush3.bf16.msra.mxu1 %v9374_v62 }
 0x326   : > { %7758 = vmatprep.subr.bf16.mxu1 %v9401_v14 }
 0x328   : > { %7679 = vmatmul.mubr.bf16.gmra.mrb[68].mxu1 %v9419_v30 }
 0x329   : > { %7682 = vmatprep.mubr.bf16.mxu1 %v9426_v52  ;;  %7759 = vmatpush3.bf16.msra.mxu1 %v9401_v14 }
 0x32a   : > { %7760 = vmatprep.subr.bf16.mxu1 %v9409_v57 }
 0x32d   : > { %7761 = vmatpush3.bf16.msra.mxu1 %v9409_v57 }
 0x32e   : > { %7762 = vmatprep.subr.bf16.mxu1 %v9435_v60 }
 0x330   : > { %7683 = vmatmul.mubr.bf16.gmra.mrb[72].mxu1 %v9453_v63 }
 0x331   : > { %7686 = vmatprep.mubr.bf16.mxu1 %v9463_v8  ;;  %7763 = vmatpush3.bf16.msra.mxu1 %v9435_v60 }
 0x332   : > { %7764 = vmatprep.subr.bf16.mxu1 %v9443_v20 }
 0x335   : > { %7765 = vmatpush3.bf16.msra.mxu1 %v9443_v20 }
 0x336   : > { %7766 = vmatprep.subr.bf16.mxu1 %v9472_v36 }
 0x338   : > { %7687 = vmatmul.mubr.bf16.gmra.mrb[76].mxu1 %v9460_v17 }
 0x339   : > { %7767 = vmatpush3.bf16.msra.mxu1 %v9472_v36  ;;  %7770 = vmatprep.mubr.bf16.mxu1 %v9365_v11 }
 0x33a   : > { %7768 = vmatprep.subr.bf16.mxu1 %v9480_v25 }
 0x33d   : > { %7769 = vmatpush3.bf16.msra.mxu1 %v9480_v25 }
 0x340   : > { %7771 = vmatmul.mubr.bf16.vlgmr.msra.gmra.mrb[80].mxu1 %v9386_v49 }
 0x341   : > { %7774 = vmatprep.mubr.bf16.mxu1 %v9392_v10 }
 0x348   : > { %7775 = vmatmul.mubr.bf16.gmra.mrb[84].mxu1 %v9419_v30 }
 0x349   : > { %7778 = vmatprep.mubr.bf16.mxu1 %v9426_v52 }
 0x350   : > { %7779 = vmatmul.mubr.bf16.gmra.mrb[88].mxu1 %v9453_v63 }
 0x351   : > { %7782 = vmatprep.mubr.bf16.mxu1 %v9463_v8 }
 0x358   : > { %7783 = vmatmul.mubr.bf16.gmra.mrb[92].mxu1 %v9460_v17 }
 0x3b1   : > { %v7356_v28 = vpop.f32.mrb[80].mxu0 }
 0x3b2   : > { %v3041_v59 = vpop.f32.mrb[81].mxu0  ;;  %v7516_v15 = vpop.f32.mrb[32].mxu1 }
 0x3b3   : > { %v7357_v45 = vpop.f32.mrb[82].mxu0  ;;  %v3840_v18 = vpop.f32.mrb[33].mxu1 }
 0x3b4   : > { %v3105_v21 = vpack.c.bf16 %v7357_v45, %v7356_v28  ;;  %v3044_v22 = vpop.f32.mrb[83].mxu0  ;;  %v7517_v47 = vpop.f32.mrb[34].mxu1 }
 0x3b5   : > { %v3104_v23 = vpack.c.bf16 %v3044_v22, %v3041_v59  ;;  %v9573_v26 = vpack.c.bf16 %v7517_v47, %v7516_v15  ;;  %v3843_v53 = vpop.f32.mrb[35].mxu1 }
 0x3b6   : > { %v9575_v29 = vpack.c.bf16 %v3843_v53, %v3840_v18 }
 0x3b7   : > { %7402 = vmatprep.subr.bf16.mxu0 %v3104_v23 }
 0x3b8   : > { %7403 = vmatpush3.bf16.msra.mxu0 %v3104_v23 }
 0x3b9   : > { %v7360_v6 = vpop.f32.mrb[84].mxu0  ;;  %7404 = vmatprep.subr.bf16.mxu0 %v3105_v21 }
 0x3ba   : > { %v3057_v31 = vpop.f32.mrb[85].mxu0  ;;  %v7520_v37 = vpop.f32.mrb[36].mxu1 }
 0x3bb   : > { %v7361_v40 = vpop.f32.mrb[86].mxu0  ;;  %v3856_v27 = vpop.f32.mrb[37].mxu1 }
 0x3bc   : > { %v3107_v33 = vpack.c.bf16 %v7361_v40, %v7360_v6  ;;  %v3060_v58 = vpop.f32.mrb[87].mxu0  ;;  %7405 = vmatpush3.bf16.msra.mxu0 %v3105_v21  ;;  %v7521_v38 = vpop.f32.mrb[38].mxu1  ;;  %v8232_v6 = vld [vmem:[%s9998_s3 + $0x8] sm:$0xff]  }
 0x3bd   : > { %v3106_v61 = vpack.c.bf16 %v3060_v58, %v3057_v31  ;;  %v9577_v39 = vpack.c.bf16 %v7521_v38, %v7520_v37  ;;  %v3859_v42 = vpop.f32.mrb[39].mxu1  ;;  %v8233_v37 = vld [vmem:[%s9998_s3 + $0x10] sm:$0xff]  }
 0x3be   : > { %v9579_v24 = vpack.c.bf16 %v3859_v42, %v3856_v27 }
 0x3bf   : > { %7406 = vmatprep.subr.bf16.mxu0 %v3106_v61 }
 0x3c0   : > { %7407 = vmatpush3.bf16.msra.mxu0 %v3106_v61  ;;  %v8234_v61 = vld [vmem:[%s9998_s3 + $0x18] sm:$0xff]  }
 0x3c1   : > { %v7364_v16 = vpop.f32.mrb[88].mxu0  ;;  %7408 = vmatprep.subr.bf16.mxu0 %v3107_v33 }
 0x3c2   : > { %v3073_v35 = vpop.f32.mrb[89].mxu0  ;;  %v7524_v44 = vpop.f32.mrb[40].mxu1 }
 0x3c3   : > { %v7365_v48 = vpop.f32.mrb[90].mxu0  ;;  %v3872_v55 = vpop.f32.mrb[41].mxu1 }
 0x3c4   : > { %v3109_v19 = vpack.c.bf16 %v7365_v48, %v7364_v16  ;;  %v3076_v3 = vpop.f32.mrb[91].mxu0  ;;  %7409 = vmatpush3.bf16.msra.mxu0 %v3107_v33  ;;  %v7525_v34 = vpop.f32.mrb[42].mxu1  ;;  %v8235_v16 = vld [vmem:[%s9998_s3 + $0x20] sm:$0xff]  }
 0x3c5   : > { %v3108_v41 = vpack.c.bf16 %v3076_v3, %v3073_v35  ;;  %v9581_v51 = vpack.c.bf16 %v7525_v34, %v7524_v44  ;;  %v3875_v56 = vpop.f32.mrb[43].mxu1  ;;  %v8237_v3 = vld [vmem:[%s9998_s3 + $0x30] sm:$0xff]  }
 0x3c6   : > { %v9583_v9 = vpack.c.bf16 %v3875_v56, %v3872_v55 }
 0x3c7   : > { %7410 = vmatprep.subr.bf16.mxu0 %v3108_v41 }
 0x3c8   : > { %7411 = vmatpush3.bf16.msra.mxu0 %v3108_v41 }
 0x3c9   : > { %v7368_v5 = vpop.f32.mrb[92].mxu0  ;;  %7412 = vmatprep.subr.bf16.mxu0 %v3109_v19 }
 0x3ca   : > { %v3089_v50 = vpop.f32.mrb[93].mxu0  ;;  %v7528_v13 = vpop.f32.mrb[44].mxu1 }
 0x3cb   : > { %v7369_v28 = vpop.f32.mrb[94].mxu0  ;;  %v3888_v59 = vpop.f32.mrb[45].mxu1 }
 0x3cc   : > { %v3111_v15 = vpack.c.bf16 %v7369_v28, %v7368_v5  ;;  %v3092_v45 = vpop.f32.mrb[95].mxu0  ;;  %7413 = vmatpush3.bf16.msra.mxu0 %v3109_v19  ;;  %v7529_v18 = vpop.f32.mrb[46].mxu1 }
 0x3cd   : > { %v3110_v21 = vpack.c.bf16 %v3092_v45, %v3089_v50  ;;  %v9585_v22 = vpack.c.bf16 %v7529_v18, %v7528_v13  ;;  %v3891_v47 = vpop.f32.mrb[47].mxu1 }
 0x3ce   : > { %v9587_v23 = vpack.c.bf16 %v3891_v47, %v3888_v59 }
 0x3cf   : > { %7414 = vmatprep.subr.bf16.mxu0 %v3110_v21 }
 0x3d0   : > { %7415 = vmatpush3.bf16.msra.mxu0 %v3110_v21 }
 0x3d1   : > { %7416 = vmatprep.subr.bf16.mxu0 %v3111_v15 }
 0x3d3   : > { %v7612_v53 = vpop.f32.mrb[48].mxu1 }
 0x3d4   : > { %v4301_v31 = vpop.f32.mrb[49].mxu1  ;;  %7417 = vmatpush3.bf16.msra.mxu0 %v3111_v15 }
 0x3d5   : > { %v7613_v40 = vpop.f32.mrb[50].mxu1  ;;  %7434 = vmatprep.subr.bf16.mxu0 %v9348_v7 }
 0x3d6   : > { %v9596_v27 = vpack.c.bf16 %v7613_v40, %v7612_v53  ;;  %v4304_v33 = vpop.f32.mrb[51].mxu1 }
 0x3d7   : > { %v9598_v58 = vpack.c.bf16 %v4304_v33, %v4301_v31  ;;  %7419 = vmatmul.mubr.bf16.vlgmr.msra.gmra.mrb[96].mxu0 %v8232_v6 }
 0x3d8   : > { %7435 = vmatpush3.bf16.msra.mxu0 %v9348_v7  ;;  %7422 = vmatprep.mubr.bf16.mxu0 %v8233_v37 }
 0x3d9   : > { %7436 = vmatprep.subr.bf16.mxu0 %v9374_v62 }
 0x3db   : > { %v7616_v38 = vpop.f32.mrb[52].mxu1 }
 0x3dc   : > { %v4317_v42 = vpop.f32.mrb[53].mxu1  ;;  %7437 = vmatpush3.bf16.msra.mxu0 %v9374_v62  ;;  %v8236_v62 = vld [vmem:[%s9998_s3 + $0x28] sm:$0xff]  }
 0x3dd   : > { %v7617_v35 = vpop.f32.mrb[54].mxu1  ;;  %7438 = vmatprep.subr.bf16.mxu0 %v9401_v14 }
 0x3de   : > { %v9610_v44 = vpack.c.bf16 %v7617_v35, %v7616_v38  ;;  %v4320_v7 = vpop.f32.mrb[55].mxu1 }
 0x3df   : > { %v9612_v48 = vpack.c.bf16 %v4320_v7, %v4317_v42  ;;  %7423 = vmatmul.mubr.bf16.gmra.mrb[100].mxu0 %v8234_v61 }
 0x3e0   : > { %7439 = vmatpush3.bf16.msra.mxu0 %v9401_v14  ;;  %7426 = vmatprep.mubr.bf16.mxu0 %v8235_v16 }
 0x3e1   : > { %7440 = vmatprep.subr.bf16.mxu0 %v9409_v57 }
 0x3e3   : > { %v7620_v55 = vpop.f32.mrb[56].mxu1 }
 0x3e4   : > { %v4333_v19 = vpop.f32.mrb[57].mxu1  ;;  %7441 = vmatpush3.bf16.msra.mxu0 %v9409_v57  ;;  %v8238_v57 = vld [vmem:[%s9998_s3 + $0x38] sm:$0xff]  }
 0x3e5   : > { %v7621_v34 = vpop.f32.mrb[58].mxu1  ;;  %7442 = vmatprep.subr.bf16.mxu0 %v9435_v60 }
 0x3e6   : > { %v9624_v41 = vpack.c.bf16 %v7621_v34, %v7620_v55  ;;  %v4336_v14 = vpop.f32.mrb[59].mxu1 }
 0x3e7   : > { %v9626_v56 = vpack.c.bf16 %v4336_v14, %v4333_v19  ;;  %7427 = vmatmul.mubr.bf16.gmra.mrb[104].mxu0 %v8236_v62 }
 0x3e8   : > { %7443 = vmatpush3.bf16.msra.mxu0 %v9435_v60  ;;  %7430 = vmatprep.mubr.bf16.mxu0 %v8237_v3 }
 0x3e9   : > { %7444 = vmatprep.subr.bf16.mxu0 %v9443_v20 }
 0x3eb   : > { %v7624_v5 = vpop.f32.mrb[60].mxu1 }
 0x3ec   : > { %v4349_v50 = vpop.f32.mrb[61].mxu1  ;;  %7445 = vmatpush3.bf16.msra.mxu0 %v9443_v20 }
 0x3ed   : > { %v7625_v13 = vpop.f32.mrb[62].mxu1  ;;  %7446 = vmatprep.subr.bf16.mxu0 %v9472_v36 }
 0x3ee   : > { %v9635_v28 = vpack.c.bf16 %v7625_v13, %v7624_v5  ;;  %v4352_v59 = vpop.f32.mrb[63].mxu1 }
 0x3ef   : > { %v9637_v15 = vpack.c.bf16 %v4352_v59, %v4349_v50  ;;  %7431 = vmatmul.mubr.bf16.gmra.mrb[108].mxu0 %v8238_v57 }
 0x3f0   : > { %7447 = vmatpush3.bf16.msra.mxu0 %v9472_v36  ;;  %7450 = vmatprep.mubr.bf16.mxu0 %v9360_v1 }
 0x3f1   : > { %7448 = vmatprep.subr.bf16.mxu0 %v9480_v25 }
 0x3f3   : > { %v7676_v60 = vpop.f32.mrb[64].mxu1 }
 0x3f4   : > { %v4608_v45 = vpop.f32.mrb[65].mxu1  ;;  %7449 = vmatpush3.bf16.msra.mxu0 %v9480_v25 }
 0x3f5   : > { %v7677_v20 = vpop.f32.mrb[66].mxu1 }
 0x3f6   : > { %v9643_v18 = vpack.c.bf16 %v7677_v20, %v7676_v60  ;;  %v4611_v21 = vpop.f32.mrb[67].mxu1 }
 0x3f7   : > { %v9645_v47 = vpack.c.bf16 %v4611_v21, %v4608_v45  ;;  %7451 = vmatmul.mubr.bf16.vlgmr.msra.gmra.mrb[112].mxu0 %v9365_v11 }
 0x3f8   : > { %7454 = vmatprep.mubr.bf16.mxu0 %v9386_v49 }
 0x3fb   : > { %v7680_v53 = vpop.f32.mrb[68].mxu1 }
 0x3fc   : > { %v4624_v36 = vpop.f32.mrb[69].mxu1 }
 0x3fd   : > { %v7681_v6 = vpop.f32.mrb[70].mxu1 }
 0x3fe   : > { %v9649_v1 = vpack.c.bf16 %v7681_v6, %v7680_v53  ;;  %v4627_v31 = vpop.f32.mrb[71].mxu1 }
 0x3ff   : > { %v9651_v37 = vpack.c.bf16 %v4627_v31, %v4624_v36  ;;  %7455 = vmatmul.mubr.bf16.gmra.mrb[116].mxu0 %v9392_v10 }
 0x400   : > { %7458 = vmatprep.mubr.bf16.mxu0 %v9419_v30 }
 0x403   : > { %v7684_v25 = vpop.f32.mrb[72].mxu1 }
 0x404   : > { %v4640_v40 = vpop.f32.mrb[73].mxu1 }
 0x405   : > { %v7685_v33 = vpop.f32.mrb[74].mxu1 }
 0x406   : > { %v9655_v38 = vpack.c.bf16 %v7685_v33, %v7684_v25  ;;  %v4643_v61 = vpop.f32.mrb[75].mxu1 }
 0x407   : > { %v9657_v42 = vpack.c.bf16 %v4643_v61, %v4640_v40  ;;  %7459 = vmatmul.mubr.bf16.gmra.mrb[120].mxu0 %v9426_v52 }
 0x408   : > { %7462 = vmatprep.mubr.bf16.mxu0 %v9453_v63 }
 0x40b   : > { %v7688_v16 = vpop.f32.mrb[76].mxu1 }
 0x40c   : > { %v4656_v35 = vpop.f32.mrb[77].mxu1 }
 0x40d   : > { %v7689_v7 = vpop.f32.mrb[78].mxu1 }
 0x40e   : > { %v9661_v55 = vpack.c.bf16 %v7689_v7, %v7688_v16  ;;  %v4659_v62 = vpop.f32.mrb[79].mxu1 }
 0x40f   : > { %v9663_v19 = vpack.c.bf16 %v4659_v62, %v4656_v35  ;;  %7463 = vmatmul.mubr.bf16.gmra.mrb[124].mxu0 %v9463_v8 }
 0x413   : > { %v7772_v3 = vpop.f32.mrb[80].mxu1 }
 0x414   : > { %v5069_v34 = vpop.f32.mrb[81].mxu1 }
 0x415   : > { %v7773_v14 = vpop.f32.mrb[82].mxu1 }
 0x416   : > { %v9666_v5 = vpack.c.bf16 %v7773_v14, %v7772_v3  ;;  %v5072_v57 = vpop.f32.mrb[83].mxu1  ;;  %v8239_v3 = vld [vmem:[%s9998_s3 + $0x80] sm:$0xff]  }
 0x417   : > { %v9668_v50 = vpack.c.bf16 %v5072_v57, %v5069_v34  ;;  %7482 = vmatprep.mubr.bf16.mxu0 %v8239_v3 }
 0x41b   : > { %v7776_v13 = vpop.f32.mrb[84].mxu1 }
 0x41c   : > { %v5085_v59 = vpop.f32.mrb[85].mxu1 }
 0x41d   : > { %v7777_v60 = vpop.f32.mrb[86].mxu1 }
 0x41e   : > { %v9670_v45 = vpack.c.bf16 %v7777_v60, %v7776_v13  ;;  %v5088_v20 = vpop.f32.mrb[87].mxu1 }
 0x41f   : > { %v9672_v21 = vpack.c.bf16 %v5088_v20, %v5085_v59 }
 0x423   : > { %v7780_v53 = vpop.f32.mrb[88].mxu1 }
 0x424   : > { %v5101_v36 = vpop.f32.mrb[89].mxu1 }
 0x425   : > { %v7781_v6 = vpop.f32.mrb[90].mxu1 }
 0x426   : > { %v9674_v31 = vpack.c.bf16 %v7781_v6, %v7780_v53  ;;  %v5104_v25 = vpop.f32.mrb[91].mxu1 }
 0x427   : > { %v9676_v40 = vpack.c.bf16 %v5104_v25, %v5101_v36 }
 0x42b   : > { %v7784_v33 = vpop.f32.mrb[92].mxu1 }
 0x42c   : > { %v5117_v61 = vpop.f32.mrb[93].mxu1 }
 0x42d   : > { %v7785_v16 = vpop.f32.mrb[94].mxu1 }
 0x42e   : > { %v9678_v35 = vpack.c.bf16 %v7785_v16, %v7784_v33  ;;  %v5120_v7 = vpop.f32.mrb[95].mxu1 }
 0x42f   : > { %v9680_v62 = vpack.c.bf16 %v5120_v7, %v5117_v61 }
 0x4ca   : > { %v7452_v34 = vpop.f32.mrb[112].mxu0 }
 0x4cb   : > { %v3533_v14 = vpop.f32.mrb[113].mxu0 }
 0x4cc   : > { %v7453_v57 = vpop.f32.mrb[114].mxu0 }
 0x4cd   : > { %v3597_v13 = vpack.c.bf16 %v7453_v57, %v7452_v34  ;;  %v3536_v59 = vpop.f32.mrb[115].mxu0 }
 0x4ce   : > { %v3596_v60 = vpack.c.bf16 %v3536_v59, %v3533_v14 }
 0x4d0   : > { %7466 = vmatprep.subr.bf16.mxu0 %v3596_v60 }
 0x4d1   : > { %7467 = vmatpush3.bf16.msra.mxu0 %v3596_v60 }
 0x4d2   : > { %v7456_v20 = vpop.f32.mrb[116].mxu0  ;;  %7468 = vmatprep.subr.bf16.mxu0 %v3597_v13 }
 0x4d3   : > { %v3549_v53 = vpop.f32.mrb[117].mxu0 }
 0x4d4   : > { %v7457_v36 = vpop.f32.mrb[118].mxu0 }
 0x4d5   : > { %v3599_v6 = vpack.c.bf16 %v7457_v36, %v7456_v20  ;;  %v3552_v25 = vpop.f32.mrb[119].mxu0  ;;  %7469 = vmatpush3.bf16.msra.mxu0 %v3597_v13 }
 0x4d6   : > { %v3598_v33 = vpack.c.bf16 %v3552_v25, %v3549_v53  ;;  %v8240_v53 = vld [vmem:[%s9998_s3 + $0x88] sm:$0xff]   ;;  %v8242_v25 = vld [vmem:[%s9998_s3 + $0x98] sm:$0xff]  }
 0x4d8   : > { %7470 = vmatprep.subr.bf16.mxu0 %v3598_v33 }
 0x4d9   : > { %7471 = vmatpush3.bf16.msra.mxu0 %v3598_v33  ;;  %v8243_v33 = vld [vmem:[%s9998_s3 + $0xa0] sm:$0xff]  }
 0x4da   : > { %v7460_v61 = vpop.f32.mrb[120].mxu0  ;;  %7472 = vmatprep.subr.bf16.mxu0 %v3599_v6 }
 0x4db   : > { %v3565_v16 = vpop.f32.mrb[121].mxu0 }
 0x4dc   : > { %v7461_v7 = vpop.f32.mrb[122].mxu0 }
 0x4dd   : > { %v3601_v3 = vpack.c.bf16 %v7461_v7, %v7460_v61  ;;  %v3568_v34 = vpop.f32.mrb[123].mxu0  ;;  %7473 = vmatpush3.bf16.msra.mxu0 %v3599_v6  ;;  %v8241_v6 = vld [vmem:[%s9998_s3 + $0x90] sm:$0xff]   ;;  %v8290_v61 = vld [vmem:[%s9998_s3 + $0x218] sm:$0xff]  }
 0x4de   : > { %v3600_v14 = vpack.c.bf16 %v3568_v34, %v3565_v16  ;;  %v8293_v16 = vld [vmem:[%s9998_s3 + $0x230] sm:$0xff]   ;;  %v8294_v7 = vld [vmem:[%s9998_s3 + $0x238] sm:$0xff]   ;;  %v5337_v34 = vpop.permute.xlu0 %5336 }
 0x4e0   : > { %7474 = vmatprep.subr.bf16.mxu0 %v3600_v14 }
 0x4e1   : > { %7475 = vmatpush3.bf16.msra.mxu0 %v3600_v14  ;;  %v5342_v14 = vpop.permute.xlu1 %5341 }
 0x4e2   : > { %v7464_v57 = vpop.f32.mrb[124].mxu0  ;;  %7476 = vmatprep.subr.bf16.mxu0 %v3601_v3 }
 0x4e3   : > { %v3581_v59 = vpop.f32.mrb[125].mxu0 }
 0x4e4   : > { %v7465_v60 = vpop.f32.mrb[126].mxu0 }
 0x4e5   : > { %v3603_v20 = vpack.c.bf16 %v7465_v60, %v7464_v57  ;;  %v3584_v36 = vpop.f32.mrb[127].mxu0  ;;  %7477 = vmatpush3.bf16.msra.mxu0 %v3601_v3  ;;  %v8295_v3 = vld [vmem:[%s10000_s5] sm:$0xff]   ;;  %v5347_v57 = vpop.permute.xlu0 %5346 }
 0x4e6   : > { %v3602_v13 = vpack.c.bf16 %v3584_v36, %v3581_v59  ;;  %7834 = vmatprep.mubr.bf16.mxu1 %v8295_v3  ;;  %v5352_v59 = vpop.permute.xlu1 %5351 }
 0x4e8   : > { %7478 = vmatprep.subr.bf16.mxu0 %v3602_v13 }
 0x4e9   : > { %7479 = vmatpush3.bf16.msra.mxu0 %v3602_v13  ;;  %v5357_v60 = vpop.permute.xlu0 %5356 }
 0x4ea   : > { %7480 = vmatprep.subr.bf16.mxu0 %v3603_v20 }
 0x4ed   : > { %7481 = vmatpush3.bf16.msra.mxu0 %v3603_v20  ;;  %v5362_v20 = vpop.permute.xlu1 %5361  ;;  %v5367_v36 = vpop.permute.xlu0 %5366 }
 0x4ee   : > { %7530 = vmatprep.subr.bf16.mxu0 %v9575_v29 }
 0x4f0   : > { %7483 = vmatmul.mubr.bf16.vlgmr.msra.gmra.mrb[96].mxu0 %v8240_v53 }
 0x4f1   : > { %7531 = vmatpush3.bf16.msra.mxu0 %v9575_v29  ;;  %7486 = vmatprep.mubr.bf16.mxu0 %v8241_v6  ;;  %v8244_v29 = vld [vmem:[%s9998_s3 + $0xa8] sm:$0xff]  }
 0x4f2   : > { %7532 = vmatprep.subr.bf16.mxu0 %v9573_v26 }
 0x4f5   : > { %7533 = vmatpush3.bf16.msra.mxu0 %v9573_v26  ;;  %v8245_v26 = vld [vmem:[%s9998_s3 + $0xb0] sm:$0xff]  }
 0x4f6   : > { %7534 = vmatprep.subr.bf16.mxu0 %v9579_v24 }
 0x4f8   : > { %7487 = vmatmul.mubr.bf16.gmra.mrb[100].mxu0 %v8242_v25  ;;  %v5372_v25 = vpop.permute.xlu1 %5371 }
 0x4f9   : > { %7535 = vmatpush3.bf16.msra.mxu0 %v9579_v24  ;;  %7490 = vmatprep.mubr.bf16.mxu0 %v8243_v33  ;;  %v8246_v24 = vld [vmem:[%s9998_s3 + $0xb8] sm:$0xff]  }
 0x4fa   : > { %7536 = vmatprep.subr.bf16.mxu0 %v9577_v39 }
 0x4fd   : > { %7537 = vmatpush3.bf16.msra.mxu0 %v9577_v39  ;;  %v8247_v39 = vld [vmem:[%s9998_s3 + $0xc0] sm:$0xff]  }
 0x4fe   : > { %7538 = vmatprep.subr.bf16.mxu0 %v9583_v9 }
 0x500   : > { %7491 = vmatmul.mubr.bf16.gmra.mrb[104].mxu0 %v8244_v29 }
 0x501   : > { %7539 = vmatpush3.bf16.msra.mxu0 %v9583_v9  ;;  %7494 = vmatprep.mubr.bf16.mxu0 %v8245_v26  ;;  %v8248_v9 = vld [vmem:[%s9998_s3 + $0xc8] sm:$0xff]  }
 0x502   : > { %7540 = vmatprep.subr.bf16.mxu0 %v9581_v51 }
 0x505   : > { %7541 = vmatpush3.bf16.msra.mxu0 %v9581_v51  ;;  %v8249_v51 = vld [vmem:[%s9998_s3 + $0xd0] sm:$0xff]  }
 0x506   : > { %7542 = vmatprep.subr.bf16.mxu0 %v9587_v23 }
 0x508   : > { %7495 = vmatmul.mubr.bf16.gmra.mrb[108].mxu0 %v8246_v24 }
 0x509   : > { %7543 = vmatpush3.bf16.msra.mxu0 %v9587_v23  ;;  %7546 = vmatprep.mubr.bf16.mxu0 %v8247_v39  ;;  %v8250_v23 = vld [vmem:[%s9998_s3 + $0xd8] sm:$0xff]  }
 0x50a   : > { %7544 = vmatprep.subr.bf16.mxu0 %v9585_v22 }
 0x50d   : > { %7545 = vmatpush3.bf16.msra.mxu0 %v9585_v22  ;;  %v8251_v22 = vld [vmem:[%s9998_s3 + $0xe0] sm:$0xff]  }
 0x50e   : > { %7562 = vmatprep.subr.bf16.mxu0 %v9367_v54 }
 0x510   : > { %7547 = vmatmul.mubr.bf16.vlgmr.msra.gmra.mrb[96].mxu0 %v8248_v9 }
 0x511   : > { %7563 = vmatpush3.bf16.msra.mxu0 %v9367_v54  ;;  %7550 = vmatprep.mubr.bf16.mxu0 %v8249_v51  ;;  %v8252_v54 = vld [vmem:[%s9998_s3 + $0xe8] sm:$0xff]  }
 0x512   : > { %7564 = vmatprep.subr.bf16.mxu0 %v9363_v46 }
 0x515   : > { %7565 = vmatpush3.bf16.msra.mxu0 %v9363_v46  ;;  %v8253_v46 = vld [vmem:[%s9998_s3 + $0xf0] sm:$0xff]  }
 0x516   : > { %7566 = vmatprep.subr.bf16.mxu0 %v9394_v12 }
 0x518   : > { %7551 = vmatmul.mubr.bf16.gmra.mrb[100].mxu0 %v8250_v23  ;;  %v5377_v23 = vpop.permute.xlu0 %5376 }
 0x519   : > { %7567 = vmatpush3.bf16.msra.mxu0 %v9394_v12  ;;  %7554 = vmatprep.mubr.bf16.mxu0 %v8251_v22  ;;  %v8254_v12 = vld [vmem:[%s9998_s3 + $0xf8] sm:$0xff]  }
 0x51a   : > { %7568 = vmatprep.subr.bf16.mxu0 %v9389_v2 }
 0x51d   : > { %7569 = vmatpush3.bf16.msra.mxu0 %v9389_v2  ;;  %v8255_v2 = vld [vmem:[%s9998_s3 + $0x100] sm:$0xff]  }
 0x51e   : > { %7570 = vmatprep.subr.bf16.mxu0 %v9428_v32 }
 0x520   : > { %7555 = vmatmul.mubr.bf16.gmra.mrb[104].mxu0 %v8252_v54 }
 0x521   : > { %7571 = vmatpush3.bf16.msra.mxu0 %v9428_v32  ;;  %7558 = vmatprep.mubr.bf16.mxu0 %v8253_v46  ;;  %v8256_v32 = vld [vmem:[%s9998_s3 + $0x108] sm:$0xff]  }
 0x522   : > { %7572 = vmatprep.subr.bf16.mxu0 %v9423_v0 }
 0x525   : > { %7573 = vmatpush3.bf16.msra.mxu0 %v9423_v0  ;;  %v8257_v0 = vld [vmem:[%s9998_s3 + $0x110] sm:$0xff]  }
 0x526   : > { %7574 = vmatprep.subr.bf16.mxu0 %v9465_v43 }
 0x528   : > { %7559 = vmatmul.mubr.bf16.gmra.mrb[108].mxu0 %v8254_v12  ;;  %v5382_v12 = vpop.permute.xlu1 %5381 }
 0x529   : > { %7575 = vmatpush3.bf16.msra.mxu0 %v9465_v43  ;;  %7578 = vmatprep.mubr.bf16.mxu0 %v8255_v2  ;;  %v8258_v43 = vld [vmem:[%s9998_s3 + $0x118] sm:$0xff]  }
 0x52a   : > { %7576 = vmatprep.subr.bf16.mxu0 %v9457_v4 }
 0x52d   : > { %7577 = vmatpush3.bf16.msra.mxu0 %v9457_v4  ;;  %v8259_v4 = vld [vmem:[%s9998_s3 + $0x120] sm:$0xff]  }
 0x52e   : > { %7626 = vmatprep.subr.bf16.mxu0 %v9598_v58 }
 0x530   : > { %7579 = vmatmul.mubr.bf16.vlgmr.msra.gmra.mrb[96].mxu0 %v8256_v32 }
 0x531   : > { %7627 = vmatpush3.bf16.msra.mxu0 %v9598_v58  ;;  %7582 = vmatprep.mubr.bf16.mxu0 %v8257_v0  ;;  %v8260_v58 = vld [vmem:[%s9998_s3 + $0x128] sm:$0xff]  }
 0x532   : > { %7628 = vmatprep.subr.bf16.mxu0 %v9596_v27 }
 0x535   : > { %7629 = vmatpush3.bf16.msra.mxu0 %v9596_v27  ;;  %v8261_v27 = vld [vmem:[%s9998_s3 + $0x130] sm:$0xff]  }
 0x536   : > { %7630 = vmatprep.subr.bf16.mxu0 %v9612_v48 }
 0x538   : > { %7583 = vmatmul.mubr.bf16.gmra.mrb[100].mxu0 %v8258_v43 }
 0x539   : > { %7631 = vmatpush3.bf16.msra.mxu0 %v9612_v48  ;;  %7586 = vmatprep.mubr.bf16.mxu0 %v8259_v4  ;;  %v8262_v48 = vld [vmem:[%s9998_s3 + $0x138] sm:$0xff]  }
 0x53a   : > { %7632 = vmatprep.subr.bf16.mxu0 %v9610_v44 }
 0x53d   : > { %7633 = vmatpush3.bf16.msra.mxu0 %v9610_v44  ;;  %v8263_v44 = vld [vmem:[%s9998_s3 + $0x140] sm:$0xff]  }
 0x53e   : > { %7634 = vmatprep.subr.bf16.mxu0 %v9626_v56 }
 0x540   : > { %7587 = vmatmul.mubr.bf16.gmra.mrb[104].mxu0 %v8260_v58 }
 0x541   : > { %7635 = vmatpush3.bf16.msra.mxu0 %v9626_v56  ;;  %7590 = vmatprep.mubr.bf16.mxu0 %v8261_v27  ;;  %v8264_v56 = vld [vmem:[%s9998_s3 + $0x148] sm:$0xff]  }
 0x542   : > { %7636 = vmatprep.subr.bf16.mxu0 %v9624_v41 }
 0x545   : > { %7637 = vmatpush3.bf16.msra.mxu0 %v9624_v41  ;;  %v8265_v41 = vld [vmem:[%s9998_s3 + $0x150] sm:$0xff]  }
 0x546   : > { %7638 = vmatprep.subr.bf16.mxu0 %v9637_v15 }
 0x548   : > { %7591 = vmatmul.mubr.bf16.gmra.mrb[108].mxu0 %v8262_v48 }
 0x549   : > { %7639 = vmatpush3.bf16.msra.mxu0 %v9637_v15  ;;  %7642 = vmatprep.mubr.bf16.mxu0 %v8263_v44  ;;  %v8266_v15 = vld [vmem:[%s9998_s3 + $0x158] sm:$0xff]   ;;  %v5387_v44 = vpop.permute.xlu0 %5386 }
 0x54a   : > { %7640 = vmatprep.subr.bf16.mxu0 %v9635_v28 }
 0x54d   : > { %7641 = vmatpush3.bf16.msra.mxu0 %v9635_v28  ;;  %v8267_v28 = vld [vmem:[%s9998_s3 + $0x160] sm:$0xff]  }
 0x54e   : > { %7690 = vmatprep.subr.bf16.mxu0 %v9645_v47 }
 0x550   : > { %7643 = vmatmul.mubr.bf16.vlgmr.msra.gmra.mrb[96].mxu0 %v8264_v56 }
 0x551   : > { %7691 = vmatpush3.bf16.msra.mxu0 %v9645_v47  ;;  %7646 = vmatprep.mubr.bf16.mxu0 %v8265_v41  ;;  %v8268_v47 = vld [vmem:[%s9998_s3 + $0x168] sm:$0xff]  }
 0x552   : > { %7692 = vmatprep.subr.bf16.mxu0 %v9643_v18 }
 0x555   : > { %7693 = vmatpush3.bf16.msra.mxu0 %v9643_v18  ;;  %v8269_v18 = vld [vmem:[%s9998_s3 + $0x170] sm:$0xff]  }
 0x556   : > { %7694 = vmatprep.subr.bf16.mxu0 %v9651_v37 }
 0x558   : > { %7647 = vmatmul.mubr.bf16.gmra.mrb[100].mxu0 %v8266_v15 }
 0x559   : > { %7695 = vmatpush3.bf16.msra.mxu0 %v9651_v37  ;;  %7650 = vmatprep.mubr.bf16.mxu0 %v8267_v28  ;;  %v8270_v37 = vld [vmem:[%s9998_s3 + $0x178] sm:$0xff]   ;;  %v5392_v28 = vpop.permute.xlu1 %5391 }
 0x55a   : > { %7696 = vmatprep.subr.bf16.mxu0 %v9649_v1 }
 0x55d   : > { %7697 = vmatpush3.bf16.msra.mxu0 %v9649_v1  ;;  %v8271_v1 = vld [vmem:[%s9998_s3 + $0x180] sm:$0xff]  }
 0x55e   : > { %7698 = vmatprep.subr.bf16.mxu0 %v9657_v42 }
 0x560   : > { %7651 = vmatmul.mubr.bf16.gmra.mrb[104].mxu0 %v8268_v47 }
 0x561   : > { %7699 = vmatpush3.bf16.msra.mxu0 %v9657_v42  ;;  %7654 = vmatprep.mubr.bf16.mxu0 %v8269_v18  ;;  %v8272_v42 = vld [vmem:[%s9998_s3 + $0x188] sm:$0xff]  }
 0x562   : > { %7700 = vmatprep.subr.bf16.mxu0 %v9655_v38 }
 0x565   : > { %7701 = vmatpush3.bf16.msra.mxu0 %v9655_v38  ;;  %v8273_v38 = vld [vmem:[%s9998_s3 + $0x190] sm:$0xff]  }
 0x566   : > { %7702 = vmatprep.subr.bf16.mxu0 %v9663_v19 }
 0x568   : > { %7655 = vmatmul.mubr.bf16.gmra.mrb[108].mxu0 %v8270_v37 }
 0x569   : > { %7703 = vmatpush3.bf16.msra.mxu0 %v9663_v19  ;;  %7706 = vmatprep.mubr.bf16.mxu0 %v8271_v1  ;;  %v8274_v19 = vld [vmem:[%s9998_s3 + $0x198] sm:$0xff]  }
 0x56a   : > { %7704 = vmatprep.subr.bf16.mxu0 %v9661_v55 }
 0x56d   : > { %7705 = vmatpush3.bf16.msra.mxu0 %v9661_v55  ;;  %v8275_v55 = vld [vmem:[%s9998_s3 + $0x1a0] sm:$0xff]  }
 0x56e   : > { %7722 = vmatprep.subr.bf16.mxu0 %v9365_v11 }
 0x570   : > { %7707 = vmatmul.mubr.bf16.vlgmr.msra.gmra.mrb[96].mxu0 %v8272_v42 }
 0x571   : > { %7723 = vmatpush3.bf16.msra.mxu0 %v9365_v11  ;;  %7710 = vmatprep.mubr.bf16.mxu0 %v8273_v38  ;;  %v8276_v11 = vld [vmem:[%s9998_s3 + $0x1a8] sm:$0xff]  }
 0x572   : > { %7724 = vmatprep.subr.bf16.mxu0 %v9386_v49 }
 0x575   : > { %7725 = vmatpush3.bf16.msra.mxu0 %v9386_v49  ;;  %v8277_v49 = vld [vmem:[%s9998_s3 + $0x1b0] sm:$0xff]  }
 0x576   : > { %7726 = vmatprep.subr.bf16.mxu0 %v9392_v10 }
 0x578   : > { %7711 = vmatmul.mubr.bf16.gmra.mrb[100].mxu0 %v8274_v19 }
 0x579   : > { %7727 = vmatpush3.bf16.msra.mxu0 %v9392_v10  ;;  %7714 = vmatprep.mubr.bf16.mxu0 %v8275_v55  ;;  %v8278_v10 = vld [vmem:[%s9998_s3 + $0x1b8] sm:$0xff]   ;;  %v5397_v55 = vpop.permute.xlu0 %5396 }
 0x57a   : > { %7728 = vmatprep.subr.bf16.mxu0 %v9419_v30 }
 0x57d   : > { %7729 = vmatpush3.bf16.msra.mxu0 %v9419_v30  ;;  %v8279_v30 = vld [vmem:[%s9998_s3 + $0x1c0] sm:$0xff]  }
 0x57e   : > { %7730 = vmatprep.subr.bf16.mxu0 %v9426_v52 }
 0x580   : > { %7715 = vmatmul.mubr.bf16.gmra.mrb[104].mxu0 %v8276_v11 }
 0x581   : > { %7731 = vmatpush3.bf16.msra.mxu0 %v9426_v52  ;;  %7718 = vmatprep.mubr.bf16.mxu0 %v8277_v49  ;;  %v8280_v52 = vld [vmem:[%s9998_s3 + $0x1c8] sm:$0xff]  }
 0x582   : > { %7732 = vmatprep.subr.bf16.mxu0 %v9453_v63 }
 0x585   : > { %7733 = vmatpush3.bf16.msra.mxu0 %v9453_v63  ;;  %v8281_v63 = vld [vmem:[%s9998_s3 + $0x1d0] sm:$0xff]  }
 0x586   : > { %7734 = vmatprep.subr.bf16.mxu0 %v9463_v8 }
 0x588   : > { %7719 = vmatmul.mubr.bf16.gmra.mrb[108].mxu0 %v8278_v10 }
 0x589   : > { %7735 = vmatpush3.bf16.msra.mxu0 %v9463_v8  ;;  %7738 = vmatprep.mubr.bf16.mxu0 %v8279_v30  ;;  %v8282_v8 = vld [vmem:[%s9998_s3 + $0x1d8] sm:$0xff]  }
 0x58a   : > { %7736 = vmatprep.subr.bf16.mxu0 %v9460_v17 }
 0x58d   : > { %7737 = vmatpush3.bf16.msra.mxu0 %v9460_v17  ;;  %v8283_v17 = vld [vmem:[%s9998_s3 + $0x1e0] sm:$0xff]  }
 0x58e   : > { %7786 = vmatprep.subr.bf16.mxu0 %v9668_v50 }
 0x590   : > { %7739 = vmatmul.mubr.bf16.vlgmr.msra.gmra.mrb[96].mxu0 %v8280_v52  ;;  %v5402_v52 = vpop.permute.xlu1 %5401 }
 0x591   : > { %7787 = vmatpush3.bf16.msra.mxu0 %v9668_v50  ;;  %7742 = vmatprep.mubr.bf16.mxu0 %v8281_v63  ;;  %v8284_v50 = vld [vmem:[%s9998_s3 + $0x1e8] sm:$0xff]  }
 0x592   : > { %7788 = vmatprep.subr.bf16.mxu0 %v9666_v5 }
 0x595   : > { %7789 = vmatpush3.bf16.msra.mxu0 %v9666_v5  ;;  %v8285_v5 = vld [vmem:[%s9998_s3 + $0x1f0] sm:$0xff]  }
 0x596   : > { %7790 = vmatprep.subr.bf16.mxu0 %v9672_v21 }
 0x598   : > { %7743 = vmatmul.mubr.bf16.gmra.mrb[100].mxu0 %v8282_v8 }
 0x599   : > { %7791 = vmatpush3.bf16.msra.mxu0 %v9672_v21  ;;  %7746 = vmatprep.mubr.bf16.mxu0 %v8283_v17  ;;  %v8286_v21 = vld [vmem:[%s9998_s3 + $0x1f8] sm:$0xff]  }
 0x59a   : > { %7792 = vmatprep.subr.bf16.mxu0 %v9670_v45 }
 0x59d   : > { %7793 = vmatpush3.bf16.msra.mxu0 %v9670_v45  ;;  %v8287_v45 = vld [vmem:[%s9998_s3 + $0x200] sm:$0xff]  }
 0x59e   : > { %7794 = vmatprep.subr.bf16.mxu0 %v9676_v40 }
 0x5a0   : > { %7747 = vmatmul.mubr.bf16.gmra.mrb[104].mxu0 %v8284_v50 }
 0x5a1   : > { %7795 = vmatpush3.bf16.msra.mxu0 %v9676_v40  ;;  %7750 = vmatprep.mubr.bf16.mxu0 %v8285_v5  ;;  %v8288_v40 = vld [vmem:[%s9998_s3 + $0x208] sm:$0xff]  }
 0x5a2   : > { %7796 = vmatprep.subr.bf16.mxu0 %v9674_v31 }
 0x5a5   : > { %7797 = vmatpush3.bf16.msra.mxu0 %v9674_v31  ;;  %v8289_v31 = vld [vmem:[%s9998_s3 + $0x210] sm:$0xff]  }
 0x5a6   : > { %7798 = vmatprep.subr.bf16.mxu0 %v9680_v62 }
 0x5a8   : > { %7751 = vmatmul.mubr.bf16.gmra.mrb[108].mxu0 %v8286_v21 }
 0x5a9   : > { %7799 = vmatpush3.bf16.msra.mxu0 %v9680_v62  ;;  %7802 = vmatprep.mubr.bf16.mxu0 %v8287_v45  ;;  %v8291_v62 = vld [vmem:[%s9998_s3 + $0x220] sm:$0xff]   ;;  %v5407_v45 = vpop.permute.xlu0 %5406 }
 0x5aa   : > { %7800 = vmatprep.subr.bf16.mxu0 %v9678_v35 }
 0x5ad   : > { %7801 = vmatpush3.bf16.msra.mxu0 %v9678_v35  ;;  %v8292_v35 = vld [vmem:[%s9998_s3 + $0x228] sm:$0xff]  }
 0x5b0   : > { %7803 = vmatmul.mubr.bf16.vlgmr.msra.gmra.mrb[96].mxu0 %v8288_v40 }
 0x5b1   : > { %7806 = vmatprep.mubr.bf16.mxu0 %v8289_v31 }
 0x5b8   : > { %7807 = vmatmul.mubr.bf16.gmra.mrb[100].mxu0 %v8290_v61 }
 0x5b9   : > { %7810 = vmatprep.mubr.bf16.mxu0 %v8291_v62 }
 0x5c0   : > { %7811 = vmatmul.mubr.bf16.gmra.mrb[104].mxu0 %v8292_v35  ;;  %v5412_v35 = vpop.permute.xlu1 %5411 }
 0x5c1   : > { %7814 = vmatprep.mubr.bf16.mxu0 %v8293_v16 }
 0x5c8   : > { %7815 = vmatmul.mubr.bf16.gmra.mrb[108].mxu0 %v8294_v7 }
 0x683   : > { %v7804_v13 = vpop.f32.mrb[96].mxu0 }
 0x684   : > { %v5416_v53 = vadd.f32 %v7804_v13, %v5347_v57  ;;  %v5239_v6 = vpop.f32.mrb[97].mxu0 }
 0x685   : > { %v5414_v33 = vadd.f32 %v5337_v34, %v5239_v6  ;;  %v7805_v29 = vpop.f32.mrb[98].mxu0  ;;  %v8297_v6 = vld [vmem:[%s10000_s5 + $0x10] sm:$0xff]  }
 0x686   : > { %v5417_v26 = vadd.f32 %v7805_v29, %v5352_v59  ;;  %v5242_v24 = vpop.f32.mrb[99].mxu0  ;;  %v5432_v9 = vmax.f32 %v5416_v53, 0.0  ;;  %v8296_v53 = vld [vmem:[%s10000_s5 + $0x8] sm:$0xff]  }
 0x687   : > { %v5415_v39 = vadd.f32 %v5342_v14, %v5242_v24  ;;  %v5430_v22 = vmax.f32 %v5414_v33, 0.0  ;;  %v8299_v33 = vld [vmem:[%s10000_s5 + $0x20] sm:$0xff]   ;;  %v8300_v29 = vld [vmem:[%s10000_s5 + $0x28] sm:$0xff]   ;;  %v8302_v24 = vld [vmem:[%s10000_s5 + $0x38] sm:$0xff]  }
 0x688   : > { %v5433_v51 = vmax.f32 %v5417_v26, 0.0  ;;  %v8301_v26 = vld [vmem:[%s10000_s5 + $0x30] sm:$0xff]  }
 0x689   : > { %v5431_v54 = vmax.f32 %v5415_v39, 0.0  ;;  %v5489_v39 = vpop.permute.xlu0 %5488 }
 0x68a   : > { %v5463_v46 = vpack.c.bf16 %v5433_v51, %v5432_v9  ;;  %v5494_v9 = vpop.permute.xlu1 %5493 }
 0x68b   : > { %v5462_v2 = vpack.c.bf16 %v5431_v54, %v5430_v22  ;;  %v7808_v32 = vpop.f32.mrb[100].mxu0 }
 0x68c   : > { %v5420_v0 = vadd.f32 %v7808_v32, %v5367_v36  ;;  %v5255_v43 = vpop.f32.mrb[101].mxu0 }
 0x68d   : > { %v5418_v4 = vadd.f32 %v5357_v60, %v5255_v43  ;;  %v7809_v58 = vpop.f32.mrb[102].mxu0  ;;  %7818 = vmatprep.subr.bf16.mxu1 %v5462_v2  ;;  %v5499_v51 = vpop.permute.xlu0 %5498 }
 0x68e   : > { %v5421_v27 = vadd.f32 %v7809_v58, %v5372_v25  ;;  %v5258_v48 = vpop.f32.mrb[103].mxu0  ;;  %7819 = vmatpush3.bf16.msra.mxu1 %v5462_v2  ;;  %v5436_v41 = vmax.f32 %v5420_v0, 0.0  ;;  %v8298_v25 = vld [vmem:[%s10000_s5 + $0x18] sm:$0xff]  }
 0x68f   : > { %v5419_v56 = vadd.f32 %v5362_v20, %v5258_v48  ;;  %7820 = vmatprep.subr.bf16.mxu1 %v5463_v46  ;;  %v5434_v47 = vmax.f32 %v5418_v4, 0.0 }
 0x690   : > { %v5437_v15 = vmax.f32 %v5421_v27, 0.0 }
 0x691   : > { %v5435_v18 = vmax.f32 %v5419_v56, 0.0  ;;  %v5509_v22 = vpop.permute.xlu0 %5508 }
 0x692   : > { %v5465_v37 = vpack.c.bf16 %v5437_v15, %v5436_v41  ;;  %7821 = vmatpush3.bf16.msra.mxu1 %v5463_v46 }
 0x693   : > { %v5464_v1 = vpack.c.bf16 %v5435_v18, %v5434_v47  ;;  %v7812_v42 = vpop.f32.mrb[104].mxu0 }
 0x694   : > { %v5424_v38 = vadd.f32 %v7812_v42, %v5387_v44  ;;  %v5271_v19 = vpop.f32.mrb[105].mxu0 }
 0x695   : > { %v5422_v11 = vadd.f32 %v5377_v23, %v5271_v19  ;;  %v7813_v49 = vpop.f32.mrb[106].mxu0  ;;  %7822 = vmatprep.subr.bf16.mxu1 %v5464_v1  ;;  %v5504_v23 = vpop.permute.xlu1 %5503 }
 0x696   : > { %v5425_v10 = vadd.f32 %v7813_v49, %v5392_v28  ;;  %v5274_v30 = vpop.f32.mrb[107].mxu0  ;;  %7823 = vmatpush3.bf16.msra.mxu1 %v5464_v1  ;;  %v5440_v8 = vmax.f32 %v5424_v38, 0.0  ;;  %v5519_v46 = vpop.permute.xlu0 %5518 }
 0x697   : > { %v5423_v63 = vadd.f32 %v5382_v12, %v5274_v30  ;;  %7824 = vmatprep.subr.bf16.mxu1 %v5465_v37  ;;  %v5438_v50 = vmax.f32 %v5422_v11, 0.0 }
 0x698   : > { %v5441_v17 = vmax.f32 %v5425_v10, 0.0 }
 0x699   : > { %v5439_v5 = vmax.f32 %v5423_v63, 0.0  ;;  %v5514_v54 = vpop.permute.xlu1 %5513 }
 0x69a   : > { %v5467_v21 = vpack.c.bf16 %v5441_v17, %v5440_v8  ;;  %7825 = vmatpush3.bf16.msra.mxu1 %v5465_v37  ;;  %v5529_v28 = vpop.permute.xlu0 %5528 }
 0x69b   : > { %v5466_v40 = vpack.c.bf16 %v5439_v5, %v5438_v50  ;;  %v7816_v31 = vpop.f32.mrb[108].mxu0 }
 0x69c   : > { %v5428_v61 = vadd.f32 %v7816_v31, %v5407_v45  ;;  %v5287_v62 = vpop.f32.mrb[109].mxu0 }
 0x69d   : > { %v5426_v16 = vadd.f32 %v5397_v55, %v5287_v62  ;;  %v7817_v7 = vpop.f32.mrb[110].mxu0  ;;  %7826 = vmatprep.subr.bf16.mxu1 %v5466_v40  ;;  %v5524_v0 = vpop.permute.xlu1 %5523 }
 0x69e   : > { %v5429_v3 = vadd.f32 %v7817_v7, %v5412_v35  ;;  %v5290_v34 = vpop.f32.mrb[111].mxu0  ;;  %7827 = vmatpush3.bf16.msra.mxu1 %v5466_v40  ;;  %v5444_v57 = vmax.f32 %v5428_v61, 0.0  ;;  %v5539_v63 = vpop.permute.xlu0 %5538 }
 0x69f   : > { %v5427_v14 = vadd.f32 %v5402_v52, %v5290_v34  ;;  %7828 = vmatprep.subr.bf16.mxu1 %v5467_v21  ;;  %v5442_v60 = vmax.f32 %v5426_v16, 0.0 }
 0x6a0   : > { %v5445_v59 = vmax.f32 %v5429_v3, 0.0 }
 0x6a1   : > { %v5443_v20 = vmax.f32 %v5427_v14, 0.0  ;;  %v5534_v1 = vpop.permute.xlu1 %5533 }
 0x6a2   : > { %v5469_v36 = vpack.c.bf16 %v5445_v59, %v5444_v57  ;;  %7829 = vmatpush3.bf16.msra.mxu1 %v5467_v21  ;;  %v5549_v34 = vpop.permute.xlu0 %5548 }
 0x6a3   : > { %v5468_v13 = vpack.c.bf16 %v5443_v20, %v5442_v60 }
 0x6a5   : > { %7830 = vmatprep.subr.bf16.mxu1 %v5468_v13  ;;  %v5544_v21 = vpop.permute.xlu1 %5543 }
 0x6a6   : > { %7831 = vmatpush3.bf16.msra.mxu1 %v5468_v13 }
 0x6a7   : > { %7832 = vmatprep.subr.bf16.mxu1 %v5469_v36 }
 0x6aa   : > { %7833 = vmatpush3.bf16.msra.mxu1 %v5469_v36 }
 0x6ad   : > { %7835 = vmatmul.mubr.bf16.vlgmr.msra.gmra.mrb[96].mxu1 %v8296_v53 }
 0x6ae   : > { %7838 = vmatprep.mubr.bf16.mxu1 %v8297_v6 }
 0x6b5   : > { %7839 = vmatmul.mubr.bf16.gmra.mrb[100].mxu1 %v8298_v25  ;;  %v5554_v25 = vpop.permute.xlu1 %5553 }
 0x6b6   : > { %7842 = vmatprep.mubr.bf16.mxu1 %v8299_v33 }
 0x6bd   : > { %7843 = vmatmul.mubr.bf16.gmra.mrb[104].mxu1 %v8300_v29 }
 0x6be   : > { %7846 = vmatprep.mubr.bf16.mxu1 %v8301_v26 }
 0x6c5   : > { %7847 = vmatmul.mubr.bf16.gmra.mrb[108].mxu1 %v8302_v24 }
 0x780   : > { %v7836_v12 = vpop.f32.mrb[96].mxu1 }
 0x781   : > { %v5657_v2 = vadd.f32 %v7836_v12, %v5499_v51  ;;  %v5648_v32 = vpop.f32.mrb[97].mxu1 }
 0x782   : > { %v5649_v43 = vadd.f32 %v5648_v32, %v5489_v39  ;;  %v7837_v4 = vpop.f32.mrb[98].mxu1 }
 0x783   : > { %v5713_v58 = vsub.f32 0.0, %v5657_v2  ;;  %v5660_v27 = vadd.f32 %v7837_v4, %v5504_v23  ;;  %v5651_v48 = vpop.f32.mrb[99].mxu1  ;;  %v5564_v4 = vpop.permute.xlu1 %5563 }
 0x784   : > { %v5711_v44 = vsub.f32 0.0, %v5649_v43  ;;  %v5652_v56 = vadd.f32 %v5651_v48, %v5494_v9 }
 0x785   : > { %v5731_v41 = vmul.f32 1.442695, %v5713_v58  ;;  %v5714_v15 = vsub.f32 0.0, %v5660_v27 }
 0x786   : > { %v5727_v47 = vmul.f32 1.442695, %v5711_v44  ;;  %v5712_v18 = vsub.f32 0.0, %v5652_v56 }
 0x787   : > { %8303 = vpow2.f32 %v5731_v41  ;;  %v5733_v37 = vmul.f32 1.442695, %v5714_v15 }
 0x788   : > { %8305 = vpow2.f32 %v5727_v47  ;;  %v5729_v42 = vmul.f32 1.442695, %v5712_v18  ;;  %v7840_v38 = vpop.f32.mrb[100].mxu1 }
 0x789   : > { %8307 = vpow2.f32 %v5733_v37  ;;  %v5673_v19 = vadd.f32 %v7840_v38, %v5519_v46  ;;  %v5664_v55 = vpop.f32.mrb[101].mxu1 }
 0x78a   : > { %8309 = vpow2.f32 %v5729_v42  ;;  %v5665_v11 = vadd.f32 %v5664_v55, %v5509_v22  ;;  %v7841_v49 = vpop.f32.mrb[102].mxu1 }
 0x78b   : > { %v5717_v10 = vsub.f32 0.0, %v5673_v19  ;;  %v5676_v30 = vadd.f32 %v7841_v49, %v5524_v0  ;;  %v5667_v52 = vpop.f32.mrb[103].mxu1 }
 0x78c   : > { %v5715_v8 = vsub.f32 0.0, %v5665_v11  ;;  %v5668_v17 = vadd.f32 %v5667_v52, %v5514_v54  ;;  %v5559_v54 = vpop.permute.xlu0 %5558 }
 0x78d   : > { %v5739_v50 = vmul.f32 1.442695, %v5717_v10  ;;  %v5718_v5 = vsub.f32 0.0, %v5676_v30 }
 0x78e   : > { %v5735_v45 = vmul.f32 1.442695, %v5715_v8  ;;  %v5716_v40 = vsub.f32 0.0, %v5668_v17 }
 0x78f   : > { %8311 = vpow2.f32 %v5739_v50  ;;  %v5741_v31 = vmul.f32 1.442695, %v5718_v5 }
 0x790   : > { %8313 = vpow2.f32 %v5735_v45  ;;  %v5737_v61 = vmul.f32 1.442695, %v5716_v40  ;;  %v7844_v62 = vpop.f32.mrb[104].mxu1 }
 0x791   : > { %v8304_v35 = vpop.eup %8303  ;;  %8315 = vpow2.f32 %v5741_v31  ;;  %v5689_v16 = vadd.f32 %v7844_v62, %v5539_v63  ;;  %v5680_v7 = vpop.f32.mrb[105].mxu1 }
 0x792   : > { %v8306_v3 = vpop.eup %8305  ;;  %v5761_v14 = vadd.f32 1.0, %v8304_v35  ;;  %8317 = vpow2.f32 %v5737_v61  ;;  %v5681_v57 = vadd.f32 %v5680_v7, %v5529_v28  ;;  %v7845_v59 = vpop.f32.mrb[106].mxu1 }
 0x793   : > { %v8308_v60 = vpop.eup %8307  ;;  %v5759_v20 = vadd.f32 1.0, %v8306_v3  ;;  %v5721_v36 = vsub.f32 0.0, %v5689_v16  ;;  %v5692_v13 = vadd.f32 %v7845_v59, %v5544_v21  ;;  %v5683_v53 = vpop.f32.mrb[107].mxu1 }
 0x794   : > { %v8310_v6 = vpop.eup %8309  ;;  %8319 = vrcp.f32 %v5761_v14  ;;  %v5762_v33 = vadd.f32 1.0, %v8308_v60  ;;  %v5719_v29 = vsub.f32 0.0, %v5681_v57  ;;  %v5684_v26 = vadd.f32 %v5683_v53, %v5534_v1 }
 0x795   : > { %8321 = vrcp.f32 %v5759_v20  ;;  %v5760_v24 = vadd.f32 1.0, %v8310_v6  ;;  %v5747_v39 = vmul.f32 1.442695, %v5721_v36  ;;  %v5722_v9 = vsub.f32 0.0, %v5692_v13 }
 0x796   : > { %8323 = vrcp.f32 %v5762_v33  ;;  %v5743_v51 = vmul.f32 1.442695, %v5719_v29  ;;  %v5720_v23 = vsub.f32 0.0, %v5684_v26 }
 0x797   : > { %8325 = vrcp.f32 %v5760_v24  ;;  %v5749_v22 = vmul.f32 1.442695, %v5722_v9 }
 0x798   : > { %8327 = vpow2.f32 %v5747_v39  ;;  %v5745_v46 = vmul.f32 1.442695, %v5720_v23  ;;  %v7848_v12 = vpop.f32.mrb[108].mxu1 }
 0x799   : > { %v8312_v2 = vpop.eup %8311  ;;  %8329 = vpow2.f32 %v5743_v51  ;;  %v5705_v32 = vadd.f32 %v7848_v12, %v5559_v54  ;;  %v5696_v0 = vpop.f32.mrb[109].mxu1 }
 0x79a   : > { %v8314_v43 = vpop.eup %8313  ;;  %v5765_v58 = vadd.f32 1.0, %v8312_v2  ;;  %8331 = vpow2.f32 %v5749_v22  ;;  %v5697_v27 = vadd.f32 %v5696_v0, %v5549_v34  ;;  %v7849_v48 = vpop.f32.mrb[110].mxu1 }
 0x79b   : > { %v8316_v44 = vpop.eup %8315  ;;  %v5763_v56 = vadd.f32 1.0, %v8314_v43  ;;  %8333 = vpow2.f32 %v5745_v46  ;;  %v5725_v41 = vsub.f32 0.0, %v5705_v32  ;;  %v5708_v15 = vadd.f32 %v7849_v48, %v5564_v4  ;;  %v5699_v28 = vpop.f32.mrb[111].mxu1 }
 0x79c   : > { %v8318_v47 = vpop.eup %8317  ;;  %8335 = vrcp.f32 %v5765_v58  ;;  %v5766_v18 = vadd.f32 1.0, %v8316_v44  ;;  %v5723_v37 = vsub.f32 0.0, %v5697_v27  ;;  %v5700_v1 = vadd.f32 %v5699_v28, %v5554_v25 }
 0x79d   : > { %8337 = vrcp.f32 %v5763_v56  ;;  %v5764_v42 = vadd.f32 1.0, %v8318_v47  ;;  %v5755_v38 = vmul.f32 1.442695, %v5725_v41  ;;  %v5726_v19 = vsub.f32 0.0, %v5708_v15 }
 0x79e   : > { %v8320_v55 = vpop.eup %8319  ;;  %8339 = vrcp.f32 %v5766_v18  ;;  %v5751_v11 = vmul.f32 1.442695, %v5723_v37  ;;  %v5724_v49 = vsub.f32 0.0, %v5700_v1 }
 0x79f   : > { %v8322_v10 = vpop.eup %8321  ;;  %5809 = vst [vmem:[%s9974_s10 + $0x10] sm:$0xff] %v8320_v55  ;;  %8341 = vrcp.f32 %v5764_v42  ;;  %v5757_v30 = vmul.f32 1.442695, %v5726_v19 }
 0x7a0   : > { %v8324_v52 = vpop.eup %8323  ;;  %5807 = vst [vmem:[%s9974_s10] sm:$0xff] %v8322_v10  ;;  %8343 = vpow2.f32 %v5755_v38  ;;  %v5753_v63 = vmul.f32 1.442695, %v5724_v49 }
 0x7a1   : > { %v8326_v8 = vpop.eup %8325  ;;  %5810 = vst [vmem:[%s9974_s10 + $0x18] sm:$0xff] %v8324_v52  ;;  %8345 = vpow2.f32 %v5751_v11 }
 0x7a2   : > { %v8328_v17 = vpop.eup %8327  ;;  %5808 = vst [vmem:[%s9974_s10 + $0x8] sm:$0xff] %v8326_v8  ;;  %8347 = vpow2.f32 %v5757_v30 }
 0x7a3   : > { %v8330_v50 = vpop.eup %8329  ;;  %v5769_v5 = vadd.f32 1.0, %v8328_v17  ;;  %8349 = vpow2.f32 %v5753_v63 }
 0x7a4   : > { %v8332_v21 = vpop.eup %8331  ;;  %v5767_v45 = vadd.f32 1.0, %v8330_v50 }
 0x7a5   : > { %v8334_v40 = vpop.eup %8333  ;;  %8351 = vrcp.f32 %v5769_v5  ;;  %v5770_v31 = vadd.f32 1.0, %v8332_v21 }
 0x7a6   : > { %v8336_v61 = vpop.eup %8335  ;;  %8353 = vrcp.f32 %v5767_v45  ;;  %v5768_v62 = vadd.f32 1.0, %v8334_v40 }
 0x7a7   : > { %v8338_v35 = vpop.eup %8337  ;;  %5813 = vst [vmem:[%s9974_s10 + $0x30] sm:$0xff] %v8336_v61  ;;  %8355 = vrcp.f32 %v5770_v31 }
 0x7a8   : > { %v8340_v16 = vpop.eup %8339  ;;  %5811 = vst [vmem:[%s9974_s10 + $0x20] sm:$0xff] %v8338_v35  ;;  %8357 = vrcp.f32 %v5768_v62 }
 0x7a9   : > { %v8342_v7 = vpop.eup %8341  ;;  %5814 = vst [vmem:[%s9974_s10 + $0x38] sm:$0xff] %v8340_v16 }
 0x7aa   : > { %v8344_v3 = vpop.eup %8343  ;;  %5812 = vst [vmem:[%s9974_s10 + $0x28] sm:$0xff] %v8342_v7 }
 0x7ab   : > { %v8346_v34 = vpop.eup %8345  ;;  %v5773_v14 = vadd.f32 1.0, %v8344_v3 }
 0x7ac   : > { %v8348_v57 = vpop.eup %8347  ;;  %v5771_v59 = vadd.f32 1.0, %v8346_v34 }
 0x7ad   : > { %v8350_v60 = vpop.eup %8349  ;;  %8359 = vrcp.f32 %v5773_v14  ;;  %v5774_v20 = vadd.f32 1.0, %v8348_v57 }
 0x7ae   : > { %8361 = vrcp.f32 %v5771_v59  ;;  %v5772_v36 = vadd.f32 1.0, %v8350_v60 }
 0x7af   : > { %v8352_v13 = vpop.eup %8351  ;;  %8363 = vrcp.f32 %v5774_v20 }
 0x7b0   : > { %v8354_v53 = vpop.eup %8353  ;;  %5817 = vst [vmem:[%s9974_s10 + $0x50] sm:$0xff] %v8352_v13  ;;  %8365 = vrcp.f32 %v5772_v36 }
 0x7b1   : > { %v8356_v6 = vpop.eup %8355  ;;  %5815 = vst [vmem:[%s9974_s10 + $0x40] sm:$0xff] %v8354_v53 }
 0x7b2   : > { %v8358_v25 = vpop.eup %8357  ;;  %5818 = vst [vmem:[%s9974_s10 + $0x58] sm:$0xff] %v8356_v6 }
 0x7b3   : > { %5816 = vst [vmem:[%s9974_s10 + $0x48] sm:$0xff] %v8358_v25 }
 0x7b7   : > { %v8360_v33 = vpop.eup %8359 }
 0x7b8   : > { %v8362_v29 = vpop.eup %8361  ;;  %5821 = vst [vmem:[%s9974_s10 + $0x70] sm:$0xff] %v8360_v33 }
 0x7b9   : > { %v8364_v26 = vpop.eup %8363  ;;  %5819 = vst [vmem:[%s9974_s10 + $0x60] sm:$0xff] %v8362_v29 }
 0x7ba   : > { %v8366_v24 = vpop.eup %8365  ;;  %5822 = vst [vmem:[%s9974_s10 + $0x78] sm:$0xff] %v8364_v26 }
 0x7bb   : > { %5820 = vst [vmem:[%s9974_s10 + $0x68] sm:$0xff] %v8366_v24 }
 0x7bc PF: > { %s19_s30 = sadd.s32 1, %s8379_s30  }
 0x7bd   : > { %p16_p4 = scmp.ge.s32.totalorder %s19_s30, 4  }
 0x7bf   :  { %18 = sbr.rel (!%p16_p4) target bundleno = 1 (0x1), region = 103 }

</bundles_post_ra>
